<compile_context>
chip_gen: v6e
topology: v6e:2x2x1
jax: 0.10.0
libtpu: 0.0.40
codegen_flags: <defaults>
</compile_context>

<pallas_src>
import jax
import jax.numpy as jnp
from jax import lax
from jax.experimental import pallas as pl
from jax.experimental.pallas import tpu as pltpu


# ----------------------------------------------------------------------------
# Fused ConvBlock kernel (single invocation, everything VMEM resident).
# ----------------------------------------------------------------------------
def _make_convblock_kernel(N, D, H, W, Cin, C1, C2, eps=1e-5):
    HW = H * W
    PAD = W + 1          # enough halo for shifts in [-(W+1), W+1]
    Dout = D - 1

    def taps_of(slab, left_ok, right_ok):
        """slab: (C, H*W) -> list of 9 shifted (C, H*W) slabs (3x3 taps, pad=1)."""
        C = slab.shape[0]
        zpad = jnp.zeros((C, PAD), jnp.float32)
        padded = jnp.concatenate([zpad, slab, zpad], axis=1)   # (C, HW + 2*PAD)
        taps = []
        for kh in range(3):
            for kw in range(3):
                off = (kh - 1) * W + (kw - 1)
                t = padded[:, PAD + off: PAD + off + HW]       # static lane slice
                # Row-wrap contamination only happens at W boundaries; H boundaries
                # land in the zero padding automatically.
                if kw == 0:
                    t = t * left_ok
                elif kw == 2:
                    t = t * right_ok
                taps.append(t)
        return taps

    def kernel(x_ref, w1_ref, b1_ref, g1_ref, be1_ref,
               w2_ref, b2_ref, g2_ref, be2_ref, out_ref, z1_ref):
        # boundary-column masks, computed once
        col = lax.broadcasted_iota(jnp.int32, (1, HW), 1) % W
        left_ok = (col >= 1).astype(jnp.float32)        # source col w-1 valid
        right_ok = (col <= W - 2).astype(jnp.float32)   # source col w+1 valid

        # ---------------- conv1: kd = 1, one dot per (n, d) tile ----------------
        w1 = w1_ref[...]                                # (C1, 9*Cin)
        b1 = b1_ref[...]                                # (C1, 1)
        for n in range(N):
            for d in range(D):
                slab = x_ref[n, d]                      # (Cin, HW), lane-dense
                patches = jnp.concatenate(taps_of(slab, left_ok, right_ok), axis=0)
                y = jnp.dot(w1, patches, preferred_element_type=jnp.float32) + b1
                z1_ref[n, d] = y                        # (C1, HW)

        # ------------- BatchNorm1 (training stats) + ReLU, in VMEM --------------
        inv_cnt1 = 1.0 / float(N * D * HW)
        z1 = z1_ref[...].reshape(N * D, C1, HW)
        m1 = jnp.sum(jnp.sum(z1, axis=0), axis=-1, keepdims=True) * inv_cnt1   # (C1,1)
        c1 = z1 - m1.reshape(1, C1, 1)
        v1 = jnp.sum(jnp.sum(c1 * c1, axis=0), axis=-1, keepdims=True) * inv_cnt1
        scale1 = g1_ref[...] * lax.rsqrt(v1 + eps)      # (C1, 1)
        shift1 = be1_ref[...] - m1 * scale1
        a1 = jnp.maximum(z1 * scale1.reshape(1, C1, 1) + shift1.reshape(1, C1, 1), 0.0)
        z1_ref[...] = a1.reshape(N, D, C1, HW)

        # ---------------- conv2: kd = 2, one dot per (n, d) tile ----------------
        w2 = w2_ref[...]                                # (C2, 18*C1)
        b2 = b2_ref[...]                                # (C2, 1)
        for n in range(N):
            for d in range(Dout):
                taps = []
                for t in range(2):                      # depth taps read from VMEM
                    taps.extend(taps_of(z1_ref[n, d + t], left_ok, right_ok))
                patches = jnp.concatenate(taps, axis=0)
                y = jnp.dot(w2, patches, preferred_element_type=jnp.float32) + b2
                out_ref[n, d] = y                       # (C2, HW)

        # ------------- BatchNorm2 + ReLU applied in place on the output ---------
        inv_cnt2 = 1.0 / float(N * Dout * HW)
        z2 = out_ref[...].reshape(N * Dout, C2, HW)
        m2 = jnp.sum(jnp.sum(z2, axis=0), axis=-1, keepdims=True) * inv_cnt2
        c2 = z2 - m2.reshape(1, C2, 1)
        v2 = jnp.sum(jnp.sum(c2 * c2, axis=0), axis=-1, keepdims=True) * inv_cnt2
        scale2 = g2_ref[...] * lax.rsqrt(v2 + eps)
        shift2 = be2_ref[...] - m2 * scale2
        a2 = jnp.maximum(z2 * scale2.reshape(1, C2, 1) + shift2.reshape(1, C2, 1), 0.0)
        out_ref[...] = a2.reshape(N, Dout, C2, HW)

    return kernel


# ----------------------------------------------------------------------------
# Parameter init (PyTorch layouts / PyTorch-default-like bounds).
# ----------------------------------------------------------------------------
def init_convblock_params(key, in_channels, out_channels):
    inter = in_channels // 2 if in_channels > out_channels else out_channels // 2
    k1, k2, k3, k4 = jax.random.split(key, 4)

    def conv_init(kw_key, kb_key, kd, cin, cout):
        fan_in = cin * kd * 3 * 3
        bound = float(fan_in) ** -0.5
        w = jax.random.uniform(kw_key, (cout, cin, kd, 3, 3), jnp.float32, -bound, bound)
        b = jax.random.uniform(kb_key, (cout,), jnp.float32, -bound, bound)
        return w, b

    w1, b1 = conv_init(k1, k2, 1, in_channels, inter)
    w2, b2 = conv_init(k3, k4, 2, inter, out_channels)
    return dict(
        w1=w1, b1=b1, g1=jnp.ones((inter,), jnp.float32),
        be1=jnp.zeros((inter,), jnp.float32),
        w2=w2, b2=b2, g2=jnp.ones((out_channels,), jnp.float32),
        be2=jnp.zeros((out_channels,), jnp.float32),
    )
    # TODO(synk): BatchNorm running_mean/running_var momentum updates are a training
    # side-effect that does not change the forward output; not modeled.


# ----------------------------------------------------------------------------
# Forward wrapper: NCDHW in, NCDHW out. All heavy work inside one pallas_call.
# ----------------------------------------------------------------------------
@jax.jit
def conv_block_forward(params, x_ncdhw):
    N, Cin, D, H, W = x_ncdhw.shape
    C1 = params["w1"].shape[0]
    C2 = params["w2"].shape[0]
    HW = H * W
    Dout = D - 1

    # cheap, KB-sized layout prep: put H*W on the lane axis, depth next to batch.
    x_k = jnp.transpose(x_ncdhw.astype(jnp.float32).reshape(N, Cin, D, HW),
                        (0, 2, 1, 3))                               # (N, D, Cin, HW)
    # weights -> (Cout, kd*3*3*Cin) with (t, kh, kw, ci) ordering (matches im2col).
    w1m = jnp.transpose(params["w1"], (0, 2, 3, 4, 1)).reshape(C1, 1 * 3 * 3 * Cin)
    w2m = jnp.transpose(params["w2"], (0, 2, 3, 4, 1)).reshape(C2, 2 * 3 * 3 * C1)
    b1 = params["b1"].reshape(C1, 1)
    b2 = params["b2"].reshape(C2, 1)
    g1 = params["g1"].reshape(C1, 1)
    be1 = params["be1"].reshape(C1, 1)
    g2 = params["g2"].reshape(C2, 1)
    be2 = params["be2"].reshape(C2, 1)

    kernel = _make_convblock_kernel(N, D, H, W, Cin, C1, C2)
    vmem = pl.BlockSpec(memory_space=pltpu.MemorySpace.VMEM)

    out = pl.pallas_call(
        kernel,
        out_shape=jax.ShapeDtypeStruct((N, Dout, C2, HW), jnp.float32),
        in_specs=[vmem] * 9,
        out_specs=vmem,
        scratch_shapes=[pltpu.VMEM((N, D, C1, HW), jnp.float32)],
        compiler_params=pltpu.CompilerParams(vmem_limit_bytes=32 * 1024 * 1024),
    )(x_k, w1m, b1, g1, be1, w2m, b2, g2, be2)

    # (N, Dout, C2, H*W) -> NCDHW (tiny transpose, outside the kernel)
    return jnp.transpose(out.reshape(N, Dout, C2, H, W), (0, 2, 1, 3, 4))


# ----------------------------------------------------------------------------
# Pure-JAX reference (PyTorch semantics) for correctness checking.
# ----------------------------------------------------------------------------
def _reference_forward(params, x, eps=1e-5):
    def conv3d(x, w, b):
        y = lax.conv_general_dilated(
            x, w, window_strides=(1, 1, 1),
            padding=((0, 0), (1, 1), (1, 1)),
            dimension_numbers=("NCDHW", "OIDHW", "NCDHW"),
            precision=lax.Precision.HIGHEST)
        return y + b.reshape(1, -1, 1, 1, 1)

    def bn_relu(y, g, be):
        mean = jnp.mean(y, axis=(0, 2, 3, 4), keepdims=True)
        var = jnp.mean(jnp.square(y - mean), axis=(0, 2, 3, 4), keepdims=True)
        yn = (y - mean) * lax.rsqrt(var + eps)
        return jnp.maximum(yn * g.reshape(1, -1, 1, 1, 1)
                           + be.reshape(1, -1, 1, 1, 1), 0.0)

    y1 = bn_relu(conv3d(x, params["w1"], params["b1"]), params["g1"], params["be1"])
    y2 = bn_relu(conv3d(y1, params["w2"], params["b2"]), params["g2"], params["be2"])
    return y2


if __name__ == "__main__":
    key = jax.random.PRNGKey(0)
    kx, kp = jax.random.split(key)

    N, Cin, D, H, W = 2, 4, 3, 16, 16
    Cout = 8

    x = jax.random.normal(kx, (N, Cin, D, H, W), jnp.float32)
    params = init_convblock_params(kp, Cin, Cout)

    out = jax.block_until_ready(conv_block_forward(params, x))
    ref = jax.block_until_ready(_reference_forward(params, x))

    assert out.shape == (N, Cout, D - 1, H, W), out.shape
    assert bool(jnp.all(jnp.isfinite(out)))
    err = float(jnp.max(jnp.abs(out - ref)))
    assert err < 5e-2, f"max abs err vs reference: {err}"
    print("KERNEL_OK")
</pallas_src>

<mosaic_0001>
module attributes {stable_mosaic.version = 11 : i64} {
  func.func @kernel(%arg0: memref<2x3x4x256xf32, #tpu.memory_space<vmem>>, %arg1: memref<4x36xf32, #tpu.memory_space<vmem>>, %arg2: memref<4x1xf32, #tpu.memory_space<vmem>>, %arg3: memref<4x1xf32, #tpu.memory_space<vmem>>, %arg4: memref<4x1xf32, #tpu.memory_space<vmem>>, %arg5: memref<8x72xf32, #tpu.memory_space<vmem>>, %arg6: memref<8x1xf32, #tpu.memory_space<vmem>>, %arg7: memref<8x1xf32, #tpu.memory_space<vmem>>, %arg8: memref<8x1xf32, #tpu.memory_space<vmem>>, %arg9: memref<2x2x8x256xf32, #tpu.memory_space<vmem>>, %arg10: memref<2x3x4x256xf32, #tpu.memory_space<vmem>>) attributes {dimension_semantics = [], scalar_prefetch = 0 : i64, scratch_operands = 1 : i64, tpu.core_type = #tpu.core_type<tc>} {
    %0 = tpu.iota {dimensions = array<i32: 1>} : vector<1x256xi32>
    %c16_i32 = arith.constant 16 : i32
    %c0_i32 = arith.constant 0 : i32
    %1 = arith.cmpi eq, %c16_i32, %c0_i32 : i32
    %c1_i32 = arith.constant 1 : i32
    %2 = arith.select %1, %c1_i32, %c16_i32 : i32
    %3 = vector.broadcast %2 : i32 to vector<1x256xi32>
    %4 = arith.remsi %0, %3 : vector<1x256xi32>
    %c0_i32_0 = arith.constant 0 : i32
    %5 = vector.broadcast %c0_i32_0 : i32 to vector<1x256xi32>
    %6 = arith.cmpi ne, %4, %5 : vector<1x256xi32>
    %c0_i32_1 = arith.constant 0 : i32
    %7 = vector.broadcast %c0_i32_1 : i32 to vector<1x256xi32>
    %8 = arith.cmpi slt, %4, %7 : vector<1x256xi32>
    %c0_i32_2 = arith.constant 0 : i32
    %9 = arith.cmpi slt, %2, %c0_i32_2 : i32
    %10 = vector.broadcast %9 : i1 to vector<1x256xi1>
    %11 = vector.broadcast %10 : vector<1x256xi1> to vector<1x256xi1>
    %12 = arith.xori %8, %11 : vector<1x256xi1>
    %13 = arith.andi %12, %6 : vector<1x256xi1>
    %14 = vector.broadcast %2 : i32 to vector<1x256xi32>
    %15 = arith.addi %4, %14 : vector<1x256xi32>
    %16 = arith.select %13, %15, %4 : vector<1x256xi1>, vector<1x256xi32>
    %c1_i32_3 = arith.constant 1 : i32
    %17 = vector.broadcast %c1_i32_3 : i32 to vector<1x256xi32>
    %18 = arith.cmpi sge, %16, %17 : vector<1x256xi32>
    %19 = arith.extui %18 : vector<1x256xi1> to vector<1x256xi32>
    %20 = arith.sitofp %19 : vector<1x256xi32> to vector<1x256xf32>
    %c14_i32 = arith.constant 14 : i32
    %21 = vector.broadcast %c14_i32 : i32 to vector<1x256xi32>
    %22 = arith.cmpi sle, %16, %21 : vector<1x256xi32>
    %23 = arith.extui %22 : vector<1x256xi1> to vector<1x256xi32>
    %24 = arith.sitofp %23 : vector<1x256xi32> to vector<1x256xf32>
    %c0 = arith.constant 0 : index
    %c0_4 = arith.constant 0 : index
    %25 = vector.load %arg1[%c0, %c0_4] : memref<4x36xf32, #tpu.memory_space<vmem>>, vector<4x36xf32>
    %c0_5 = arith.constant 0 : index
    %c0_6 = arith.constant 0 : index
    %26 = vector.load %arg2[%c0_5, %c0_6] : memref<4x1xf32, #tpu.memory_space<vmem>>, vector<4x1xf32>
    %c0_7 = arith.constant 0 : index
    %c0_8 = arith.constant 0 : index
    %c0_9 = arith.constant 0 : index
    %c0_10 = arith.constant 0 : index
    %27 = vector.load %arg0[%c0_7, %c0_8, %c0_9, %c0_10] : memref<2x3x4x256xf32, #tpu.memory_space<vmem>>, vector<1x1x4x256xf32>
    %28 = vector.shape_cast %27 : vector<1x1x4x256xf32> to vector<4x256xf32>
    %cst = arith.constant 0.000000e+00 : f32
    %29 = vector.broadcast %cst : f32 to vector<4x17xf32>
    %30 = tpu.concatenate %29, %28, %29 in 1 : vector<4x17xf32>, vector<4x256xf32>, vector<4x17xf32> -> vector<4x290xf32>
    %31 = vector.extract_strided_slice %30 {offsets = [0, 0], sizes = [4, 256], strides = [1, 1]} : vector<4x290xf32> to vector<4x256xf32>
    %32 = vector.broadcast %20 : vector<1x256xf32> to vector<4x256xf32>
    %33 = arith.mulf %31, %32 : vector<4x256xf32>
    %34 = vector.extract_strided_slice %30 {offsets = [0, 1], sizes = [4, 256], strides = [1, 1]} : vector<4x290xf32> to vector<4x256xf32>
    %35 = vector.extract_strided_slice %30 {offsets = [0, 2], sizes = [4, 256], strides = [1, 1]} : vector<4x290xf32> to vector<4x256xf32>
    %36 = vector.broadcast %24 : vector<1x256xf32> to vector<4x256xf32>
    %37 = arith.mulf %35, %36 : vector<4x256xf32>
    %38 = vector.extract_strided_slice %30 {offsets = [0, 16], sizes = [4, 256], strides = [1, 1]} : vector<4x290xf32> to vector<4x256xf32>
    %39 = vector.broadcast %20 : vector<1x256xf32> to vector<4x256xf32>
    %40 = arith.mulf %38, %39 : vector<4x256xf32>
    %41 = vector.extract_strided_slice %30 {offsets = [0, 17], sizes = [4, 256], strides = [1, 1]} : vector<4x290xf32> to vector<4x256xf32>
    %42 = vector.extract_strided_slice %30 {offsets = [0, 18], sizes = [4, 256], strides = [1, 1]} : vector<4x290xf32> to vector<4x256xf32>
    %43 = vector.broadcast %24 : vector<1x256xf32> to vector<4x256xf32>
    %44 = arith.mulf %42, %43 : vector<4x256xf32>
    %45 = vector.extract_strided_slice %30 {offsets = [0, 32], sizes = [4, 256], strides = [1, 1]} : vector<4x290xf32> to vector<4x256xf32>
    %46 = vector.broadcast %20 : vector<1x256xf32> to vector<4x256xf32>
    %47 = arith.mulf %45, %46 : vector<4x256xf32>
    %48 = vector.extract_strided_slice %30 {offsets = [0, 33], sizes = [4, 256], strides = [1, 1]} : vector<4x290xf32> to vector<4x256xf32>
    %49 = vector.extract_strided_slice %30 {offsets = [0, 34], sizes = [4, 256], strides = [1, 1]} : vector<4x290xf32> to vector<4x256xf32>
    %50 = vector.broadcast %24 : vector<1x256xf32> to vector<4x256xf32>
    %51 = arith.mulf %49, %50 : vector<4x256xf32>
    %52 = tpu.concatenate %33, %34, %37, %40, %41, %44, %47, %48, %51 in 0 : vector<4x256xf32>, vector<4x256xf32>, vector<4x256xf32>, vector<4x256xf32>, vector<4x256xf32>, vector<4x256xf32>, vector<4x256xf32>, vector<4x256xf32>, vector<4x256xf32> -> vector<36x256xf32>
    %cst_11 = arith.constant dense<0.000000e+00> : vector<4x256xf32>
    %53 = tpu.matmul %25, %52, %cst_11 {dimension_numbers = #tpu.dot_dimension_numbers<[1], [0], [0], [1], [0, 0, 1, 1], [], []>} : vector<4x36xf32>, vector<36x256xf32>, vector<4x256xf32> -> vector<4x256xf32>
    %54 = vector.broadcast %26 : vector<4x1xf32> to vector<4x256xf32>
    %55 = arith.addf %53, %54 : vector<4x256xf32>
    %c0_12 = arith.constant 0 : index
    %c0_13 = arith.constant 0 : index
    %c0_14 = arith.constant 0 : index
    %c0_15 = arith.constant 0 : index
    %56 = vector.load %arg10[%c0_12, %c0_13, %c0_14, %c0_15] : memref<2x3x4x256xf32, #tpu.memory_space<vmem>>, vector<1x1x4x256xf32>
    %57 = vector.shape_cast %56 : vector<1x1x4x256xf32> to vector<4x256xf32>
    %58 = vector.shape_cast %55 : vector<4x256xf32> to vector<1x1x4x256xf32>
    tpu.vector_store %arg10[%c0_12, %c0_13, %c0_14, %c0_15], %58 {strides = array<i32>} : memref<2x3x4x256xf32, #tpu.memory_space<vmem>>, vector<1x1x4x256xf32>,
    %c0_16 = arith.constant 0 : index
    %c1 = arith.constant 1 : index
    %c0_17 = arith.constant 0 : index
    %c0_18 = arith.constant 0 : index
    %59 = vector.load %arg0[%c0_16, %c1, %c0_17, %c0_18] : memref<2x3x4x256xf32, #tpu.memory_space<vmem>>, vector<1x1x4x256xf32>
    %60 = vector.shape_cast %59 : vector<1x1x4x256xf32> to vector<4x256xf32>
    %cst_19 = arith.constant 0.000000e+00 : f32
    %61 = vector.broadcast %cst_19 : f32 to vector<4x17xf32>
    %62 = tpu.concatenate %61, %60, %61 in 1 : vector<4x17xf32>, vector<4x256xf32>, vector<4x17xf32> -> vector<4x290xf32>
    %63 = vector.extract_strided_slice %62 {offsets = [0, 0], sizes = [4, 256], strides = [1, 1]} : vector<4x290xf32> to vector<4x256xf32>
    %64 = vector.broadcast %20 : vector<1x256xf32> to vector<4x256xf32>
    %65 = arith.mulf %63, %64 : vector<4x256xf32>
    %66 = vector.extract_strided_slice %62 {offsets = [0, 1], sizes = [4, 256], strides = [1, 1]} : vector<4x290xf32> to vector<4x256xf32>
    %67 = vector.extract_strided_slice %62 {offsets = [0, 2], sizes = [4, 256], strides = [1, 1]} : vector<4x290xf32> to vector<4x256xf32>
    %68 = vector.broadcast %24 : vector<1x256xf32> to vector<4x256xf32>
    %69 = arith.mulf %67, %68 : vector<4x256xf32>
    %70 = vector.extract_strided_slice %62 {offsets = [0, 16], sizes = [4, 256], strides = [1, 1]} : vector<4x290xf32> to vector<4x256xf32>
    %71 = vector.broadcast %20 : vector<1x256xf32> to vector<4x256xf32>
    %72 = arith.mulf %70, %71 : vector<4x256xf32>
    %73 = vector.extract_strided_slice %62 {offsets = [0, 17], sizes = [4, 256], strides = [1, 1]} : vector<4x290xf32> to vector<4x256xf32>
    %74 = vector.extract_strided_slice %62 {offsets = [0, 18], sizes = [4, 256], strides = [1, 1]} : vector<4x290xf32> to vector<4x256xf32>
    %75 = vector.broadcast %24 : vector<1x256xf32> to vector<4x256xf32>
    %76 = arith.mulf %74, %75 : vector<4x256xf32>
    %77 = vector.extract_strided_slice %62 {offsets = [0, 32], sizes = [4, 256], strides = [1, 1]} : vector<4x290xf32> to vector<4x256xf32>
    %78 = vector.broadcast %20 : vector<1x256xf32> to vector<4x256xf32>
    %79 = arith.mulf %77, %78 : vector<4x256xf32>
    %80 = vector.extract_strided_slice %62 {offsets = [0, 33], sizes = [4, 256], strides = [1, 1]} : vector<4x290xf32> to vector<4x256xf32>
    %81 = vector.extract_strided_slice %62 {offsets = [0, 34], sizes = [4, 256], strides = [1, 1]} : vector<4x290xf32> to vector<4x256xf32>
    %82 = vector.broadcast %24 : vector<1x256xf32> to vector<4x256xf32>
    %83 = arith.mulf %81, %82 : vector<4x256xf32>
    %84 = tpu.concatenate %65, %66, %69, %72, %73, %76, %79, %80, %83 in 0 : vector<4x256xf32>, vector<4x256xf32>, vector<4x256xf32>, vector<4x256xf32>, vector<4x256xf32>, vector<4x256xf32>, vector<4x256xf32>, vector<4x256xf32>, vector<4x256xf32> -> vector<36x256xf32>
    %cst_20 = arith.constant dense<0.000000e+00> : vector<4x256xf32>
    %85 = tpu.matmul %25, %84, %cst_20 {dimension_numbers = #tpu.dot_dimension_numbers<[1], [0], [0], [1], [0, 0, 1, 1], [], []>} : vector<4x36xf32>, vector<36x256xf32>, vector<4x256xf32> -> vector<4x256xf32>
    %86 = vector.broadcast %26 : vector<4x1xf32> to vector<4x256xf32>
    %87 = arith.addf %85, %86 : vector<4x256xf32>
    %c0_21 = arith.constant 0 : index
    %c1_22 = arith.constant 1 : index
    %c0_23 = arith.constant 0 : index
    %c0_24 = arith.constant 0 : index
    %88 = vector.load %arg10[%c0_21, %c1_22, %c0_23, %c0_24] : memref<2x3x4x256xf32, #tpu.memory_space<vmem>>, vector<1x1x4x256xf32>
    %89 = vector.shape_cast %88 : vector<1x1x4x256xf32> to vector<4x256xf32>
    %90 = vector.shape_cast %87 : vector<4x256xf32> to vector<1x1x4x256xf32>
    tpu.vector_store %arg10[%c0_21, %c1_22, %c0_23, %c0_24], %90 {strides = array<i32>} : memref<2x3x4x256xf32, #tpu.memory_space<vmem>>, vector<1x1x4x256xf32>,
    %c0_25 = arith.constant 0 : index
    %c2 = arith.constant 2 : index
    %c0_26 = arith.constant 0 : index
    %c0_27 = arith.constant 0 : index
    %91 = vector.load %arg0[%c0_25, %c2, %c0_26, %c0_27] : memref<2x3x4x256xf32, #tpu.memory_space<vmem>>, vector<1x1x4x256xf32>
    %92 = vector.shape_cast %91 : vector<1x1x4x256xf32> to vector<4x256xf32>
    %cst_28 = arith.constant 0.000000e+00 : f32
    %93 = vector.broadcast %cst_28 : f32 to vector<4x17xf32>
    %94 = tpu.concatenate %93, %92, %93 in 1 : vector<4x17xf32>, vector<4x256xf32>, vector<4x17xf32> -> vector<4x290xf32>
    %95 = vector.extract_strided_slice %94 {offsets = [0, 0], sizes = [4, 256], strides = [1, 1]} : vector<4x290xf32> to vector<4x256xf32>
    %96 = vector.broadcast %20 : vector<1x256xf32> to vector<4x256xf32>
    %97 = arith.mulf %95, %96 : vector<4x256xf32>
    %98 = vector.extract_strided_slice %94 {offsets = [0, 1], sizes = [4, 256], strides = [1, 1]} : vector<4x290xf32> to vector<4x256xf32>
    %99 = vector.extract_strided_slice %94 {offsets = [0, 2], sizes = [4, 256], strides = [1, 1]} : vector<4x290xf32> to vector<4x256xf32>
    %100 = vector.broadcast %24 : vector<1x256xf32> to vector<4x256xf32>
    %101 = arith.mulf %99, %100 : vector<4x256xf32>
    %102 = vector.extract_strided_slice %94 {offsets = [0, 16], sizes = [4, 256], strides = [1, 1]} : vector<4x290xf32> to vector<4x256xf32>
    %103 = vector.broadcast %20 : vector<1x256xf32> to vector<4x256xf32>
    %104 = arith.mulf %102, %103 : vector<4x256xf32>
    %105 = vector.extract_strided_slice %94 {offsets = [0, 17], sizes = [4, 256], strides = [1, 1]} : vector<4x290xf32> to vector<4x256xf32>
    %106 = vector.extract_strided_slice %94 {offsets = [0, 18], sizes = [4, 256], strides = [1, 1]} : vector<4x290xf32> to vector<4x256xf32>
    %107 = vector.broadcast %24 : vector<1x256xf32> to vector<4x256xf32>
    %108 = arith.mulf %106, %107 : vector<4x256xf32>
    %109 = vector.extract_strided_slice %94 {offsets = [0, 32], sizes = [4, 256], strides = [1, 1]} : vector<4x290xf32> to vector<4x256xf32>
    %110 = vector.broadcast %20 : vector<1x256xf32> to vector<4x256xf32>
    %111 = arith.mulf %109, %110 : vector<4x256xf32>
    %112 = vector.extract_strided_slice %94 {offsets = [0, 33], sizes = [4, 256], strides = [1, 1]} : vector<4x290xf32> to vector<4x256xf32>
    %113 = vector.extract_strided_slice %94 {offsets = [0, 34], sizes = [4, 256], strides = [1, 1]} : vector<4x290xf32> to vector<4x256xf32>
    %114 = vector.broadcast %24 : vector<1x256xf32> to vector<4x256xf32>
    %115 = arith.mulf %113, %114 : vector<4x256xf32>
    %116 = tpu.concatenate %97, %98, %101, %104, %105, %108, %111, %112, %115 in 0 : vector<4x256xf32>, vector<4x256xf32>, vector<4x256xf32>, vector<4x256xf32>, vector<4x256xf32>, vector<4x256xf32>, vector<4x256xf32>, vector<4x256xf32>, vector<4x256xf32> -> vector<36x256xf32>
    %cst_29 = arith.constant dense<0.000000e+00> : vector<4x256xf32>
    %117 = tpu.matmul %25, %116, %cst_29 {dimension_numbers = #tpu.dot_dimension_numbers<[1], [0], [0], [1], [0, 0, 1, 1], [], []>} : vector<4x36xf32>, vector<36x256xf32>, vector<4x256xf32> -> vector<4x256xf32>
    %118 = vector.broadcast %26 : vector<4x1xf32> to vector<4x256xf32>
    %119 = arith.addf %117, %118 : vector<4x256xf32>
    %c0_30 = arith.constant 0 : index
    %c2_31 = arith.constant 2 : index
    %c0_32 = arith.constant 0 : index
    %c0_33 = arith.constant 0 : index
    %120 = vector.load %arg10[%c0_30, %c2_31, %c0_32, %c0_33] : memref<2x3x4x256xf32, #tpu.memory_space<vmem>>, vector<1x1x4x256xf32>
    %121 = vector.shape_cast %120 : vector<1x1x4x256xf32> to vector<4x256xf32>
    %122 = vector.shape_cast %119 : vector<4x256xf32> to vector<1x1x4x256xf32>
    tpu.vector_store %arg10[%c0_30, %c2_31, %c0_32, %c0_33], %122 {strides = array<i32>} : memref<2x3x4x256xf32, #tpu.memory_space<vmem>>, vector<1x1x4x256xf32>,
    %c1_34 = arith.constant 1 : index
    %c0_35 = arith.constant 0 : index
    %c0_36 = arith.constant 0 : index
    %c0_37 = arith.constant 0 : index
    %123 = vector.load %arg0[%c1_34, %c0_35, %c0_36, %c0_37] : memref<2x3x4x256xf32, #tpu.memory_space<vmem>>, vector<1x1x4x256xf32>
    %124 = vector.shape_cast %123 : vector<1x1x4x256xf32> to vector<4x256xf32>
    %cst_38 = arith.constant 0.000000e+00 : f32
    %125 = vector.broadcast %cst_38 : f32 to vector<4x17xf32>
    %126 = tpu.concatenate %125, %124, %125 in 1 : vector<4x17xf32>, vector<4x256xf32>, vector<4x17xf32> -> vector<4x290xf32>
    %127 = vector.extract_strided_slice %126 {offsets = [0, 0], sizes = [4, 256], strides = [1, 1]} : vector<4x290xf32> to vector<4x256xf32>
    %128 = vector.broadcast %20 : vector<1x256xf32> to vector<4x256xf32>
    %129 = arith.mulf %127, %128 : vector<4x256xf32>
    %130 = vector.extract_strided_slice %126 {offsets = [0, 1], sizes = [4, 256], strides = [1, 1]} : vector<4x290xf32> to vector<4x256xf32>
    %131 = vector.extract_strided_slice %126 {offsets = [0, 2], sizes = [4, 256], strides = [1, 1]} : vector<4x290xf32> to vector<4x256xf32>
    %132 = vector.broadcast %24 : vector<1x256xf32> to vector<4x256xf32>
    %133 = arith.mulf %131, %132 : vector<4x256xf32>
    %134 = vector.extract_strided_slice %126 {offsets = [0, 16], sizes = [4, 256], strides = [1, 1]} : vector<4x290xf32> to vector<4x256xf32>
    %135 = vector.broadcast %20 : vector<1x256xf32> to vector<4x256xf32>
    %136 = arith.mulf %134, %135 : vector<4x256xf32>
    %137 = vector.extract_strided_slice %126 {offsets = [0, 17], sizes = [4, 256], strides = [1, 1]} : vector<4x290xf32> to vector<4x256xf32>
    %138 = vector.extract_strided_slice %126 {offsets = [0, 18], sizes = [4, 256], strides = [1, 1]} : vector<4x290xf32> to vector<4x256xf32>
    %139 = vector.broadcast %24 : vector<1x256xf32> to vector<4x256xf32>
    %140 = arith.mulf %138, %139 : vector<4x256xf32>
    %141 = vector.extract_strided_slice %126 {offsets = [0, 32], sizes = [4, 256], strides = [1, 1]} : vector<4x290xf32> to vector<4x256xf32>
    %142 = vector.broadcast %20 : vector<1x256xf32> to vector<4x256xf32>
    %143 = arith.mulf %141, %142 : vector<4x256xf32>
    %144 = vector.extract_strided_slice %126 {offsets = [0, 33], sizes = [4, 256], strides = [1, 1]} : vector<4x290xf32> to vector<4x256xf32>
    %145 = vector.extract_strided_slice %126 {offsets = [0, 34], sizes = [4, 256], strides = [1, 1]} : vector<4x290xf32> to vector<4x256xf32>
    %146 = vector.broadcast %24 : vector<1x256xf32> to vector<4x256xf32>
    %147 = arith.mulf %145, %146 : vector<4x256xf32>
    %148 = tpu.concatenate %129, %130, %133, %136, %137, %140, %143, %144, %147 in 0 : vector<4x256xf32>, vector<4x256xf32>, vector<4x256xf32>, vector<4x256xf32>, vector<4x256xf32>, vector<4x256xf32>, vector<4x256xf32>, vector<4x256xf32>, vector<4x256xf32> -> vector<36x256xf32>
    %cst_39 = arith.constant dense<0.000000e+00> : vector<4x256xf32>
    %149 = tpu.matmul %25, %148, %cst_39 {dimension_numbers = #tpu.dot_dimension_numbers<[1], [0], [0], [1], [0, 0, 1, 1], [], []>} : vector<4x36xf32>, vector<36x256xf32>, vector<4x256xf32> -> vector<4x256xf32>
    %150 = vector.broadcast %26 : vector<4x1xf32> to vector<4x256xf32>
    %151 = arith.addf %149, %150 : vector<4x256xf32>
    %c1_40 = arith.constant 1 : index
    %c0_41 = arith.constant 0 : index
    %c0_42 = arith.constant 0 : index
    %c0_43 = arith.constant 0 : index
    %152 = vector.load %arg10[%c1_40, %c0_41, %c0_42, %c0_43] : memref<2x3x4x256xf32, #tpu.memory_space<vmem>>, vector<1x1x4x256xf32>
    %153 = vector.shape_cast %152 : vector<1x1x4x256xf32> to vector<4x256xf32>
    %154 = vector.shape_cast %151 : vector<4x256xf32> to vector<1x1x4x256xf32>
    tpu.vector_store %arg10[%c1_40, %c0_41, %c0_42, %c0_43], %154 {strides = array<i32>} : memref<2x3x4x256xf32, #tpu.memory_space<vmem>>, vector<1x1x4x256xf32>,
    %c1_44 = arith.constant 1 : index
    %c1_45 = arith.constant 1 : index
    %c0_46 = arith.constant 0 : index
    %c0_47 = arith.constant 0 : index
    %155 = vector.load %arg0[%c1_44, %c1_45, %c0_46, %c0_47] : memref<2x3x4x256xf32, #tpu.memory_space<vmem>>, vector<1x1x4x256xf32>
    %156 = vector.shape_cast %155 : vector<1x1x4x256xf32> to vector<4x256xf32>
    %cst_48 = arith.constant 0.000000e+00 : f32
    %157 = vector.broadcast %cst_48 : f32 to vector<4x17xf32>
    %158 = tpu.concatenate %157, %156, %157 in 1 : vector<4x17xf32>, vector<4x256xf32>, vector<4x17xf32> -> vector<4x290xf32>
    %159 = vector.extract_strided_slice %158 {offsets = [0, 0], sizes = [4, 256], strides = [1, 1]} : vector<4x290xf32> to vector<4x256xf32>
    %160 = vector.broadcast %20 : vector<1x256xf32> to vector<4x256xf32>
    %161 = arith.mulf %159, %160 : vector<4x256xf32>
    %162 = vector.extract_strided_slice %158 {offsets = [0, 1], sizes = [4, 256], strides = [1, 1]} : vector<4x290xf32> to vector<4x256xf32>
    %163 = vector.extract_strided_slice %158 {offsets = [0, 2], sizes = [4, 256], strides = [1, 1]} : vector<4x290xf32> to vector<4x256xf32>
    %164 = vector.broadcast %24 : vector<1x256xf32> to vector<4x256xf32>
    %165 = arith.mulf %163, %164 : vector<4x256xf32>
    %166 = vector.extract_strided_slice %158 {offsets = [0, 16], sizes = [4, 256], strides = [1, 1]} : vector<4x290xf32> to vector<4x256xf32>
    %167 = vector.broadcast %20 : vector<1x256xf32> to vector<4x256xf32>
    %168 = arith.mulf %166, %167 : vector<4x256xf32>
    %169 = vector.extract_strided_slice %158 {offsets = [0, 17], sizes = [4, 256], strides = [1, 1]} : vector<4x290xf32> to vector<4x256xf32>
    %170 = vector.extract_strided_slice %158 {offsets = [0, 18], sizes = [4, 256], strides = [1, 1]} : vector<4x290xf32> to vector<4x256xf32>
    %171 = vector.broadcast %24 : vector<1x256xf32> to vector<4x256xf32>
    %172 = arith.mulf %170, %171 : vector<4x256xf32>
    %173 = vector.extract_strided_slice %158 {offsets = [0, 32], sizes = [4, 256], strides = [1, 1]} : vector<4x290xf32> to vector<4x256xf32>
    %174 = vector.broadcast %20 : vector<1x256xf32> to vector<4x256xf32>
    %175 = arith.mulf %173, %174 : vector<4x256xf32>
    %176 = vector.extract_strided_slice %158 {offsets = [0, 33], sizes = [4, 256], strides = [1, 1]} : vector<4x290xf32> to vector<4x256xf32>
    %177 = vector.extract_strided_slice %158 {offsets = [0, 34], sizes = [4, 256], strides = [1, 1]} : vector<4x290xf32> to vector<4x256xf32>
    %178 = vector.broadcast %24 : vector<1x256xf32> to vector<4x256xf32>
    %179 = arith.mulf %177, %178 : vector<4x256xf32>
    %180 = tpu.concatenate %161, %162, %165, %168, %169, %172, %175, %176, %179 in 0 : vector<4x256xf32>, vector<4x256xf32>, vector<4x256xf32>, vector<4x256xf32>, vector<4x256xf32>, vector<4x256xf32>, vector<4x256xf32>, vector<4x256xf32>, vector<4x256xf32> -> vector<36x256xf32>
    %cst_49 = arith.constant dense<0.000000e+00> : vector<4x256xf32>
    %181 = tpu.matmul %25, %180, %cst_49 {dimension_numbers = #tpu.dot_dimension_numbers<[1], [0], [0], [1], [0, 0, 1, 1], [], []>} : vector<4x36xf32>, vector<36x256xf32>, vector<4x256xf32> -> vector<4x256xf32>
    %182 = vector.broadcast %26 : vector<4x1xf32> to vector<4x256xf32>
    %183 = arith.addf %181, %182 : vector<4x256xf32>
    %c1_50 = arith.constant 1 : index
    %c1_51 = arith.constant 1 : index
    %c0_52 = arith.constant 0 : index
    %c0_53 = arith.constant 0 : index
    %184 = vector.load %arg10[%c1_50, %c1_51, %c0_52, %c0_53] : memref<2x3x4x256xf32, #tpu.memory_space<vmem>>, vector<1x1x4x256xf32>
    %185 = vector.shape_cast %184 : vector<1x1x4x256xf32> to vector<4x256xf32>
    %186 = vector.shape_cast %183 : vector<4x256xf32> to vector<1x1x4x256xf32>
    tpu.vector_store %arg10[%c1_50, %c1_51, %c0_52, %c0_53], %186 {strides = array<i32>} : memref<2x3x4x256xf32, #tpu.memory_space<vmem>>, vector<1x1x4x256xf32>,
    %c1_54 = arith.constant 1 : index
    %c2_55 = arith.constant 2 : index
    %c0_56 = arith.constant 0 : index
    %c0_57 = arith.constant 0 : index
    %187 = vector.load %arg0[%c1_54, %c2_55, %c0_56, %c0_57] : memref<2x3x4x256xf32, #tpu.memory_space<vmem>>, vector<1x1x4x256xf32>
    %188 = vector.shape_cast %187 : vector<1x1x4x256xf32> to vector<4x256xf32>
    %cst_58 = arith.constant 0.000000e+00 : f32
    %189 = vector.broadcast %cst_58 : f32 to vector<4x17xf32>
    %190 = tpu.concatenate %189, %188, %189 in 1 : vector<4x17xf32>, vector<4x256xf32>, vector<4x17xf32> -> vector<4x290xf32>
    %191 = vector.extract_strided_slice %190 {offsets = [0, 0], sizes = [4, 256], strides = [1, 1]} : vector<4x290xf32> to vector<4x256xf32>
    %192 = vector.broadcast %20 : vector<1x256xf32> to vector<4x256xf32>
    %193 = arith.mulf %191, %192 : vector<4x256xf32>
    %194 = vector.extract_strided_slice %190 {offsets = [0, 1], sizes = [4, 256], strides = [1, 1]} : vector<4x290xf32> to vector<4x256xf32>
    %195 = vector.extract_strided_slice %190 {offsets = [0, 2], sizes = [4, 256], strides = [1, 1]} : vector<4x290xf32> to vector<4x256xf32>
    %196 = vector.broadcast %24 : vector<1x256xf32> to vector<4x256xf32>
    %197 = arith.mulf %195, %196 : vector<4x256xf32>
    %198 = vector.extract_strided_slice %190 {offsets = [0, 16], sizes = [4, 256], strides = [1, 1]} : vector<4x290xf32> to vector<4x256xf32>
    %199 = vector.broadcast %20 : vector<1x256xf32> to vector<4x256xf32>
    %200 = arith.mulf %198, %199 : vector<4x256xf32>
    %201 = vector.extract_strided_slice %190 {offsets = [0, 17], sizes = [4, 256], strides = [1, 1]} : vector<4x290xf32> to vector<4x256xf32>
    %202 = vector.extract_strided_slice %190 {offsets = [0, 18], sizes = [4, 256], strides = [1, 1]} : vector<4x290xf32> to vector<4x256xf32>
    %203 = vector.broadcast %24 : vector<1x256xf32> to vector<4x256xf32>
    %204 = arith.mulf %202, %203 : vector<4x256xf32>
    %205 = vector.extract_strided_slice %190 {offsets = [0, 32], sizes = [4, 256], strides = [1, 1]} : vector<4x290xf32> to vector<4x256xf32>
    %206 = vector.broadcast %20 : vector<1x256xf32> to vector<4x256xf32>
    %207 = arith.mulf %205, %206 : vector<4x256xf32>
    %208 = vector.extract_strided_slice %190 {offsets = [0, 33], sizes = [4, 256], strides = [1, 1]} : vector<4x290xf32> to vector<4x256xf32>
    %209 = vector.extract_strided_slice %190 {offsets = [0, 34], sizes = [4, 256], strides = [1, 1]} : vector<4x290xf32> to vector<4x256xf32>
    %210 = vector.broadcast %24 : vector<1x256xf32> to vector<4x256xf32>
    %211 = arith.mulf %209, %210 : vector<4x256xf32>
    %212 = tpu.concatenate %193, %194, %197, %200, %201, %204, %207, %208, %211 in 0 : vector<4x256xf32>, vector<4x256xf32>, vector<4x256xf32>, vector<4x256xf32>, vector<4x256xf32>, vector<4x256xf32>, vector<4x256xf32>, vector<4x256xf32>, vector<4x256xf32> -> vector<36x256xf32>
    %cst_59 = arith.constant dense<0.000000e+00> : vector<4x256xf32>
    %213 = tpu.matmul %25, %212, %cst_59 {dimension_numbers = #tpu.dot_dimension_numbers<[1], [0], [0], [1], [0, 0, 1, 1], [], []>} : vector<4x36xf32>, vector<36x256xf32>, vector<4x256xf32> -> vector<4x256xf32>
    %214 = vector.broadcast %26 : vector<4x1xf32> to vector<4x256xf32>
    %215 = arith.addf %213, %214 : vector<4x256xf32>
    %c1_60 = arith.constant 1 : index
    %c2_61 = arith.constant 2 : index
    %c0_62 = arith.constant 0 : index
    %c0_63 = arith.constant 0 : index
    %216 = vector.load %arg10[%c1_60, %c2_61, %c0_62, %c0_63] : memref<2x3x4x256xf32, #tpu.memory_space<vmem>>, vector<1x1x4x256xf32>
    %217 = vector.shape_cast %216 : vector<1x1x4x256xf32> to vector<4x256xf32>
    %218 = vector.shape_cast %215 : vector<4x256xf32> to vector<1x1x4x256xf32>
    tpu.vector_store %arg10[%c1_60, %c2_61, %c0_62, %c0_63], %218 {strides = array<i32>} : memref<2x3x4x256xf32, #tpu.memory_space<vmem>>, vector<1x1x4x256xf32>,
    %c0_64 = arith.constant 0 : index
    %c0_65 = arith.constant 0 : index
    %c0_66 = arith.constant 0 : index
    %c0_67 = arith.constant 0 : index
    %219 = vector.load %arg10[%c0_64, %c0_65, %c0_66, %c0_67] : memref<2x3x4x256xf32, #tpu.memory_space<vmem>>, vector<2x3x4x256xf32>
    %220 = vector.shape_cast %219 : vector<2x3x4x256xf32> to vector<6x4x256xf32>
    %cst_68 = arith.constant dense<0.000000e+00> : vector<4x256xf32>
    %221 = vector.multi_reduction <add>, %220, %cst_68 [0] : vector<6x4x256xf32> to vector<4x256xf32>
    %cst_69 = arith.constant dense<0.000000e+00> : vector<4xf32>
    %222 = vector.multi_reduction <add>, %221, %cst_69 [1] : vector<4x256xf32> to vector<4xf32>
    %223 = vector.shape_cast %222 : vector<4xf32> to vector<4x1xf32>
    %cst_70 = arith.constant 6.51041686E-4 : f32
    %224 = vector.broadcast %cst_70 : f32 to vector<4x1xf32>
    %225 = arith.mulf %223, %224 : vector<4x1xf32>
    %226 = vector.shape_cast %225 : vector<4x1xf32> to vector<1x4x1xf32>
    %227 = vector.broadcast %226 : vector<1x4x1xf32> to vector<6x4x256xf32>
    %228 = arith.subf %220, %227 : vector<6x4x256xf32>
    %229 = arith.mulf %228, %228 : vector<6x4x256xf32>
    %cst_71 = arith.constant dense<0.000000e+00> : vector<4x256xf32>
    %230 = vector.multi_reduction <add>, %229, %cst_71 [0] : vector<6x4x256xf32> to vector<4x256xf32>
    %cst_72 = arith.constant dense<0.000000e+00> : vector<4xf32>
    %231 = vector.multi_reduction <add>, %230, %cst_72 [1] : vector<4x256xf32> to vector<4xf32>
    %232 = vector.shape_cast %231 : vector<4xf32> to vector<4x1xf32>
    %cst_73 = arith.constant 6.51041686E-4 : f32
    %233 = vector.broadcast %cst_73 : f32 to vector<4x1xf32>
    %234 = arith.mulf %232, %233 : vector<4x1xf32>
    %c0_74 = arith.constant 0 : index
    %c0_75 = arith.constant 0 : index
    %235 = vector.load %arg3[%c0_74, %c0_75] : memref<4x1xf32, #tpu.memory_space<vmem>>, vector<4x1xf32>
    %cst_76 = arith.constant 9.99999974E-6 : f32
    %236 = vector.broadcast %cst_76 : f32 to vector<4x1xf32>
    %237 = arith.addf %234, %236 : vector<4x1xf32>
    %238 = math.rsqrt %237 : vector<4x1xf32>
    %239 = arith.mulf %235, %238 : vector<4x1xf32>
    %c0_77 = arith.constant 0 : index
    %c0_78 = arith.constant 0 : index
    %240 = vector.load %arg4[%c0_77, %c0_78] : memref<4x1xf32, #tpu.memory_space<vmem>>, vector<4x1xf32>
    %241 = arith.mulf %225, %239 : vector<4x1xf32>
    %242 = arith.subf %240, %241 : vector<4x1xf32>
    %243 = vector.shape_cast %239 : vector<4x1xf32> to vector<1x4x1xf32>
    %244 = vector.broadcast %243 : vector<1x4x1xf32> to vector<6x4x256xf32>
    %245 = arith.mulf %220, %244 : vector<6x4x256xf32>
    %246 = vector.shape_cast %242 : vector<4x1xf32> to vector<1x4x1xf32>
    %247 = vector.broadcast %246 : vector<1x4x1xf32> to vector<6x4x256xf32>
    %248 = arith.addf %245, %247 : vector<6x4x256xf32>
    %cst_79 = arith.constant 0.000000e+00 : f32
    %249 = vector.broadcast %cst_79 : f32 to vector<6x4x256xf32>
    %250 = arith.maximumf %248, %249 : vector<6x4x256xf32>
    %251 = vector.shape_cast %250 : vector<6x4x256xf32> to vector<2x3x4x256xf32>
    %c0_80 = arith.constant 0 : index
    %c0_81 = arith.constant 0 : index
    %c0_82 = arith.constant 0 : index
    %c0_83 = arith.constant 0 : index
    %252 = vector.load %arg10[%c0_80, %c0_81, %c0_82, %c0_83] : memref<2x3x4x256xf32, #tpu.memory_space<vmem>>, vector<2x3x4x256xf32>
    tpu.vector_store %arg10[%c0_80, %c0_81, %c0_82, %c0_83], %251 {strides = array<i32>} : memref<2x3x4x256xf32, #tpu.memory_space<vmem>>, vector<2x3x4x256xf32>,
    %c0_84 = arith.constant 0 : index
    %c0_85 = arith.constant 0 : index
    %253 = vector.load %arg5[%c0_84, %c0_85] : memref<8x72xf32, #tpu.memory_space<vmem>>, vector<8x72xf32>
    %c0_86 = arith.constant 0 : index
    %c0_87 = arith.constant 0 : index
    %254 = vector.load %arg6[%c0_86, %c0_87] : memref<8x1xf32, #tpu.memory_space<vmem>>, vector<8x1xf32>
    %c0_88 = arith.constant 0 : index
    %c0_89 = arith.constant 0 : index
    %c0_90 = arith.constant 0 : index
    %c0_91 = arith.constant 0 : index
    %255 = vector.load %arg10[%c0_88, %c0_89, %c0_90, %c0_91] : memref<2x3x4x256xf32, #tpu.memory_space<vmem>>, vector<1x1x4x256xf32>
    %256 = vector.shape_cast %255 : vector<1x1x4x256xf32> to vector<4x256xf32>
    %cst_92 = arith.constant 0.000000e+00 : f32
    %257 = vector.broadcast %cst_92 : f32 to vector<4x17xf32>
    %258 = tpu.concatenate %257, %256, %257 in 1 : vector<4x17xf32>, vector<4x256xf32>, vector<4x17xf32> -> vector<4x290xf32>
    %259 = vector.extract_strided_slice %258 {offsets = [0, 0], sizes = [4, 256], strides = [1, 1]} : vector<4x290xf32> to vector<4x256xf32>
    %260 = vector.broadcast %20 : vector<1x256xf32> to vector<4x256xf32>
    %261 = arith.mulf %259, %260 : vector<4x256xf32>
    %262 = vector.extract_strided_slice %258 {offsets = [0, 1], sizes = [4, 256], strides = [1, 1]} : vector<4x290xf32> to vector<4x256xf32>
    %263 = vector.extract_strided_slice %258 {offsets = [0, 2], sizes = [4, 256], strides = [1, 1]} : vector<4x290xf32> to vector<4x256xf32>
    %264 = vector.broadcast %24 : vector<1x256xf32> to vector<4x256xf32>
    %265 = arith.mulf %263, %264 : vector<4x256xf32>
    %266 = vector.extract_strided_slice %258 {offsets = [0, 16], sizes = [4, 256], strides = [1, 1]} : vector<4x290xf32> to vector<4x256xf32>
    %267 = vector.broadcast %20 : vector<1x256xf32> to vector<4x256xf32>
    %268 = arith.mulf %266, %267 : vector<4x256xf32>
    %269 = vector.extract_strided_slice %258 {offsets = [0, 17], sizes = [4, 256], strides = [1, 1]} : vector<4x290xf32> to vector<4x256xf32>
    %270 = vector.extract_strided_slice %258 {offsets = [0, 18], sizes = [4, 256], strides = [1, 1]} : vector<4x290xf32> to vector<4x256xf32>
    %271 = vector.broadcast %24 : vector<1x256xf32> to vector<4x256xf32>
    %272 = arith.mulf %270, %271 : vector<4x256xf32>
    %273 = vector.extract_strided_slice %258 {offsets = [0, 32], sizes = [4, 256], strides = [1, 1]} : vector<4x290xf32> to vector<4x256xf32>
    %274 = vector.broadcast %20 : vector<1x256xf32> to vector<4x256xf32>
    %275 = arith.mulf %273, %274 : vector<4x256xf32>
    %276 = vector.extract_strided_slice %258 {offsets = [0, 33], sizes = [4, 256], strides = [1, 1]} : vector<4x290xf32> to vector<4x256xf32>
    %277 = vector.extract_strided_slice %258 {offsets = [0, 34], sizes = [4, 256], strides = [1, 1]} : vector<4x290xf32> to vector<4x256xf32>
    %278 = vector.broadcast %24 : vector<1x256xf32> to vector<4x256xf32>
    %279 = arith.mulf %277, %278 : vector<4x256xf32>
    %c0_93 = arith.constant 0 : index
    %c1_94 = arith.constant 1 : index
    %c0_95 = arith.constant 0 : index
    %c0_96 = arith.constant 0 : index
    %280 = vector.load %arg10[%c0_93, %c1_94, %c0_95, %c0_96] : memref<2x3x4x256xf32, #tpu.memory_space<vmem>>, vector<1x1x4x256xf32>
    %281 = vector.shape_cast %280 : vector<1x1x4x256xf32> to vector<4x256xf32>
    %cst_97 = arith.constant 0.000000e+00 : f32
    %282 = vector.broadcast %cst_97 : f32 to vector<4x17xf32>
    %283 = tpu.concatenate %282, %281, %282 in 1 : vector<4x17xf32>, vector<4x256xf32>, vector<4x17xf32> -> vector<4x290xf32>
    %284 = vector.extract_strided_slice %283 {offsets = [0, 0], sizes = [4, 256], strides = [1, 1]} : vector<4x290xf32> to vector<4x256xf32>
    %285 = vector.broadcast %20 : vector<1x256xf32> to vector<4x256xf32>
    %286 = arith.mulf %284, %285 : vector<4x256xf32>
    %287 = vector.extract_strided_slice %283 {offsets = [0, 1], sizes = [4, 256], strides = [1, 1]} : vector<4x290xf32> to vector<4x256xf32>
    %288 = vector.extract_strided_slice %283 {offsets = [0, 2], sizes = [4, 256], strides = [1, 1]} : vector<4x290xf32> to vector<4x256xf32>
    %289 = vector.broadcast %24 : vector<1x256xf32> to vector<4x256xf32>
    %290 = arith.mulf %288, %289 : vector<4x256xf32>
    %291 = vector.extract_strided_slice %283 {offsets = [0, 16], sizes = [4, 256], strides = [1, 1]} : vector<4x290xf32> to vector<4x256xf32>
    %292 = vector.broadcast %20 : vector<1x256xf32> to vector<4x256xf32>
    %293 = arith.mulf %291, %292 : vector<4x256xf32>
    %294 = vector.extract_strided_slice %283 {offsets = [0, 17], sizes = [4, 256], strides = [1, 1]} : vector<4x290xf32> to vector<4x256xf32>
    %295 = vector.extract_strided_slice %283 {offsets = [0, 18], sizes = [4, 256], strides = [1, 1]} : vector<4x290xf32> to vector<4x256xf32>
    %296 = vector.broadcast %24 : vector<1x256xf32> to vector<4x256xf32>
    %297 = arith.mulf %295, %296 : vector<4x256xf32>
    %298 = vector.extract_strided_slice %283 {offsets = [0, 32], sizes = [4, 256], strides = [1, 1]} : vector<4x290xf32> to vector<4x256xf32>
    %299 = vector.broadcast %20 : vector<1x256xf32> to vector<4x256xf32>
    %300 = arith.mulf %298, %299 : vector<4x256xf32>
    %301 = vector.extract_strided_slice %283 {offsets = [0, 33], sizes = [4, 256], strides = [1, 1]} : vector<4x290xf32> to vector<4x256xf32>
    %302 = vector.extract_strided_slice %283 {offsets = [0, 34], sizes = [4, 256], strides = [1, 1]} : vector<4x290xf32> to vector<4x256xf32>
    %303 = vector.broadcast %24 : vector<1x256xf32> to vector<4x256xf32>
    %304 = arith.mulf %302, %303 : vector<4x256xf32>
    %305 = tpu.concatenate %261, %262, %265, %268, %269, %272, %275, %276, %279, %286, %287, %290, %293, %294, %297, %300 in 0 : vector<4x256xf32>, vector<4x256xf32>, vector<4x256xf32>, vector<4x256xf32>, vector<4x256xf32>, vector<4x256xf32>, vector<4x256xf32>, vector<4x256xf32>, vector<4x256xf32>, vector<4x256xf32>, vector<4x256xf32>, vector<4x256xf32>, vector<4x256xf32>, vector<4x256xf32>, vector<4x256xf32>, vector<4x256xf32> -> vector<64x256xf32>
    %306 = tpu.concatenate %301, %304 in 0 : vector<4x256xf32>, vector<4x256xf32> -> vector<8x256xf32>
    %307 = tpu.concatenate %305, %306 in 0 : vector<64x256xf32>, vector<8x256xf32> -> vector<72x256xf32>
    %cst_98 = arith.constant dense<0.000000e+00> : vector<8x256xf32>
    %308 = tpu.matmul %253, %307, %cst_98 {dimension_numbers = #tpu.dot_dimension_numbers<[1], [0], [0], [1], [0, 0, 1, 1], [], []>} : vector<8x72xf32>, vector<72x256xf32>, vector<8x256xf32> -> vector<8x256xf32>
    %309 = vector.broadcast %254 : vector<8x1xf32> to vector<8x256xf32>
    %310 = arith.addf %308, %309 : vector<8x256xf32>
    %c0_99 = arith.constant 0 : index
    %c0_100 = arith.constant 0 : index
    %c0_101 = arith.constant 0 : index
    %c0_102 = arith.constant 0 : index
    %311 = vector.load %arg9[%c0_99, %c0_100, %c0_101, %c0_102] : memref<2x2x8x256xf32, #tpu.memory_space<vmem>>, vector<1x1x8x256xf32>
    %312 = vector.shape_cast %311 : vector<1x1x8x256xf32> to vector<8x256xf32>
    %313 = vector.shape_cast %310 : vector<8x256xf32> to vector<1x1x8x256xf32>
    tpu.vector_store %arg9[%c0_99, %c0_100, %c0_101, %c0_102], %313 {strides = array<i32>} : memref<2x2x8x256xf32, #tpu.memory_space<vmem>>, vector<1x1x8x256xf32>,
    %c0_103 = arith.constant 0 : index
    %c1_104 = arith.constant 1 : index
    %c0_105 = arith.constant 0 : index
    %c0_106 = arith.constant 0 : index
    %314 = vector.load %arg10[%c0_103, %c1_104, %c0_105, %c0_106] : memref<2x3x4x256xf32, #tpu.memory_space<vmem>>, vector<1x1x4x256xf32>
    %315 = vector.shape_cast %314 : vector<1x1x4x256xf32> to vector<4x256xf32>
    %cst_107 = arith.constant 0.000000e+00 : f32
    %316 = vector.broadcast %cst_107 : f32 to vector<4x17xf32>
    %317 = tpu.concatenate %316, %315, %316 in 1 : vector<4x17xf32>, vector<4x256xf32>, vector<4x17xf32> -> vector<4x290xf32>
    %318 = vector.extract_strided_slice %317 {offsets = [0, 0], sizes = [4, 256], strides = [1, 1]} : vector<4x290xf32> to vector<4x256xf32>
    %319 = vector.broadcast %20 : vector<1x256xf32> to vector<4x256xf32>
    %320 = arith.mulf %318, %319 : vector<4x256xf32>
    %321 = vector.extract_strided_slice %317 {offsets = [0, 1], sizes = [4, 256], strides = [1, 1]} : vector<4x290xf32> to vector<4x256xf32>
    %322 = vector.extract_strided_slice %317 {offsets = [0, 2], sizes = [4, 256], strides = [1, 1]} : vector<4x290xf32> to vector<4x256xf32>
    %323 = vector.broadcast %24 : vector<1x256xf32> to vector<4x256xf32>
    %324 = arith.mulf %322, %323 : vector<4x256xf32>
    %325 = vector.extract_strided_slice %317 {offsets = [0, 16], sizes = [4, 256], strides = [1, 1]} : vector<4x290xf32> to vector<4x256xf32>
    %326 = vector.broadcast %20 : vector<1x256xf32> to vector<4x256xf32>
    %327 = arith.mulf %325, %326 : vector<4x256xf32>
    %328 = vector.extract_strided_slice %317 {offsets = [0, 17], sizes = [4, 256], strides = [1, 1]} : vector<4x290xf32> to vector<4x256xf32>
    %329 = vector.extract_strided_slice %317 {offsets = [0, 18], sizes = [4, 256], strides = [1, 1]} : vector<4x290xf32> to vector<4x256xf32>
    %330 = vector.broadcast %24 : vector<1x256xf32> to vector<4x256xf32>
    %331 = arith.mulf %329, %330 : vector<4x256xf32>
    %332 = vector.extract_strided_slice %317 {offsets = [0, 32], sizes = [4, 256], strides = [1, 1]} : vector<4x290xf32> to vector<4x256xf32>
    %333 = vector.broadcast %20 : vector<1x256xf32> to vector<4x256xf32>
    %334 = arith.mulf %332, %333 : vector<4x256xf32>
    %335 = vector.extract_strided_slice %317 {offsets = [0, 33], sizes = [4, 256], strides = [1, 1]} : vector<4x290xf32> to vector<4x256xf32>
    %336 = vector.extract_strided_slice %317 {offsets = [0, 34], sizes = [4, 256], strides = [1, 1]} : vector<4x290xf32> to vector<4x256xf32>
    %337 = vector.broadcast %24 : vector<1x256xf32> to vector<4x256xf32>
    %338 = arith.mulf %336, %337 : vector<4x256xf32>
    %c0_108 = arith.constant 0 : index
    %c2_109 = arith.constant 2 : index
    %c0_110 = arith.constant 0 : index
    %c0_111 = arith.constant 0 : index
    %339 = vector.load %arg10[%c0_108, %c2_109, %c0_110, %c0_111] : memref<2x3x4x256xf32, #tpu.memory_space<vmem>>, vector<1x1x4x256xf32>
    %340 = vector.shape_cast %339 : vector<1x1x4x256xf32> to vector<4x256xf32>
    %cst_112 = arith.constant 0.000000e+00 : f32
    %341 = vector.broadcast %cst_112 : f32 to vector<4x17xf32>
    %342 = tpu.concatenate %341, %340, %341 in 1 : vector<4x17xf32>, vector<4x256xf32>, vector<4x17xf32> -> vector<4x290xf32>
    %343 = vector.extract_strided_slice %342 {offsets = [0, 0], sizes = [4, 256], strides = [1, 1]} : vector<4x290xf32> to vector<4x256xf32>
    %344 = vector.broadcast %20 : vector<1x256xf32> to vector<4x256xf32>
    %345 = arith.mulf %343, %344 : vector<4x256xf32>
    %346 = vector.extract_strided_slice %342 {offsets = [0, 1], sizes = [4, 256], strides = [1, 1]} : vector<4x290xf32> to vector<4x256xf32>
    %347 = vector.extract_strided_slice %342 {offsets = [0, 2], sizes = [4, 256], strides = [1, 1]} : vector<4x290xf32> to vector<4x256xf32>
    %348 = vector.broadcast %24 : vector<1x256xf32> to vector<4x256xf32>
    %349 = arith.mulf %347, %348 : vector<4x256xf32>
    %350 = vector.extract_strided_slice %342 {offsets = [0, 16], sizes = [4, 256], strides = [1, 1]} : vector<4x290xf32> to vector<4x256xf32>
    %351 = vector.broadcast %20 : vector<1x256xf32> to vector<4x256xf32>
    %352 = arith.mulf %350, %351 : vector<4x256xf32>
    %353 = vector.extract_strided_slice %342 {offsets = [0, 17], sizes = [4, 256], strides = [1, 1]} : vector<4x290xf32> to vector<4x256xf32>
    %354 = vector.extract_strided_slice %342 {offsets = [0, 18], sizes = [4, 256], strides = [1, 1]} : vector<4x290xf32> to vector<4x256xf32>
    %355 = vector.broadcast %24 : vector<1x256xf32> to vector<4x256xf32>
    %356 = arith.mulf %354, %355 : vector<4x256xf32>
    %357 = vector.extract_strided_slice %342 {offsets = [0, 32], sizes = [4, 256], strides = [1, 1]} : vector<4x290xf32> to vector<4x256xf32>
    %358 = vector.broadcast %20 : vector<1x256xf32> to vector<4x256xf32>
    %359 = arith.mulf %357, %358 : vector<4x256xf32>
    %360 = vector.extract_strided_slice %342 {offsets = [0, 33], sizes = [4, 256], strides = [1, 1]} : vector<4x290xf32> to vector<4x256xf32>
    %361 = vector.extract_strided_slice %342 {offsets = [0, 34], sizes = [4, 256], strides = [1, 1]} : vector<4x290xf32> to vector<4x256xf32>
    %362 = vector.broadcast %24 : vector<1x256xf32> to vector<4x256xf32>
    %363 = arith.mulf %361, %362 : vector<4x256xf32>
    %364 = tpu.concatenate %320, %321, %324, %327, %328, %331, %334, %335, %338, %345, %346, %349, %352, %353, %356, %359 in 0 : vector<4x256xf32>, vector<4x256xf32>, vector<4x256xf32>, vector<4x256xf32>, vector<4x256xf32>, vector<4x256xf32>, vector<4x256xf32>, vector<4x256xf32>, vector<4x256xf32>, vector<4x256xf32>, vector<4x256xf32>, vector<4x256xf32>, vector<4x256xf32>, vector<4x256xf32>, vector<4x256xf32>, vector<4x256xf32> -> vector<64x256xf32>
    %365 = tpu.concatenate %360, %363 in 0 : vector<4x256xf32>, vector<4x256xf32> -> vector<8x256xf32>
    %366 = tpu.concatenate %364, %365 in 0 : vector<64x256xf32>, vector<8x256xf32> -> vector<72x256xf32>
    %cst_113 = arith.constant dense<0.000000e+00> : vector<8x256xf32>
    %367 = tpu.matmul %253, %366, %cst_113 {dimension_numbers = #tpu.dot_dimension_numbers<[1], [0], [0], [1], [0, 0, 1, 1], [], []>} : vector<8x72xf32>, vector<72x256xf32>, vector<8x256xf32> -> vector<8x256xf32>
    %368 = vector.broadcast %254 : vector<8x1xf32> to vector<8x256xf32>
    %369 = arith.addf %367, %368 : vector<8x256xf32>
    %c0_114 = arith.constant 0 : index
    %c1_115 = arith.constant 1 : index
    %c0_116 = arith.constant 0 : index
    %c0_117 = arith.constant 0 : index
    %370 = vector.load %arg9[%c0_114, %c1_115, %c0_116, %c0_117] : memref<2x2x8x256xf32, #tpu.memory_space<vmem>>, vector<1x1x8x256xf32>
    %371 = vector.shape_cast %370 : vector<1x1x8x256xf32> to vector<8x256xf32>
    %372 = vector.shape_cast %369 : vector<8x256xf32> to vector<1x1x8x256xf32>
    tpu.vector_store %arg9[%c0_114, %c1_115, %c0_116, %c0_117], %372 {strides = array<i32>} : memref<2x2x8x256xf32, #tpu.memory_space<vmem>>, vector<1x1x8x256xf32>,
    %c1_118 = arith.constant 1 : index
    %c0_119 = arith.constant 0 : index
    %c0_120 = arith.constant 0 : index
    %c0_121 = arith.constant 0 : index
    %373 = vector.load %arg10[%c1_118, %c0_119, %c0_120, %c0_121] : memref<2x3x4x256xf32, #tpu.memory_space<vmem>>, vector<1x1x4x256xf32>
    %374 = vector.shape_cast %373 : vector<1x1x4x256xf32> to vector<4x256xf32>
    %cst_122 = arith.constant 0.000000e+00 : f32
    %375 = vector.broadcast %cst_122 : f32 to vector<4x17xf32>
    %376 = tpu.concatenate %375, %374, %375 in 1 : vector<4x17xf32>, vector<4x256xf32>, vector<4x17xf32> -> vector<4x290xf32>
    %377 = vector.extract_strided_slice %376 {offsets = [0, 0], sizes = [4, 256], strides = [1, 1]} : vector<4x290xf32> to vector<4x256xf32>
    %378 = vector.broadcast %20 : vector<1x256xf32> to vector<4x256xf32>
    %379 = arith.mulf %377, %378 : vector<4x256xf32>
    %380 = vector.extract_strided_slice %376 {offsets = [0, 1], sizes = [4, 256], strides = [1, 1]} : vector<4x290xf32> to vector<4x256xf32>
    %381 = vector.extract_strided_slice %376 {offsets = [0, 2], sizes = [4, 256], strides = [1, 1]} : vector<4x290xf32> to vector<4x256xf32>
    %382 = vector.broadcast %24 : vector<1x256xf32> to vector<4x256xf32>
    %383 = arith.mulf %381, %382 : vector<4x256xf32>
    %384 = vector.extract_strided_slice %376 {offsets = [0, 16], sizes = [4, 256], strides = [1, 1]} : vector<4x290xf32> to vector<4x256xf32>
    %385 = vector.broadcast %20 : vector<1x256xf32> to vector<4x256xf32>
    %386 = arith.mulf %384, %385 : vector<4x256xf32>
    %387 = vector.extract_strided_slice %376 {offsets = [0, 17], sizes = [4, 256], strides = [1, 1]} : vector<4x290xf32> to vector<4x256xf32>
    %388 = vector.extract_strided_slice %376 {offsets = [0, 18], sizes = [4, 256], strides = [1, 1]} : vector<4x290xf32> to vector<4x256xf32>
    %389 = vector.broadcast %24 : vector<1x256xf32> to vector<4x256xf32>
    %390 = arith.mulf %388, %389 : vector<4x256xf32>
    %391 = vector.extract_strided_slice %376 {offsets = [0, 32], sizes = [4, 256], strides = [1, 1]} : vector<4x290xf32> to vector<4x256xf32>
    %392 = vector.broadcast %20 : vector<1x256xf32> to vector<4x256xf32>
    %393 = arith.mulf %391, %392 : vector<4x256xf32>
    %394 = vector.extract_strided_slice %376 {offsets = [0, 33], sizes = [4, 256], strides = [1, 1]} : vector<4x290xf32> to vector<4x256xf32>
    %395 = vector.extract_strided_slice %376 {offsets = [0, 34], sizes = [4, 256], strides = [1, 1]} : vector<4x290xf32> to vector<4x256xf32>
    %396 = vector.broadcast %24 : vector<1x256xf32> to vector<4x256xf32>
    %397 = arith.mulf %395, %396 : vector<4x256xf32>
    %c1_123 = arith.constant 1 : index
    %c1_124 = arith.constant 1 : index
    %c0_125 = arith.constant 0 : index
    %c0_126 = arith.constant 0 : index
    %398 = vector.load %arg10[%c1_123, %c1_124, %c0_125, %c0_126] : memref<2x3x4x256xf32, #tpu.memory_space<vmem>>, vector<1x1x4x256xf32>
    %399 = vector.shape_cast %398 : vector<1x1x4x256xf32> to vector<4x256xf32>
    %cst_127 = arith.constant 0.000000e+00 : f32
    %400 = vector.broadcast %cst_127 : f32 to vector<4x17xf32>
    %401 = tpu.concatenate %400, %399, %400 in 1 : vector<4x17xf32>, vector<4x256xf32>, vector<4x17xf32> -> vector<4x290xf32>
    %402 = vector.extract_strided_slice %401 {offsets = [0, 0], sizes = [4, 256], strides = [1, 1]} : vector<4x290xf32> to vector<4x256xf32>
    %403 = vector.broadcast %20 : vector<1x256xf32> to vector<4x256xf32>
    %404 = arith.mulf %402, %403 : vector<4x256xf32>
    %405 = vector.extract_strided_slice %401 {offsets = [0, 1], sizes = [4, 256], strides = [1, 1]} : vector<4x290xf32> to vector<4x256xf32>
    %406 = vector.extract_strided_slice %401 {offsets = [0, 2], sizes = [4, 256], strides = [1, 1]} : vector<4x290xf32> to vector<4x256xf32>
    %407 = vector.broadcast %24 : vector<1x256xf32> to vector<4x256xf32>
    %408 = arith.mulf %406, %407 : vector<4x256xf32>
    %409 = vector.extract_strided_slice %401 {offsets = [0, 16], sizes = [4, 256], strides = [1, 1]} : vector<4x290xf32> to vector<4x256xf32>
    %410 = vector.broadcast %20 : vector<1x256xf32> to vector<4x256xf32>
    %411 = arith.mulf %409, %410 : vector<4x256xf32>
    %412 = vector.extract_strided_slice %401 {offsets = [0, 17], sizes = [4, 256], strides = [1, 1]} : vector<4x290xf32> to vector<4x256xf32>
    %413 = vector.extract_strided_slice %401 {offsets = [0, 18], sizes = [4, 256], strides = [1, 1]} : vector<4x290xf32> to vector<4x256xf32>
    %414 = vector.broadcast %24 : vector<1x256xf32> to vector<4x256xf32>
    %415 = arith.mulf %413, %414 : vector<4x256xf32>
    %416 = vector.extract_strided_slice %401 {offsets = [0, 32], sizes = [4, 256], strides = [1, 1]} : vector<4x290xf32> to vector<4x256xf32>
    %417 = vector.broadcast %20 : vector<1x256xf32> to vector<4x256xf32>
    %418 = arith.mulf %416, %417 : vector<4x256xf32>
    %419 = vector.extract_strided_slice %401 {offsets = [0, 33], sizes = [4, 256], strides = [1, 1]} : vector<4x290xf32> to vector<4x256xf32>
    %420 = vector.extract_strided_slice %401 {offsets = [0, 34], sizes = [4, 256], strides = [1, 1]} : vector<4x290xf32> to vector<4x256xf32>
    %421 = vector.broadcast %24 : vector<1x256xf32> to vector<4x256xf32>
    %422 = arith.mulf %420, %421 : vector<4x256xf32>
    %423 = tpu.concatenate %379, %380, %383, %386, %387, %390, %393, %394, %397, %404, %405, %408, %411, %412, %415, %418 in 0 : vector<4x256xf32>, vector<4x256xf32>, vector<4x256xf32>, vector<4x256xf32>, vector<4x256xf32>, vector<4x256xf32>, vector<4x256xf32>, vector<4x256xf32>, vector<4x256xf32>, vector<4x256xf32>, vector<4x256xf32>, vector<4x256xf32>, vector<4x256xf32>, vector<4x256xf32>, vector<4x256xf32>, vector<4x256xf32> -> vector<64x256xf32>
    %424 = tpu.concatenate %419, %422 in 0 : vector<4x256xf32>, vector<4x256xf32> -> vector<8x256xf32>
    %425 = tpu.concatenate %423, %424 in 0 : vector<64x256xf32>, vector<8x256xf32> -> vector<72x256xf32>
    %cst_128 = arith.constant dense<0.000000e+00> : vector<8x256xf32>
    %426 = tpu.matmul %253, %425, %cst_128 {dimension_numbers = #tpu.dot_dimension_numbers<[1], [0], [0], [1], [0, 0, 1, 1], [], []>} : vector<8x72xf32>, vector<72x256xf32>, vector<8x256xf32> -> vector<8x256xf32>
    %427 = vector.broadcast %254 : vector<8x1xf32> to vector<8x256xf32>
    %428 = arith.addf %426, %427 : vector<8x256xf32>
    %c1_129 = arith.constant 1 : index
    %c0_130 = arith.constant 0 : index
    %c0_131 = arith.constant 0 : index
    %c0_132 = arith.constant 0 : index
    %429 = vector.load %arg9[%c1_129, %c0_130, %c0_131, %c0_132] : memref<2x2x8x256xf32, #tpu.memory_space<vmem>>, vector<1x1x8x256xf32>
    %430 = vector.shape_cast %429 : vector<1x1x8x256xf32> to vector<8x256xf32>
    %431 = vector.shape_cast %428 : vector<8x256xf32> to vector<1x1x8x256xf32>
    tpu.vector_store %arg9[%c1_129, %c0_130, %c0_131, %c0_132], %431 {strides = array<i32>} : memref<2x2x8x256xf32, #tpu.memory_space<vmem>>, vector<1x1x8x256xf32>,
    %c1_133 = arith.constant 1 : index
    %c1_134 = arith.constant 1 : index
    %c0_135 = arith.constant 0 : index
    %c0_136 = arith.constant 0 : index
    %432 = vector.load %arg10[%c1_133, %c1_134, %c0_135, %c0_136] : memref<2x3x4x256xf32, #tpu.memory_space<vmem>>, vector<1x1x4x256xf32>
    %433 = vector.shape_cast %432 : vector<1x1x4x256xf32> to vector<4x256xf32>
    %cst_137 = arith.constant 0.000000e+00 : f32
    %434 = vector.broadcast %cst_137 : f32 to vector<4x17xf32>
    %435 = tpu.concatenate %434, %433, %434 in 1 : vector<4x17xf32>, vector<4x256xf32>, vector<4x17xf32> -> vector<4x290xf32>
    %436 = vector.extract_strided_slice %435 {offsets = [0, 0], sizes = [4, 256], strides = [1, 1]} : vector<4x290xf32> to vector<4x256xf32>
    %437 = vector.broadcast %20 : vector<1x256xf32> to vector<4x256xf32>
    %438 = arith.mulf %436, %437 : vector<4x256xf32>
    %439 = vector.extract_strided_slice %435 {offsets = [0, 1], sizes = [4, 256], strides = [1, 1]} : vector<4x290xf32> to vector<4x256xf32>
    %440 = vector.extract_strided_slice %435 {offsets = [0, 2], sizes = [4, 256], strides = [1, 1]} : vector<4x290xf32> to vector<4x256xf32>
    %441 = vector.broadcast %24 : vector<1x256xf32> to vector<4x256xf32>
    %442 = arith.mulf %440, %441 : vector<4x256xf32>
    %443 = vector.extract_strided_slice %435 {offsets = [0, 16], sizes = [4, 256], strides = [1, 1]} : vector<4x290xf32> to vector<4x256xf32>
    %444 = vector.broadcast %20 : vector<1x256xf32> to vector<4x256xf32>
    %445 = arith.mulf %443, %444 : vector<4x256xf32>
    %446 = vector.extract_strided_slice %435 {offsets = [0, 17], sizes = [4, 256], strides = [1, 1]} : vector<4x290xf32> to vector<4x256xf32>
    %447 = vector.extract_strided_slice %435 {offsets = [0, 18], sizes = [4, 256], strides = [1, 1]} : vector<4x290xf32> to vector<4x256xf32>
    %448 = vector.broadcast %24 : vector<1x256xf32> to vector<4x256xf32>
    %449 = arith.mulf %447, %448 : vector<4x256xf32>
    %450 = vector.extract_strided_slice %435 {offsets = [0, 32], sizes = [4, 256], strides = [1, 1]} : vector<4x290xf32> to vector<4x256xf32>
    %451 = vector.broadcast %20 : vector<1x256xf32> to vector<4x256xf32>
    %452 = arith.mulf %450, %451 : vector<4x256xf32>
    %453 = vector.extract_strided_slice %435 {offsets = [0, 33], sizes = [4, 256], strides = [1, 1]} : vector<4x290xf32> to vector<4x256xf32>
    %454 = vector.extract_strided_slice %435 {offsets = [0, 34], sizes = [4, 256], strides = [1, 1]} : vector<4x290xf32> to vector<4x256xf32>
    %455 = vector.broadcast %24 : vector<1x256xf32> to vector<4x256xf32>
    %456 = arith.mulf %454, %455 : vector<4x256xf32>
    %c1_138 = arith.constant 1 : index
    %c2_139 = arith.constant 2 : index
    %c0_140 = arith.constant 0 : index
    %c0_141 = arith.constant 0 : index
    %457 = vector.load %arg10[%c1_138, %c2_139, %c0_140, %c0_141] : memref<2x3x4x256xf32, #tpu.memory_space<vmem>>, vector<1x1x4x256xf32>
    %458 = vector.shape_cast %457 : vector<1x1x4x256xf32> to vector<4x256xf32>
    %cst_142 = arith.constant 0.000000e+00 : f32
    %459 = vector.broadcast %cst_142 : f32 to vector<4x17xf32>
    %460 = tpu.concatenate %459, %458, %459 in 1 : vector<4x17xf32>, vector<4x256xf32>, vector<4x17xf32> -> vector<4x290xf32>
    %461 = vector.extract_strided_slice %460 {offsets = [0, 0], sizes = [4, 256], strides = [1, 1]} : vector<4x290xf32> to vector<4x256xf32>
    %462 = vector.broadcast %20 : vector<1x256xf32> to vector<4x256xf32>
    %463 = arith.mulf %461, %462 : vector<4x256xf32>
    %464 = vector.extract_strided_slice %460 {offsets = [0, 1], sizes = [4, 256], strides = [1, 1]} : vector<4x290xf32> to vector<4x256xf32>
    %465 = vector.extract_strided_slice %460 {offsets = [0, 2], sizes = [4, 256], strides = [1, 1]} : vector<4x290xf32> to vector<4x256xf32>
    %466 = vector.broadcast %24 : vector<1x256xf32> to vector<4x256xf32>
    %467 = arith.mulf %465, %466 : vector<4x256xf32>
    %468 = vector.extract_strided_slice %460 {offsets = [0, 16], sizes = [4, 256], strides = [1, 1]} : vector<4x290xf32> to vector<4x256xf32>
    %469 = vector.broadcast %20 : vector<1x256xf32> to vector<4x256xf32>
    %470 = arith.mulf %468, %469 : vector<4x256xf32>
    %471 = vector.extract_strided_slice %460 {offsets = [0, 17], sizes = [4, 256], strides = [1, 1]} : vector<4x290xf32> to vector<4x256xf32>
    %472 = vector.extract_strided_slice %460 {offsets = [0, 18], sizes = [4, 256], strides = [1, 1]} : vector<4x290xf32> to vector<4x256xf32>
    %473 = vector.broadcast %24 : vector<1x256xf32> to vector<4x256xf32>
    %474 = arith.mulf %472, %473 : vector<4x256xf32>
    %475 = vector.extract_strided_slice %460 {offsets = [0, 32], sizes = [4, 256], strides = [1, 1]} : vector<4x290xf32> to vector<4x256xf32>
    %476 = vector.broadcast %20 : vector<1x256xf32> to vector<4x256xf32>
    %477 = arith.mulf %475, %476 : vector<4x256xf32>
    %478 = vector.extract_strided_slice %460 {offsets = [0, 33], sizes = [4, 256], strides = [1, 1]} : vector<4x290xf32> to vector<4x256xf32>
    %479 = vector.extract_strided_slice %460 {offsets = [0, 34], sizes = [4, 256], strides = [1, 1]} : vector<4x290xf32> to vector<4x256xf32>
    %480 = vector.broadcast %24 : vector<1x256xf32> to vector<4x256xf32>
    %481 = arith.mulf %479, %480 : vector<4x256xf32>
    %482 = tpu.concatenate %438, %439, %442, %445, %446, %449, %452, %453, %456, %463, %464, %467, %470, %471, %474, %477 in 0 : vector<4x256xf32>, vector<4x256xf32>, vector<4x256xf32>, vector<4x256xf32>, vector<4x256xf32>, vector<4x256xf32>, vector<4x256xf32>, vector<4x256xf32>, vector<4x256xf32>, vector<4x256xf32>, vector<4x256xf32>, vector<4x256xf32>, vector<4x256xf32>, vector<4x256xf32>, vector<4x256xf32>, vector<4x256xf32> -> vector<64x256xf32>
    %483 = tpu.concatenate %478, %481 in 0 : vector<4x256xf32>, vector<4x256xf32> -> vector<8x256xf32>
    %484 = tpu.concatenate %482, %483 in 0 : vector<64x256xf32>, vector<8x256xf32> -> vector<72x256xf32>
    %cst_143 = arith.constant dense<0.000000e+00> : vector<8x256xf32>
    %485 = tpu.matmul %253, %484, %cst_143 {dimension_numbers = #tpu.dot_dimension_numbers<[1], [0], [0], [1], [0, 0, 1, 1], [], []>} : vector<8x72xf32>, vector<72x256xf32>, vector<8x256xf32> -> vector<8x256xf32>
    %486 = vector.broadcast %254 : vector<8x1xf32> to vector<8x256xf32>
    %487 = arith.addf %485, %486 : vector<8x256xf32>
    %c1_144 = arith.constant 1 : index
    %c1_145 = arith.constant 1 : index
    %c0_146 = arith.constant 0 : index
    %c0_147 = arith.constant 0 : index
    %488 = vector.load %arg9[%c1_144, %c1_145, %c0_146, %c0_147] : memref<2x2x8x256xf32, #tpu.memory_space<vmem>>, vector<1x1x8x256xf32>
    %489 = vector.shape_cast %488 : vector<1x1x8x256xf32> to vector<8x256xf32>
    %490 = vector.shape_cast %487 : vector<8x256xf32> to vector<1x1x8x256xf32>
    tpu.vector_store %arg9[%c1_144, %c1_145, %c0_146, %c0_147], %490 {strides = array<i32>} : memref<2x2x8x256xf32, #tpu.memory_space<vmem>>, vector<1x1x8x256xf32>,
    %c0_148 = arith.constant 0 : index
    %c0_149 = arith.constant 0 : index
    %c0_150 = arith.constant 0 : index
    %c0_151 = arith.constant 0 : index
    %491 = vector.load %arg9[%c0_148, %c0_149, %c0_150, %c0_151] : memref<2x2x8x256xf32, #tpu.memory_space<vmem>>, vector<2x2x8x256xf32>
    %492 = vector.shape_cast %491 : vector<2x2x8x256xf32> to vector<4x8x256xf32>
    %cst_152 = arith.constant dense<0.000000e+00> : vector<8x256xf32>
    %493 = vector.multi_reduction <add>, %492, %cst_152 [0] : vector<4x8x256xf32> to vector<8x256xf32>
    %cst_153 = arith.constant dense<0.000000e+00> : vector<8xf32>
    %494 = vector.multi_reduction <add>, %493, %cst_153 [1] : vector<8x256xf32> to vector<8xf32>
    %495 = vector.shape_cast %494 : vector<8xf32> to vector<8x1xf32>
    %cst_154 = arith.constant 9.765625E-4 : f32
    %496 = vector.broadcast %cst_154 : f32 to vector<8x1xf32>
    %497 = arith.mulf %495, %496 : vector<8x1xf32>
    %498 = vector.shape_cast %497 : vector<8x1xf32> to vector<1x8x1xf32>
    %499 = vector.broadcast %498 : vector<1x8x1xf32> to vector<4x8x256xf32>
    %500 = arith.subf %492, %499 : vector<4x8x256xf32>
    %501 = arith.mulf %500, %500 : vector<4x8x256xf32>
    %cst_155 = arith.constant dense<0.000000e+00> : vector<8x256xf32>
    %502 = vector.multi_reduction <add>, %501, %cst_155 [0] : vector<4x8x256xf32> to vector<8x256xf32>
    %cst_156 = arith.constant dense<0.000000e+00> : vector<8xf32>
    %503 = vector.multi_reduction <add>, %502, %cst_156 [1] : vector<8x256xf32> to vector<8xf32>
    %504 = vector.shape_cast %503 : vector<8xf32> to vector<8x1xf32>
    %cst_157 = arith.constant 9.765625E-4 : f32
    %505 = vector.broadcast %cst_157 : f32 to vector<8x1xf32>
    %506 = arith.mulf %504, %505 : vector<8x1xf32>
    %c0_158 = arith.constant 0 : index
    %c0_159 = arith.constant 0 : index
    %507 = vector.load %arg7[%c0_158, %c0_159] : memref<8x1xf32, #tpu.memory_space<vmem>>, vector<8x1xf32>
    %cst_160 = arith.constant 9.99999974E-6 : f32
    %508 = vector.broadcast %cst_160 : f32 to vector<8x1xf32>
    %509 = arith.addf %506, %508 : vector<8x1xf32>
    %510 = math.rsqrt %509 : vector<8x1xf32>
    %511 = arith.mulf %507, %510 : vector<8x1xf32>
    %c0_161 = arith.constant 0 : index
    %c0_162 = arith.constant 0 : index
    %512 = vector.load %arg8[%c0_161, %c0_162] : memref<8x1xf32, #tpu.memory_space<vmem>>, vector<8x1xf32>
    %513 = arith.mulf %497, %511 : vector<8x1xf32>
    %514 = arith.subf %512, %513 : vector<8x1xf32>
    %515 = vector.shape_cast %511 : vector<8x1xf32> to vector<1x8x1xf32>
    %516 = vector.broadcast %515 : vector<1x8x1xf32> to vector<4x8x256xf32>
    %517 = arith.mulf %492, %516 : vector<4x8x256xf32>
    %518 = vector.shape_cast %514 : vector<8x1xf32> to vector<1x8x1xf32>
    %519 = vector.broadcast %518 : vector<1x8x1xf32> to vector<4x8x256xf32>
    %520 = arith.addf %517, %519 : vector<4x8x256xf32>
    %cst_163 = arith.constant 0.000000e+00 : f32
    %521 = vector.broadcast %cst_163 : f32 to vector<4x8x256xf32>
    %522 = arith.maximumf %520, %521 : vector<4x8x256xf32>
    %523 = vector.shape_cast %522 : vector<4x8x256xf32> to vector<2x2x8x256xf32>
    %c0_164 = arith.constant 0 : index
    %c0_165 = arith.constant 0 : index
    %c0_166 = arith.constant 0 : index
    %c0_167 = arith.constant 0 : index
    %524 = vector.load %arg9[%c0_164, %c0_165, %c0_166, %c0_167] : memref<2x2x8x256xf32, #tpu.memory_space<vmem>>, vector<2x2x8x256xf32>
    tpu.vector_store %arg9[%c0_164, %c0_165, %c0_166, %c0_167], %523 {strides = array<i32>} : memref<2x2x8x256xf32, #tpu.memory_space<vmem>>, vector<2x2x8x256xf32>,
    return
  }
}

</mosaic_0001>

<bundles_post_ra>
// kernel: conv_block_forward.1
= control target key start
LH: loop header
LB: loop body
LE: loop exit
PB: predicated region body
PF: predicated region fallthrough
CT: control target
= control target key end

     0   :  { %v5901_v0 = vlaneseq  ;;  %v5902_v3 = vmov 0.0   ;;  %s3374_s13 = smov 17   ;;  %s3375_s14 = smov 34   ;;  %vm80_vm4 = vcmask 138240   ;;  %vm145_vm5 = vcmask 277504   ;;  %s5891_s0 = inlined_call_operand.vmem [shape: f32[2,3,4,256], index: 0, kind: input, shape index: {}]   ;;  %s5892_s1 = inlined_call_operand.vmem [shape: f32[4,36], index: 1, kind: input, shape index: {}]   ;;  %s5893_s2 = inlined_call_operand.vmem [shape: f32[4,1], index: 2, kind: input, shape index: {}]   ;;  %s5894_s3 = inlined_call_operand.vmem [shape: f32[4,1], index: 3, kind: input, shape index: {}]   ;;  %s5895_s4 = inlined_call_operand.vmem [shape: f32[4,1], index: 4, kind: input, shape index: {}]   ;;  %s5896_s6 = inlined_call_operand.vmem [shape: f32[8,1], index: 6, kind: input, shape index: {}]   ;;  %s5897_s5 = inlined_call_operand.vmem [shape: f32[8,72], index: 5, kind: input, shape index: {}]   ;;  %s5898_s7 = inlined_call_operand.vmem [shape: f32[8,1], index: 7, kind: input, shape index: {}]   ;;  %s5899_s8 = inlined_call_operand.vmem [shape: f32[8,1], index: 8, kind: input, shape index: {}]   ;;  %s5900_s9 = inlined_call_operand.vmem [shape: f32[2,2,8,256], index: 9, kind: output, shape index: {}]  }
   0x1   :  { %v73_v1 = vld [vmem:[%s5891_s0] sm:$0xff]  ;;  %v3283_v2 = vld [vmem:[%s5891_s0 + $0x8] sm:$0xff]  ;;  %351 = vmatprep.mubr.f32.mxu0 %v5902_v3  ;;  %574 = vmatprep.mubr.f32.mxu1 %v5902_v3  ;;  %s3376_s15 = smov 32   ;;  %s3377_s16 = smov 18   ;;  %v3287_v16 = vld [vmem:[%s5891_s0 + $0x10] sm:$0xff]  ;;  %vm133_vm6 = vcmask 261120  }
   0x2   :  { %76 = vrot.lane.b32.xlu0 %v73_v1, %s3374_s13  ;;  %v75_v4 = vcombine.high %v73_v1, %v73_v1  ;;  %367 = vrot.lane.b32.xlu1 %v3283_v2, %s3374_s13  ;;  %v33_v5 = vand.u32 127, %v5901_v0  ;;  %v366_v15 = vcombine.high %v3283_v2, %v3283_v2  ;;  %s3378_s19 = smov 16   ;;  %s3379_s20 = smov 2   ;;  %v590_v17 = vcombine.high %v3287_v16, %v3287_v16  ;;  %v3291_v18 = vld [vmem:[%s5891_s0 + $0x18] sm:$0xff]  ;;  %v3295_v20 = vld [vmem:[%s5891_s0 + $0x20] sm:$0xff] }
   0x3   :  { %v814_v19 = vcombine.high %v3291_v18, %v3291_v18  ;;  %v1038_v21 = vcombine.high %v3295_v20, %v3295_v20  ;;  %v3299_v22 = vld [vmem:[%s5891_s0 + $0x28] sm:$0xff]  ;;  %s3380_s27 = smov 111   ;;  %s3381_s0 = smov 95   ;;  %vm95_vm7 = vcmask 15360   ;;  %vm109_vm8 = vcmask 130048  }
   0x4   :  { %v34_v6 = vadd.s32 128, %v33_v5  ;;  %v39_v7 = vand.u32 15, %v33_v5  ;;  %v1262_v23 = vcombine.high %v3299_v22, %v3299_v22  ;;  %s3382_s28 = smov 127   ;;  %s3383_s29 = smov 96   ;;  %vm121_vm9 = vcmask 146432  }
   0x5   :  { %s3384_s30 = smov 94   ;;  %s3385_s10 = smov 126   ;;  %vm262_vm10 = vcmask 769024   ;;  %vm265_vm11 = vcmask 1043456   ;;  %vm248_vm12 = vcmask 777216   ;;  %vm237_vm13 = vcmask 785408  }
   0x6   :  { %78 = vrot.lane.b32.xlu0 %v75_v4, %s3374_s13  ;;  %v46_v8 = vand.u32 15, %v34_v6  ;;  %vm59_vm0 = vcmp.ge.s32.totalorder %v39_v7, 1  ;;  %vm65_vm1 = vcmp.le.s32.totalorder %v39_v7, 14  ;;  %s3386_s11 = smov 110   ;;  %s3387_s12 = smov 112   ;;  %vm223_vm14 = vcmask 900096  }
   0x7   :  { %v3453_v9 = vsel %vm59_vm0, 1.0, %v5902_v3  ;;  %v3278_v10 = vsel %vm65_vm1, 1.0, %v5902_v3  ;;  %vm206_vm15 = vcmask 908288   ;;  %vm164_vm0 = vcmask 1039360  }
   0x8   :  { %5967 = vst [vmem:[#allocation3_spill] sm:$0xff] %v3453_v9  ;;  %vm66_vm2 = vcmp.le.s32.totalorder %v46_v8, 14  ;;  %vm60_vm3 = vcmp.ge.s32.totalorder %v46_v8, 1  ;;  %vm178_vm1 = vcmask 1031168  }
   0x9   :  { %v3279_v11 = vsel %vm66_vm2, 1.0, %v5902_v3  ;;  %v3458_v12 = vsel %vm60_vm3, 1.0, %v5902_v3  ;;  %vm195_vm2 = vcmask 916480   ;;  %vm279_vm3 = vcmask 293888  }
   0xa   :  { %5968 = vst [vmem:[#allocation4_spill] sm:$0xff] %v3458_v12  ;;  %v3336_v13 = vpack.i.bf16 %v3279_v11, %v3278_v10  ;;  %v3346_v14 = vpack.i.bf16 %v3458_v12, %v3453_v9 }
   0xc   :  { %3337 = vrot.lane.b32.xlu1 %v3336_v13, %s3375_s14  ;;  %3347 = vrot.lane.b32.xlu0 %v3346_v14, %s3376_s15 }
  0x10   :  { %3342 = vrot.lane.b32.xlu1 %v3336_v13, %s3377_s16  ;;  %369 = vrot.lane.b32.xlu0 %v366_v15, %s3374_s13 }
  0x14   :  { %3352 = vrot.lane.b32.xlu1 %v3346_v14, %s3378_s19  ;;  %3357 = vrot.lane.b32.xlu0 %v3336_v13, %s3379_s20 }
  0x18   :  { %591 = vrot.lane.b32.xlu1 %v3287_v16, %s3374_s13  ;;  %593 = vrot.lane.b32.xlu0 %v590_v17, %s3374_s13 }
  0x1c   :  { %815 = vrot.lane.b32.xlu1 %v3291_v18, %s3374_s13  ;;  %817 = vrot.lane.b32.xlu0 %v814_v19, %s3374_s13 }
  0x20   :  { %1039 = vrot.lane.b32.xlu1 %v3295_v20, %s3374_s13  ;;  %1041 = vrot.lane.b32.xlu0 %v1038_v21, %s3374_s13 }
  0x24   :  { %1263 = vrot.lane.b32.xlu1 %v3299_v22, %s3374_s13  ;;  %1265 = vrot.lane.b32.xlu0 %v1262_v23, %s3374_s13 }
  0x74   :  { %v77_v24 = vpop.permute.xlu0 %76  ;;  %v368_v25 = vpop.permute.xlu1 %367 }
  0x75   :  { %v3484_v26 = vsel %vm80_vm4, 0.0, %v77_v24  ;;  %v3489_v27 = vsel %vm80_vm4, 0.0, %v368_v25 }
  0x76   :  { %5969 = vst [vmem:[#allocation5_spill] sm:$0xff] %v3484_v26  ;;  %200 = vrot.lane.b32.xlu1 %v3484_v26, %s3380_s27  ;;  %v396_v30 = vrot.slane %v3489_v27, 4  ;;  %v155_v31 = vrot.slane %v3484_v26, 4 }
  0x78   :  { %v79_v28 = vpop.permute.xlu0 %78 }
  0x79   :  { %v3492_v29 = vsel %vm80_vm4, %v77_v24, %v79_v28  ;;  %v3503_v33 = vsel %vm80_vm4, %v79_v28, 0.0 }
  0x7a   :  { %438 = vrot.lane.b32.xlu1 %v3489_v27, %s3380_s27  ;;  %202 = vrot.lane.b32.xlu0 %v3492_v29, %s3380_s27  ;;  %v157_v37 = vrot.slane %v3503_v33, 4  ;;  %v156_v38 = vrot.slane %v3492_v29, 4 }
  0x7e   :  { %242 = vrot.lane.b32.xlu1 %v155_v31, %s3381_s0  ;;  %v3348_v32 = vpop.permute.xlu0 %3347  ;;  %477 = vrot.lane.b32.xlu0 %v396_v30, %s3381_s0  ;;  %v3338_v41 = vpop.permute.xlu1 %3337 }
  0x7f   :  { %v3528_v42 = vunpack.i.l.bf16 %v3348_v32  ;;  %v3531_v43 = vunpack.i.l.bf16 %v3338_v41  ;;  %v3548_v51 = vunpack.i.h.bf16 %v3338_v41  ;;  %v3556_v55 = vunpack.i.h.bf16 %v3348_v32 }
  0x81   :  { %v138_v44 = vmul.f32 %v3528_v42, %v3484_v26  ;;  %v150_v46 = vmul.f32 %v3531_v43, %v3484_v26  ;;  %v391_v48 = vmul.f32 %v3531_v43, %v3489_v27  ;;  %v388_v50 = vmul.f32 %v3528_v42, %v3489_v27 }
  0x82   :  { %204 = vrot.lane.b32.xlu1 %v3503_v33, %s3380_s27  ;;  %v370_v34 = vpop.permute.xlu0 %369  ;;  %v3343_v49 = vpop.permute.xlu1 %3342  ;;  %v152_v57 = vmul.f32 %v3548_v51, %v3503_v33  ;;  %v140_v60 = vmul.f32 %v3556_v55, %v3503_v33  ;;  %v3584_v5 = vsel %vm145_vm5, %v3531_v43, %v3548_v51  ;;  %v3596_v10 = vsel %vm133_vm6, %v3528_v42, %v3556_v55 }
  0x83   :  { %v3508_v35 = vsel %vm80_vm4, %v370_v34, 0.0  ;;  %v3513_v36 = vsel %vm80_vm4, %v368_v25, %v370_v34  ;;  %v3558_v56 = vunpack.i.l.bf16 %v3343_v49  ;;  %v151_v8 = vmul.f32 %v3584_v5, %v3492_v29 }
  0x84   :  { %442 = vrot.lane.b32.xlu0 %v3508_v35, %s3380_s27  ;;  %v397_v39 = vrot.slane %v3513_v36, 4  ;;  %v398_v40 = vrot.slane %v3508_v35, 4  ;;  %v393_v59 = vmul.f32 %v3548_v51, %v3508_v35  ;;  %v390_v62 = vmul.f32 %v3556_v55, %v3508_v35 }
  0x85   :  { %5970 = vst [vmem:[#allocation6_spill] sm:$0xff] %v3558_v56  ;;  %v126_v61 = vmul.f32 %v3558_v56, %v3484_v26  ;;  %v385_v13 = vmul.f32 %v3558_v56, %v3489_v27  ;;  %v139_v14 = vmul.f32 %v3596_v10, %v3492_v29  ;;  %v3615_v19 = vunpack.i.h.bf16 %v3343_v49 }
  0x86   :  { %440 = vrot.lane.b32.xlu1 %v3513_v36, %s3380_s27  ;;  %v3358_v45 = vpop.permute.xlu0 %3357  ;;  %v3353_v54 = vpop.permute.xlu1 %3352  ;;  %v392_v24 = vmul.f32 %v3513_v36, %v3584_v5  ;;  %v389_v32 = vmul.f32 %v3513_v36, %v3596_v10 }
  0x87   :  { %v3540_v47 = vunpack.i.l.bf16 %v3358_v45  ;;  %v3563_v58 = vunpack.i.l.bf16 %v3353_v54  ;;  %v3578_v1 = vunpack.i.h.bf16 %v3358_v45  ;;  %v214_v2 = vrot.slane %v126_v61, 4 }
  0x88   :  { %399 = vrot.lane.b32.xlu0 %v396_v30, %s3382_s28  ;;  %v451_v16 = vrot.slane %v385_v13, 4  ;;  %v3620_v23 = vunpack.i.h.bf16 %v3353_v54  ;;  %v128_v30 = vmul.f32 %v3615_v19, %v3503_v33  ;;  %v387_v41 = vmul.f32 %v3615_v19, %v3508_v35 }
  0x89   :  { %v379_v52 = vmul.f32 %v3540_v47, %v3489_v27  ;;  %v100_v53 = vmul.f32 %v3540_v47, %v3484_v26  ;;  %v382_v63 = vmul.f32 %v3563_v58, %v3489_v27  ;;  %v102_v6 = vmul.f32 %v3578_v1, %v3503_v33 }
  0x8a   :  { %158 = vrot.lane.b32.xlu1 %v155_v31, %s3382_s28  ;;  %v114_v7 = vmul.f32 %v3563_v58, %v3484_v26  ;;  %v3606_v15 = vsel %vm95_vm7, %v3540_v47, %v3578_v1  ;;  %v381_v18 = vmul.f32 %v3578_v1, %v3508_v35  ;;  %v592_v20 = vpop.permute.xlu1 %591  ;;  %v594_v21 = vpop.permute.xlu0 %593  ;;  %5972 = vst [vmem:[#allocation8_spill] sm:$0xff] %v3620_v23  ;;  %v453_v45 = vrot.slane %v387_v41, 4 }
  0x8b   :  { %v425_v4 = vrot.slane %v382_v63, 4  ;;  %5971 = vst [vmem:[#allocation7_spill] sm:$0xff] %v3606_v15  ;;  %v101_v17 = vmul.f32 %v3606_v15, %v3492_v29  ;;  %v380_v22 = vmul.f32 %v3513_v36, %v3606_v15  ;;  %v3626_v25 = vsel %vm80_vm4, %v592_v20, %v594_v21 }
  0x8c   :  { %246 = vrot.lane.b32.xlu0 %v157_v37, %s3381_s0  ;;  %v186_v11 = vrot.slane %v114_v7, 4  ;;  %5973 = vst [vmem:[#allocation9_spill] sm:$0xff] %v3626_v25  ;;  %v616_v28 = vmul.f32 %v3626_v25, %v3584_v5  ;;  %v3635_v31 = vsel %vm109_vm8, %v3563_v58, %v3620_v23  ;;  %v116_v34 = vmul.f32 %v3620_v23, %v3503_v33 }
  0x8d   :  { %5974 = vst [vmem:[#allocation10_spill] sm:$0xff] %v3635_v31  ;;  %v383_v49 = vmul.f32 %v3513_v36, %v3635_v31 }
  0x8e   :  { %244 = vrot.lane.b32.xlu1 %v156_v38, %s3381_s0  ;;  %v818_v61 = vpop.permute.xlu0 %817 }
  0x90   :  { %479 = vrot.lane.b32.xlu0 %v397_v39, %s3381_s0 }
  0x92   :  { %481 = vrot.lane.b32.xlu1 %v398_v40, %s3381_s0  ;;  %v3690_v7 = vpop.permute.xlu0 %1041 }
  0x94   :  { %162 = vrot.lane.b32.xlu0 %v157_v37, %s3382_s28  ;;  %v216_v37 = vrot.slane %v128_v30, 4 }
  0x96   :  { %160 = vrot.lane.b32.xlu1 %v156_v38, %s3382_s28  ;;  %v115_v38 = vmul.f32 %v3635_v31, %v3492_v29 }
  0x98   :  { %401 = vrot.lane.b32.xlu0 %v397_v39, %s3382_s28  ;;  %v3647_v39 = vsel %vm121_vm9, %v3558_v56, %v3615_v19  ;;  %v187_v33 = vrot.slane %v115_v38, 4 }
  0x9a   :  { %403 = vrot.lane.b32.xlu1 %v398_v40, %s3382_s28  ;;  %v188_v40 = vrot.slane %v116_v34, 4 }
  0x9c   :  { %231 = vrot.lane.b32.xlu0 %v138_v44, %s3383_s29  ;;  %v386_v44 = vmul.f32 %v3513_v36, %v3647_v39 }
  0x9e   :  { %256 = vrot.lane.b32.xlu1 %v150_v46, %s3384_s30  ;;  %v384_v46 = vmul.f32 %v3620_v23, %v3508_v35  ;;  %v613_v35 = vmul.f32 %v3626_v25, %v3596_v10 }
  0xa0   :  { %490 = vrot.lane.b32.xlu0 %v391_v48, %s3384_s30  ;;  %v452_v48 = vrot.slane %v386_v44, 4 }
  0xa2   :  { %467 = vrot.lane.b32.xlu1 %v388_v50, %s3383_s29  ;;  %v427_v50 = vrot.slane %v384_v46, 4 }
  0xa4   :  { %412 = vrot.lane.b32.xlu0 %v379_v52, %s3385_s10  ;;  %v127_v52 = vmul.f32 %v3647_v39, %v3492_v29 }
  0xa6   :  { %172 = vrot.lane.b32.xlu1 %v100_v53, %s3385_s10  ;;  %v426_v53 = vrot.slane %v383_v49, 4  ;;  %v215_v54 = vrot.slane %v127_v52, 4 }
  0xa8   :  { %260 = vrot.lane.b32.xlu0 %v152_v57, %s3384_s30  ;;  %v816_v57 = vpop.permute.xlu1 %815 }
  0xaa   :  { %494 = vrot.lane.b32.xlu1 %v393_v59, %s3384_s30  ;;  %v3670_v59 = vsel %vm80_vm4, %v594_v21, 0.0  ;;  %v3716_v21 = vsel %vm80_vm4, %v816_v57, %v818_v61 }
  0xab   :  { %v611_v30 = vmul.f32 %v3615_v19, %v3670_v59 }
  0xac   :  { %235 = vrot.lane.b32.xlu0 %v140_v60, %s3383_s29  ;;  %v617_v60 = vmul.f32 %v3548_v51, %v3670_v59  ;;  %v3677_v63 = vpop.permute.xlu1 %1039 }
  0xad   :  { %v677_v38 = vrot.slane %v611_v30, 4 }
  0xae   :  { %471 = vrot.lane.b32.xlu1 %v390_v62, %s3383_s29  ;;  %v621_v62 = vrot.slane %v3626_v25, 4 }
  0xb0   :  { %217 = vrot.lane.b32.xlu0 %v214_v2, %s3386_s11  ;;  %v614_v2 = vmul.f32 %v3556_v55, %v3670_v59 }
  0xb2   :  { %428 = vrot.lane.b32.xlu1 %v425_v4, %s3387_s12  ;;  %v3685_v4 = vsel %vm80_vm4, 0.0, %v592_v20 }
  0xb3   :  { %v5907_v13 = vrot.slane %v3685_v4, 4 }
  0xb4   :  { %176 = vrot.lane.b32.xlu0 %v102_v6, %s3385_s10  ;;  %v615_v6 = vmul.f32 %v3531_v43, %v3685_v4 }
  0xb6   :  { %258 = vrot.lane.b32.xlu1 %v151_v8, %s3384_s30  ;;  %v5908_v8 = vrot.slane %v3670_v59, 4 }
  0xb8   :  { %189 = vrot.lane.b32.xlu0 %v186_v11, %s3387_s12  ;;  %v3694_v11 = vpop.permute.xlu1 %1263 }
  0xba   :  { %233 = vrot.lane.b32.xlu1 %v139_v14, %s3383_s29  ;;  %v612_v14 = vmul.f32 %v3528_v42, %v3685_v4 }
  0xbc   :  { %454 = vrot.lane.b32.xlu0 %v451_v16, %s3386_s11  ;;  %v3706_v16 = vsel %vm80_vm4, %v818_v61, 0.0 }
  0xbd   :  { %v841_v20 = vmul.f32 %v3548_v51, %v3706_v16  ;;  %v835_v3 = vmul.f32 %v3615_v19, %v3706_v16 }
  0xbe   :  { %174 = vrot.lane.b32.xlu1 %v101_v17, %s3385_s10  ;;  %v3708_v17 = vpop.permute.xlu0 %1265 }
  0xc0   :  { %416 = vrot.lane.b32.xlu0 %v381_v18, %s3385_s10 }
  0xc2   :  { %414 = vrot.lane.b32.xlu1 %v380_v22, %s3385_s10  ;;  %v840_v22 = vmul.f32 %v3716_v21, %v3584_v5 }
  0xc4   :  { %492 = vrot.lane.b32.xlu0 %v392_v24, %s3384_s30 }
  0xc6   :  { %716 = vrot.lane.b32.xlu1 %v616_v28, %s3384_s30 }
  0xc8   :  { %469 = vrot.lane.b32.xlu0 %v389_v32, %s3383_s29  ;;  %v610_v32 = vmul.f32 %v3626_v25, %v3647_v39 }
  0xca   :  { %221 = vrot.lane.b32.xlu1 %v216_v37, %s3386_s11 }
  0xcc   :  { %193 = vrot.lane.b32.xlu0 %v188_v40, %s3387_s12  ;;  %v676_v40 = vrot.slane %v610_v32, 4 }
  0xce   :  { %191 = vrot.lane.b32.xlu1 %v187_v33, %s3387_s12  ;;  %v838_v33 = vmul.f32 %v3556_v55, %v3706_v16 }
  0xd0   :  { %458 = vrot.lane.b32.xlu0 %v453_v45, %s3386_s11  ;;  %v837_v45 = vmul.f32 %v3716_v21, %v3596_v10 }
  0xd2   :  { %456 = vrot.lane.b32.xlu1 %v452_v48, %s3386_s11  ;;  %v5906_v48 = vrot.slane %v3706_v16, 4 }
  0xd4   :  { %432 = vrot.lane.b32.xlu0 %v427_v50, %s3387_s12  ;;  %v5905_v50 = vrot.slane %v3716_v21, 4 }
  0xd6   :  { %430 = vrot.lane.b32.xlu1 %v426_v53, %s3387_s12  ;;  %v3765_v53 = vsel %vm80_vm4, 0.0, %v816_v57 }
  0xd7   :  { %v5904_v32 = vrot.slane %v3765_v53, 4 }
  0xd8   :  { %219 = vrot.lane.b32.xlu0 %v215_v54, %s3386_s11 }
  0xda   :  { %693 = vrot.lane.b32.xlu1 %v613_v35, %s3383_s29  ;;  %v839_v35 = vmul.f32 %v3531_v43, %v3765_v53 }
  0xdc   :  { %718 = vrot.lane.b32.xlu0 %v617_v60, %s3384_s30  ;;  %v609_v60 = vmul.f32 %v3558_v56, %v3685_v4 }
  0xde   :  { %703 = vrot.lane.b32.xlu1 %v621_v62, %s3381_s0 }
  0xe0   :  { %695 = vrot.lane.b32.xlu0 %v614_v2, %s3383_s29  ;;  %v836_v2 = vmul.f32 %v3528_v42, %v3765_v53 }
  0xe2   :  { %714 = vrot.lane.b32.xlu1 %v615_v6, %s3384_s30  ;;  %v675_v6 = vrot.slane %v609_v60, 4 }
  0xe4   :  { %705 = vrot.lane.b32.xlu0 %v5908_v8, %s3381_s0 }
  0xe6   :  { %701 = vrot.lane.b32.xlu1 %v5907_v13, %s3381_s0  ;;  %v833_v13 = vmul.f32 %v3558_v56, %v3765_v53 }
  0xe8   :  { %v3710_v18 = vpop.permute.xlu1 %200  ;;  %691 = vrot.lane.b32.xlu0 %v612_v14, %s3383_s29 }
  0xea   :  { %942 = vrot.lane.b32.xlu1 %v841_v20, %s3384_s30  ;;  %v604_v20 = vmul.f32 %v3626_v25, %v3606_v15 }
  0xec   :  { %v3721_v24 = vpop.permute.xlu1 %438  ;;  %v3723_v28 = vpop.permute.xlu0 %202  ;;  %940 = vrot.lane.b32.xlu0 %v840_v22, %s3384_s30  ;;  %v607_v22 = vmul.f32 %v3626_v25, %v3635_v31 }
  0xee   :  { %666 = vrot.lane.b32.xlu1 %v3670_v59, %s3380_s27 }
  0xf0   :  { %v3732_v34 = vpop.permute.xlu1 %242  ;;  %664 = vrot.lane.b32.xlu0 %v3626_v25, %s3380_s27  ;;  %v3736_v37 = vpop.permute.xlu0 %477 }
  0xf2   :  { %682 = vrot.lane.b32.xlu1 %v677_v38, %s3386_s11 }
  0xf4   :  { %v3739_v41 = vpop.permute.xlu1 %204  ;;  %680 = vrot.lane.b32.xlu0 %v676_v40, %s3386_s11  ;;  %v650_v40 = vrot.slane %v607_v22, 4 }
  0xf6   :  { %v3744_v44 = vpop.permute.xlu0 %442  ;;  %919 = vrot.lane.b32.xlu1 %v838_v33, %s3383_s29 }
  0xf8   :  { %v3749_v46 = vpop.permute.xlu1 %440  ;;  %917 = vrot.lane.b32.xlu0 %v837_v45, %s3383_s29  ;;  %v605_v45 = vmul.f32 %v3578_v1, %v3670_v59 }
  0xfa   :  { %v3753_v49 = vpop.permute.xlu0 %399  ;;  %929 = vrot.lane.b32.xlu1 %v5906_v48, %s3381_s0 }
  0xfc   :  { %v3759_v52 = vpop.permute.xlu1 %158  ;;  %927 = vrot.lane.b32.xlu0 %v5905_v50, %s3381_s0 }
  0xfe   :  { %v3767_v54 = vpop.permute.xlu0 %246  ;;  %662 = vrot.lane.b32.xlu1 %v3685_v4, %s3380_s27 }
 0x100   :  { %v3775_v61 = vpop.permute.xlu1 %244  ;;  %938 = vrot.lane.b32.xlu0 %v839_v35, %s3384_s30  ;;  %v608_v35 = vmul.f32 %v3620_v23, %v3670_v59 }
 0x102   :  { %v3780_v57 = vpop.permute.xlu0 %479  ;;  %915 = vrot.lane.b32.xlu1 %v836_v2, %s3383_s29  ;;  %v834_v2 = vmul.f32 %v3716_v21, %v3647_v39 }
 0x104   :  { %v3783_v14 = vpop.permute.xlu1 %481  ;;  %678 = vrot.lane.b32.xlu0 %v675_v6, %s3386_s11 }
 0x106   :  { %v3790_v30 = vpop.permute.xlu0 %162  ;;  %638 = vrot.lane.b32.xlu1 %v604_v20, %s3385_s10  ;;  %v651_v20 = vrot.slane %v608_v35, 4 }
 0x108   :  { %v3794_v38 = vpop.permute.xlu1 %160  ;;  %925 = vrot.lane.b32.xlu0 %v5904_v32, %s3381_s0  ;;  %v603_v32 = vmul.f32 %v3540_v47, %v3685_v4 }
 0x10a   :  { %v3799_v33 = vpop.permute.xlu0 %401  ;;  %654 = vrot.lane.b32.xlu1 %v650_v40, %s3387_s12  ;;  %v900_v40 = vrot.slane %v834_v2, 4  ;;  %v901_v2 = vrot.slane %v835_v3, 4  ;;  %v899_v3 = vrot.slane %v833_v13, 4 }
 0x10c   :  { %v3806_v60 = vpop.permute.xlu1 %403  ;;  %640 = vrot.lane.b32.xlu0 %v605_v45, %s3385_s10 }
 0x10e   :  { %v232_v6 = vpop.permute.xlu0 %231  ;;  %888 = vrot.lane.b32.xlu1 %v3716_v21, %s3380_s27 }
 0x110   :  { %v257_v22 = vpop.permute.xlu1 %256  ;;  %656 = vrot.lane.b32.xlu0 %v651_v20, %s3387_s12  ;;  %v606_v20 = vmul.f32 %v3563_v58, %v3685_v4 }
 0x112   :  { %v3814_v0 = vpop.permute.xlu0 %490  ;;  %904 = vrot.lane.b32.xlu1 %v900_v40, %s3386_s11  ;;  %v649_v48 = vrot.slane %v606_v20, 4  ;;  %v831_v20 = vmul.f32 %v3716_v21, %v3635_v31  ;;  %v832_v31 = vmul.f32 %v3620_v23, %v3706_v16 }
 0x114   :  { %v3819_v45 = vpop.permute.xlu1 %467  ;;  %890 = vrot.lane.b32.xlu0 %v3706_v16, %s3380_s27  ;;  %v874_v13 = vrot.slane %v831_v20, 4  ;;  %v875_v23 = vrot.slane %v832_v31, 4 }
 0x116   :  { %v3825_v35 = vpop.permute.xlu0 %412  ;;  %636 = vrot.lane.b32.xlu1 %v603_v32, %s3385_s10 }
 0x118   :  { %v3830_v40 = vpop.permute.xlu1 %172  ;;  %906 = vrot.lane.b32.xlu0 %v901_v2, %s3386_s11  ;;  %v828_v2 = vmul.f32 %v3716_v21, %v3606_v15 }
 0x11a   :  { %v261_v50 = vpop.permute.xlu0 %260  ;;  %886 = vrot.lane.b32.xlu1 %v3765_v53, %s3380_s27 }
 0x11c   :  { %v495_v8 = vpop.permute.xlu1 %494  ;;  %652 = vrot.lane.b32.xlu0 %v649_v48, %s3387_s12 }
 0x11e   :  { %v236_v32 = vpop.permute.xlu0 %235  ;;  %625 = vrot.lane.b32.xlu1 %v621_v62, %s3382_s28  ;;  %v5975_v62 = vrot.slane %v3670_v59, 4 }
 0x120   :  { %v3841_v26 = vpop.permute.xlu1 %471  ;;  %902 = vrot.lane.b32.xlu0 %v899_v3, %s3386_s11  ;;  %v829_v3 = vmul.f32 %v3578_v1, %v3706_v16 }
 0x122   :  { %v3848_v56 = vpop.permute.xlu0 %217  ;;  %862 = vrot.lane.b32.xlu1 %v828_v2, %s3385_s10  ;;  %v830_v2 = vmul.f32 %v3563_v58, %v3765_v53 }
 0x124   :  { %v3851_v48 = vpop.permute.xlu1 %428  ;;  %627 = vrot.lane.b32.xlu0 %v5975_v62, %s3382_s28 }
 0x126   :  { %v3856_v25 = vpop.permute.xlu0 %176  ;;  %878 = vrot.lane.b32.xlu1 %v874_v13, %s3387_s12  ;;  %v5976_v13 = vrot.slane %v3685_v4, 4 }
 0x128   :  { %v259_v15 = vpop.permute.xlu1 %258  ;;  %864 = vrot.lane.b32.xlu0 %v829_v3, %s3385_s10 }
 0x129   :  { %v264_v59 = vsel %vm262_vm10, %v259_v15, %v261_v50  ;;  %v263_v20 = vsel %vm262_vm10, %v257_v22, %v259_v15  ;;  %v873_v50 = vrot.slane %v830_v2, 4  ;;  %v249_v15 = vsel %vm248_vm12, %v3732_v34, %v3775_v61 }
 0x12a   :  { %v3868_v62 = vpop.permute.xlu0 %189  ;;  %3280 = vmatprep.subr.msk.mxu0 %vm265_vm11, %v264_v59  ;;  %623 = vrot.lane.b32.xlu1 %v5976_v13, %s3382_s28  ;;  %v250_v22 = vsel %vm248_vm12, %v3775_v61, %v3767_v54  ;;  %v5977_v61 = vrot.slane %v3706_v16, 4 }
 0x12b   :  { %3281 = vmatpush1.msk.msra.mxu0 %vm265_vm11, %v263_v20 }
 0x12c   :  { %880 = vrot.lane.b32.xlu0 %v875_v23, %s3387_s12  ;;  %v234_v3 = vpop.permute.xlu1 %233  ;;  %v827_v23 = vmul.f32 %v3540_v47, %v3765_v53 }
 0x12d   :  { %v238_v59 = vsel %vm237_vm13, %v232_v6, %v234_v3  ;;  %v239_v13 = vsel %vm237_vm13, %v234_v3, %v236_v32  ;;  %v3900_v6 = vsel %vm80_vm4, %v3677_v63, %v3690_v7  ;;  %v5978_v32 = vrot.slane %v3716_v21, 4 }
 0x12e   :  { %v455_v31 = vpop.permute.xlu0 %454  ;;  %876 = vrot.lane.b32.xlu1 %v873_v50, %s3387_s12  ;;  %v273_v20 = vsel %vm265_vm11, %v239_v13, %v250_v22  ;;  %v272_v2 = vsel %vm265_vm11, %v238_v59, %v249_v15  ;;  %v1064_v50 = vmul.f32 %v3900_v6, %v3584_v5  ;;  %v5979_v59 = vrot.slane %v3765_v53, 4 }
 0x12f   :  { %311 = vmatprep.subr.mxu0 %v273_v20  ;;  %v1061_v20 = vmul.f32 %v3900_v6, %v3596_v10 }
 0x130   :  { %860 = vrot.lane.b32.xlu0 %v827_v23, %s3385_s10  ;;  %312 = vmatpush1.msra.mxu0 %v272_v2  ;;  %v3890_v34 = vpop.permute.xlu1 %174  ;;  %v3923_v23 = vsel %vm80_vm4, %v3690_v7, 0.0  ;;  %v483_v2 = vsel %vm248_vm12, %v3736_v37, %v3780_v57 }
 0x132   :  { %v3892_v54 = vpop.permute.xlu0 %416  ;;  %851 = vrot.lane.b32.xlu1 %v5977_v61, %s3382_s28  ;;  %v484_v61 = vsel %vm248_vm12, %v3780_v57, %v3783_v14  ;;  %v1062_v57 = vmul.f32 %v3556_v55, %v3923_v23 }
 0x134   :  { %849 = vrot.lane.b32.xlu0 %v5978_v32, %s3382_s28  ;;  %v3905_v3 = vpop.permute.xlu1 %414 }
 0x136   :  { %v493_v15 = vpop.permute.xlu0 %492  ;;  %1164 = vrot.lane.b32.xlu1 %v1064_v50, %s3384_s30 }
 0x137   :  { %v497_v16 = vsel %vm262_vm10, %v493_v15, %v495_v8  ;;  %v496_v22 = vsel %vm262_vm10, %v3814_v0, %v493_v15  ;;  %v1065_v0 = vmul.f32 %v3548_v51, %v3923_v23 }
 0x138   :  { %3284 = vmatprep.subr.msk.mxu1 %vm265_vm11, %v497_v16  ;;  %847 = vrot.lane.b32.xlu0 %v5979_v59, %s3382_s28  ;;  %v3917_v13 = vpop.permute.xlu1 %716 }
 0x139   :  { %3285 = vmatpush1.msk.msra.mxu1 %vm265_vm11, %v496_v22  ;;  %v1069_v22 = vrot.slane %v3900_v6, 4 }
 0x13a   :  { %v470_v8 = vpop.permute.xlu0 %469  ;;  %1141 = vrot.lane.b32.xlu1 %v1061_v20, %s3383_s29  ;;  %v1070_v20 = vrot.slane %v3923_v23, 4 }
 0x13b   :  { %v473_v7 = vsel %vm237_vm13, %v3819_v45, %v470_v8  ;;  %v474_v32 = vsel %vm237_vm13, %v470_v8, %v3841_v26  ;;  %v3950_v26 = vsel %vm80_vm4, 0.0, %v3677_v63  ;;  %v377_v8 = vmul.f32 %v3453_v9, %v3489_v27 }
 0x13c   :  { %1166 = vrot.lane.b32.xlu0 %v1065_v0, %s3384_s30  ;;  %v222_v50 = vpop.permute.xlu1 %221  ;;  %v505_v15 = vsel %vm265_vm11, %v474_v32, %v484_v61  ;;  %v504_v16 = vsel %vm265_vm11, %v473_v7, %v483_v2  ;;  %v1063_v45 = vmul.f32 %v3531_v43, %v3950_v26  ;;  %v3961_v63 = vmul.f32 %v3458_v12, %v3492_v29 }
 0x13d   :  { %534 = vmatprep.subr.mxu1 %v505_v15  ;;  %v3966_v0 = vsel %vm80_vm4, %v3694_v11, %v3708_v17  ;;  %v3970_v2 = vsel %vm80_vm4, %v3708_v17, 0.0  ;;  %v1068_v27 = vrot.slane %v3950_v26, 4  ;;  %v444_v29 = vsel %vm206_vm15, %v3721_v24, %v3749_v46 }
 0x13e   :  { %535 = vmatpush1.msra.mxu1 %v504_v16  ;;  %v194_v37 = vpop.permute.xlu0 %193  ;;  %1151 = vrot.lane.b32.xlu1 %v1069_v22, %s3381_s0  ;;  %v445_v7 = vsel %vm206_vm15, %v3749_v46, %v3744_v44  ;;  %v1288_v44 = vmul.f32 %v3966_v0, %v3584_v5  ;;  %v378_v46 = vmul.f32 %v3458_v12, %v3513_v36 }
 0x140   :  { %1143 = vrot.lane.b32.xlu0 %v1062_v57, %s3383_s29  ;;  %v192_v14 = vpop.permute.xlu1 %191  ;;  %v1060_v57 = vmul.f32 %v3528_v42, %v3950_v26 }
 0x142   :  { %v459_v59 = vpop.permute.xlu0 %458  ;;  %1162 = vrot.lane.b32.xlu1 %v1063_v45, %s3384_s30  ;;  %v1289_v45 = vmul.f32 %v3548_v51, %v3970_v2 }
 0x144   :  { %1153 = vrot.lane.b32.xlu0 %v1070_v20, %s3381_s0  ;;  %v457_v61 = vpop.permute.xlu1 %456 }
 0x145   :  { %v460_v32 = vsel %vm223_vm14, %v455_v31, %v457_v61  ;;  %v461_v17 = vsel %vm223_vm14, %v457_v61, %v459_v59  ;;  %v1059_v31 = vmul.f32 %v3615_v19, %v3923_v23  ;;  %v1058_v59 = vmul.f32 %v3900_v6, %v3647_v39 }
 0x146   :  { %v433_v15 = vpop.permute.xlu0 %432  ;;  %1149 = vrot.lane.b32.xlu1 %v1068_v27, %s3381_s0  ;;  %v503_v16 = vsel %vm265_vm11, %v445_v7, %v461_v17  ;;  %v502_v24 = vsel %vm265_vm11, %v444_v29, %v460_v32  ;;  %v207_v61 = vsel %vm206_vm15, %v3710_v18, %v3723_v28  ;;  %v406_v29 = vsel %vm164_vm0, %v3799_v33, %v3806_v60 }
 0x147   :  { %536 = vmatprep.subr.mxu1 %v503_v16  ;;  %v418_v7 = vsel %vm178_vm1, %v3825_v35, %v3905_v3  ;;  %v419_v32 = vsel %vm178_vm1, %v3905_v3, %v3892_v54  ;;  %v208_v60 = vsel %vm206_vm15, %v3723_v28, %v3739_v41  ;;  %v405_v16 = vsel %vm164_vm0, %v3753_v49, %v3799_v33 }
 0x148   :  { %1139 = vrot.lane.b32.xlu0 %v1060_v57, %s3383_s29  ;;  %537 = vmatpush1.msra.mxu1 %v502_v24  ;;  %v431_v36 = vpop.permute.xlu1 %430  ;;  %v197_v3 = vsel %vm195_vm2, %v192_v14, %v194_v37  ;;  %v499_v28 = vsel %vm265_vm11, %v378_v46, %v406_v29  ;;  %v196_v41 = vsel %vm195_vm2, %v3868_v62, %v192_v14 }
 0x149   :  { %v434_v18 = vsel %vm195_vm2, %v3851_v48, %v431_v36  ;;  %v435_v17 = vsel %vm195_vm2, %v431_v36, %v433_v15  ;;  %v180_v62 = vsel %vm178_vm1, %v3890_v34, %v3856_v25  ;;  %v179_v37 = vsel %vm178_vm1, %v3830_v40, %v3890_v34  ;;  %v5980_v25 = vld [vmem:[#allocation5_spill] sm:$0xff] }
 0x14a   :  { %v220_v57 = vpop.permute.xlu0 %219  ;;  %1390 = vrot.lane.b32.xlu1 %v1289_v45, %s3384_s30  ;;  %v501_v35 = vsel %vm265_vm11, %v419_v32, %v435_v17  ;;  %v500_v54 = vsel %vm265_vm11, %v418_v7, %v434_v18  ;;  %v269_v45 = vsel %vm265_vm11, %v180_v62, %v197_v3  ;;  %v1286_v36 = vmul.f32 %v3556_v55, %v3970_v2 }
 0x14b   :  { %v224_v48 = vsel %vm223_vm14, %v3848_v56, %v220_v57  ;;  %v225_v15 = vsel %vm223_vm14, %v220_v57, %v222_v50  ;;  %538 = vmatprep.subr.mxu1 %v501_v35  ;;  %v165_v56 = vsel %vm164_vm0, %v3759_v52, %v3794_v38  ;;  %v166_v50 = vsel %vm164_vm0, %v3794_v38, %v3790_v30 }
 0x14c   :  { %1388 = vrot.lane.b32.xlu0 %v1288_v44, %s3384_s30  ;;  %539 = vmatpush1.msra.mxu1 %v500_v54  ;;  %v694_v49 = vpop.permute.xlu1 %693  ;;  %v271_v33 = vsel %vm265_vm11, %v208_v60, %v225_v15  ;;  %v270_v24 = vsel %vm265_vm11, %v207_v61, %v224_v48  ;;  %v498_v52 = vsel %vm265_vm11, %v377_v8, %v405_v16  ;;  %v1125_v44 = vrot.slane %v1059_v31, 4  ;;  %v4062_v8 = vld [vmem:[%s5892_s1] sm:$0xf] }
 0x14d   :  { %313 = vmatprep.subr.mxu0 %v271_v33  ;;  %540 = vmatprep.subr.mxu1 %v499_v28  ;;  %v268_v30 = vsel %vm265_vm11, %v179_v37, %v196_v41  ;;  %v87_v38 = vmul.f32 %v3453_v9, %v5980_v25  ;;  %v267_v34 = vsel %vm265_vm11, %v3961_v63, %v166_v50  ;;  %v1124_v63 = vrot.slane %v1058_v59, 4  ;;  %v5984_v25 = vld [vmem:[#allocation10_spill] sm:$0xff] }
 0x14e   :  { %v719_v14 = vpop.permute.xlu0 %718  ;;  %1114 = vrot.lane.b32.xlu1 %v3923_v23, %s3380_s27  ;;  %314 = vmatpush1.msra.mxu0 %v270_v24  ;;  %v5981_v7 = vmov 0.0   ;;  %v1285_v59 = vmul.f32 %v3966_v0, %v3596_v10  ;;  %v1293_v54 = vrot.slane %v3966_v0, 4  ;;  %v4101_v41 = vsel %vm80_vm4, 0.0, %v3694_v11 }
 0x14f   :  { %541 = vmatpush1.msra.mxu1 %v498_v52  ;;  %315 = vmatprep.subr.mxu0 %v269_v45  ;;  %v266_v46 = vsel %vm265_vm11, %v87_v38, %v165_v56  ;;  %v721_v61 = vsel %vm262_vm10, %v3917_v13, %v719_v14  ;;  %v1287_v24 = vmul.f32 %v3531_v43, %v4101_v41  ;;  %v5983_v45 = vld [vmem:[#allocation7_spill] sm:$0xff] }
 0x150   :  { %1112 = vrot.lane.b32.xlu0 %v3900_v6, %s3380_s27  ;;  %316 = vmatpush1.msra.mxu0 %v268_v30  ;;  %v704_v40 = vpop.permute.xlu1 %703  ;;  %v1284_v11 = vmul.f32 %v3528_v42, %v4101_v41  ;;  %v1052_v30 = vmul.f32 %v3900_v6, %v5983_v45  ;;  %v1055_v38 = vmul.f32 %v3900_v6, %v5984_v25 }
 0x151   :  { %317 = vmatprep.subr.mxu0 %v267_v34  ;;  %3286 = vmatmul.mubr.msk.f32.vlgmr.msra.gmra.mxu1 %vm279_vm3, %v4062_v8  ;;  %v1292_v34 = vrot.slane %v4101_v41, 4 }
 0x152   :  { %v696_v29 = vpop.permute.xlu0 %695  ;;  %1130 = vrot.lane.b32.xlu1 %v1125_v44, %s3386_s11  ;;  %318 = vmatpush1.msra.mxu0 %v266_v46 }
 0x153   :  { %3288 = vmatprep.subr.msk.mxu0 %vm265_vm11, %v721_v61  ;;  %3282 = vmatmul.mubr.msk.f32.vlgmr.msra.gmra.mxu0 %vm279_vm3, %v4062_v8  ;;  %v698_v17 = vsel %vm237_vm13, %v694_v49, %v696_v29 }
 0x154   :  { %1128 = vrot.lane.b32.xlu0 %v1124_v63, %s3386_s11  ;;  %v715_v31 = vpop.permute.xlu1 %714  ;;  %798 = vmatprep.mubr.f32.mxu0 %v5981_v7  ;;  %v1098_v63 = vrot.slane %v1055_v38, 4 }
 0x155   :  { %v720_v32 = vsel %vm262_vm10, %v715_v31, %v3917_v13  ;;  %1022 = vmatprep.mubr.f32.mxu1 %v5981_v7  ;;  %v1294_v13 = vrot.slane %v3970_v2, 4 }
 0x156   :  { %v706_v18 = vpop.permute.xlu0 %705  ;;  %1367 = vrot.lane.b32.xlu1 %v1286_v36, %s3383_s29  ;;  %3289 = vmatpush1.msk.msra.mxu0 %vm265_vm11, %v720_v32  ;;  %v1053_v36 = vmul.f32 %v3578_v1, %v3923_v23  ;;  %v5985_v32 = vld [vmem:[#allocation8_spill] sm:$0xff] }
 0x157   :  { %v708_v60 = vsel %vm248_vm12, %v704_v40, %v706_v18  ;;  %v1056_v18 = vmul.f32 %v5985_v32, %v3923_v23  ;;  %v1278_v23 = vmul.f32 %v3563_v58, %v4101_v41 }
 0x158   :  { %1365 = vrot.lane.b32.xlu0 %v1285_v59, %s3383_s29  ;;  %v702_v16 = vpop.permute.xlu1 %701  ;;  %v729_v57 = vsel %vm265_vm11, %v698_v17, %v708_v60  ;;  %v1282_v17 = vmul.f32 %v3966_v0, %v3647_v39 }
 0x159   :  { %758 = vmatprep.subr.mxu0 %v729_v57  ;;  %v707_v3 = vsel %vm248_vm12, %v702_v16, %v704_v40  ;;  %v1099_v16 = vrot.slane %v1056_v18, 4 }
 0x15a   :  { %v692_v35 = vpop.permute.xlu0 %691  ;;  %1377 = vrot.lane.b32.xlu1 %v1294_v13, %s3381_s0 }
 0x15b   :  { %v697_v48 = vsel %vm237_vm13, %v692_v35, %v694_v49  ;;  %v5982_v49 = vld [vmem:[#allocation6_spill] sm:$0xff]  ;;  %v1348_v35 = vrot.slane %v1282_v17, 4 }
 0x15c   :  { %1375 = vrot.lane.b32.xlu0 %v1293_v54, %s3381_s0  ;;  %v943_v15 = vpop.permute.xlu1 %942  ;;  %v728_v28 = vsel %vm265_vm11, %v697_v48, %v707_v3  ;;  %v1057_v56 = vmul.f32 %v5982_v49, %v3950_v26 }
 0x15d   :  { %759 = vmatpush1.msra.mxu0 %v728_v28 }
 0x15e   :  { %v941_v33 = vpop.permute.xlu0 %940  ;;  %1110 = vrot.lane.b32.xlu1 %v3950_v26, %s3380_s27  ;;  %v1123_v14 = vrot.slane %v1057_v56, 4 }
 0x15f   :  { %v945_v50 = vsel %vm262_vm10, %v941_v33, %v943_v15  ;;  %v1283_v15 = vmul.f32 %v3615_v19, %v3970_v2 }
 0x160   :  { %1386 = vrot.lane.b32.xlu0 %v1287_v24, %s3384_s30  ;;  %3292 = vmatprep.subr.msk.mxu1 %vm265_vm11, %v945_v50  ;;  %v667_v62 = vpop.permute.xlu1 %666 }
 0x162   :  { %v665_v37 = vpop.permute.xlu0 %664  ;;  %1363 = vrot.lane.b32.xlu1 %v1284_v11, %s3383_s29 }
 0x163   :  { %v669_v44 = vsel %vm206_vm15, %v665_v37, %v667_v62  ;;  %v1051_v62 = vmul.f32 %v3540_v47, %v3950_v26 }
 0x164   :  { %1126 = vrot.lane.b32.xlu0 %v1123_v14, %s3386_s11  ;;  %v683_v52 = vpop.permute.xlu1 %682  ;;  %v1349_v14 = vrot.slane %v1283_v15, 4 }
 0x166   :  { %v681_v40 = vpop.permute.xlu0 %680  ;;  %1086 = vrot.lane.b32.xlu1 %v1052_v30, %s3385_s10 }
 0x167   :  { %v685_v46 = vsel %vm223_vm14, %v681_v40, %v683_v52  ;;  %v1054_v52 = vmul.f32 %v3563_v58, %v3950_v26 }
 0x168   :  { %1373 = vrot.lane.b32.xlu0 %v1292_v34, %s3381_s0  ;;  %v920_v61 = vpop.permute.xlu1 %919  ;;  %v727_v29 = vsel %vm265_vm11, %v669_v44, %v685_v46 }
 0x169   :  { %760 = vmatprep.subr.mxu0 %v727_v29  ;;  %v1281_v29 = vmul.f32 %v5982_v49, %v4101_v41 }
 0x16a   :  { %v918_v31 = vpop.permute.xlu0 %917  ;;  %1102 = vrot.lane.b32.xlu1 %v1098_v63, %s3387_s12 }
 0x16b   :  { %v922_v28 = vsel %vm237_vm13, %v918_v31, %v920_v61  ;;  %v1097_v61 = vrot.slane %v1054_v52, 4 }
 0x16c   :  { %1088 = vrot.lane.b32.xlu0 %v1053_v36, %s3385_s10  ;;  %v930_v59 = vpop.permute.xlu1 %929 }
 0x16e   :  { %v928_v60 = vpop.permute.xlu0 %927  ;;  %1336 = vrot.lane.b32.xlu1 %v3966_v0, %s3380_s27 }
 0x16f   :  { %v932_v3 = vsel %vm248_vm12, %v928_v60, %v930_v59  ;;  %v1347_v59 = vrot.slane %v1281_v29, 4 }
 0x170   :  { %1104 = vrot.lane.b32.xlu0 %v1099_v16, %s3387_s12  ;;  %v663_v57 = vpop.permute.xlu1 %662  ;;  %v953_v50 = vsel %vm265_vm11, %v922_v28, %v932_v3  ;;  %v1277_v28 = vmul.f32 %v3578_v1, %v3970_v2 }
 0x172   :  { %v939_v48 = vpop.permute.xlu0 %938  ;;  %1352 = vrot.lane.b32.xlu1 %v1348_v35, %s3386_s11 }
 0x173   :  { %v944_v24 = vsel %vm262_vm10, %v939_v48, %v941_v33  ;;  %v668_v33 = vsel %vm206_vm15, %v663_v57, %v665_v37 }
 0x174   :  { %1338 = vrot.lane.b32.xlu0 %v3970_v2, %s3380_s27  ;;  %3293 = vmatpush1.msk.msra.mxu1 %vm265_vm11, %v944_v24  ;;  %v916_v56 = vpop.permute.xlu1 %915  ;;  %v1280_v24 = vmul.f32 %v5985_v32, %v3970_v2 }
 0x175   :  { %982 = vmatprep.subr.mxu1 %v953_v50  ;;  %v921_v63 = vsel %vm237_vm13, %v916_v56, %v918_v31  ;;  %v1276_v31 = vmul.f32 %v3966_v0, %v5983_v45 }
 0x176   :  { %v679_v11 = vpop.permute.xlu0 %678  ;;  %1084 = vrot.lane.b32.xlu1 %v1051_v62, %s3385_s10  ;;  %v1323_v50 = vrot.slane %v1280_v24, 4 }
 0x177   :  { %v684_v30 = vsel %vm223_vm14, %v679_v11, %v681_v40 }
 0x178   :  { %1354 = vrot.lane.b32.xlu0 %v1349_v14, %s3386_s11  ;;  %v639_v38 = vpop.permute.xlu1 %638  ;;  %v726_v44 = vsel %vm265_vm11, %v668_v33, %v684_v30  ;;  %v1321_v33 = vrot.slane %v1278_v23, 4 }
 0x179   :  { %761 = vmatpush1.msra.mxu0 %v726_v44  ;;  %v1275_v44 = vmul.f32 %v3540_v47, %v4101_v41 }
 0x17a   :  { %v926_v46 = vpop.permute.xlu0 %925  ;;  %1334 = vrot.lane.b32.xlu1 %v4101_v41, %s3380_s27 }
 0x17b   :  { %v931_v37 = vsel %vm248_vm12, %v926_v46, %v928_v60  ;;  %v1279_v60 = vmul.f32 %v3966_v0, %v5984_v25 }
 0x17c   :  { %1100 = vrot.lane.b32.xlu0 %v1097_v61, %s3387_s12  ;;  %v655_v40 = vpop.permute.xlu1 %654  ;;  %v952_v36 = vsel %vm265_vm11, %v921_v63, %v931_v37  ;;  %v3388_v61 = vmov 0  }
 0x17d   :  { %983 = vmatpush1.msra.mxu1 %v952_v36  ;;  %v1322_v48 = vrot.slane %v1279_v60, 4  ;;  %3361 = vset.pattern.permute.xlu1 %v3388_v61  ;;  %v5986_v60 = vld [vmem:[#allocation9_spill] sm:$0xff] }
 0x17e   :  { %v641_v18 = vpop.permute.xlu0 %640  ;;  %1073 = vrot.lane.b32.xlu1 %v1069_v22, %s3382_s28  ;;  %3362 = vset.pattern.permute.xlu0 %v3388_v61  ;;  %v602_v2 = vmul.f32 %v3458_v12, %v5986_v60 }
 0x17f   :  { %v643_v57 = vsel %vm178_vm1, %v639_v38, %v641_v18 }
 0x180   :  { %1350 = vrot.lane.b32.xlu0 %v1347_v59, %s3386_s11  ;;  %v889_v17 = vpop.permute.xlu1 %888 }
 0x182   :  { %v657_v16 = vpop.permute.xlu0 %656  ;;  %1310 = vrot.lane.b32.xlu1 %v1276_v31, %s3385_s10 }
 0x183   :  { %v659_v35 = vsel %vm195_vm2, %v655_v40, %v657_v16 }
 0x184   :  { %1075 = vrot.lane.b32.xlu0 %v1070_v20, %s3382_s28  ;;  %v905_v22 = vpop.permute.xlu1 %904  ;;  %v725_v3 = vsel %vm265_vm11, %v643_v57, %v659_v35  ;;  %v601_v35 = vmul.f32 %v3453_v9, %v3685_v4 }
 0x185   :  { %762 = vmatprep.subr.mxu0 %v725_v3 }
 0x186   :  { %v891_v15 = vpop.permute.xlu0 %890  ;;  %1326 = vrot.lane.b32.xlu1 %v1322_v48, %s3387_s12 }
 0x187   :  { %v893_v62 = vsel %vm206_vm15, %v889_v17, %v891_v15 }
 0x188   :  { %1312 = vrot.lane.b32.xlu0 %v1277_v28, %s3385_s10  ;;  %v637_v56 = vpop.permute.xlu1 %636 }
 0x18a   :  { %v907_v20 = vpop.permute.xlu0 %906  ;;  %1071 = vrot.lane.b32.xlu1 %v1068_v27, %s3382_s28  ;;  %v642_v27 = vsel %vm178_vm1, %v637_v56, %v639_v38 }
 0x18b   :  { %v909_v11 = vsel %vm223_vm14, %v905_v22, %v907_v20 }
 0x18c   :  { %1328 = vrot.lane.b32.xlu0 %v1323_v50, %s3387_s12  ;;  %v887_v14 = vpop.permute.xlu1 %886  ;;  %v951_v52 = vsel %vm265_vm11, %v893_v62, %v909_v11  ;;  %v826_v11 = vmul.f32 %v3458_v12, %v3716_v21 }
 0x18d   :  { %984 = vmatprep.subr.mxu1 %v951_v52  ;;  %v892_v36 = vsel %vm206_vm15, %v887_v14, %v889_v17 }
 0x18e   :  { %v653_v30 = vpop.permute.xlu0 %652  ;;  %1324 = vrot.lane.b32.xlu1 %v1321_v33, %s3387_s12 }
 0x18f   :  { %v658_v46 = vsel %vm195_vm2, %v653_v30, %v655_v40  ;;  %v72_v40 = vld [vmem:[%s5893_s2] sm:$0xf] }
 0x190   :  { %1308 = vrot.lane.b32.xlu0 %v1275_v44, %s3385_s10  ;;  %v626_v29 = vpop.permute.xlu1 %625  ;;  %v724_v63 = vsel %vm265_vm11, %v642_v27, %v658_v46  ;;  %v825_v44 = vmul.f32 %v3453_v9, %v3765_v53 }
 0x191   :  { %763 = vmatpush1.msra.mxu0 %v724_v63 }
 0x192   :  { %v903_v37 = vpop.permute.xlu0 %902  ;;  %1299 = vrot.lane.b32.xlu1 %v1294_v13, %s3382_s28 }
 0x193   :  { %v908_v38 = vsel %vm223_vm14, %v903_v37, %v905_v22 }
 0x194   :  { %1297 = vrot.lane.b32.xlu0 %v1293_v54, %s3382_s28  ;;  %v863_v18 = vpop.permute.xlu1 %862  ;;  %v950_v59 = vsel %vm265_vm11, %v892_v36, %v908_v38 }
 0x195   :  { %985 = vmatpush1.msra.mxu1 %v950_v59 }
 0x196   :  { %v628_v31 = vpop.permute.xlu0 %627  ;;  %276 = vperm.xlu1 %3361, %v72_v40  }
 0x197   :  { %v630_v13 = vsel %vm164_vm0, %v626_v29, %v628_v31 }
 0x198   :  { %1295 = vrot.lane.b32.xlu0 %v1292_v34, %s3382_s28  ;;  %v879_v17 = vpop.permute.xlu1 %878  ;;  %v723_v16 = vsel %vm265_vm11, %v602_v2, %v630_v13 }
 0x199   :  { %764 = vmatprep.subr.mxu0 %v723_v16 }
 0x19a   :  { %v865_v54 = vpop.permute.xlu0 %864 }
 0x19b   :  { %v867_v15 = vsel %vm178_vm1, %v863_v18, %v865_v54 }
 0x19c   :  { %v624_v57 = vpop.permute.xlu1 %623 }
 0x19d   :  { %v629_v22 = vsel %vm164_vm0, %v624_v57, %v626_v29 }
 0x19e   :  { %v881_v3 = vpop.permute.xlu0 %880  ;;  %v722_v48 = vsel %vm265_vm11, %v601_v35, %v629_v22 }
 0x19f   :  { %v883_v28 = vsel %vm195_vm2, %v879_v17, %v881_v3  ;;  %765 = vmatpush1.msra.mxu0 %v722_v48 }
 0x1a0   :  { %v877_v34 = vpop.permute.xlu1 %876  ;;  %v949_v24 = vsel %vm265_vm11, %v867_v15, %v883_v28  ;;  %3290 = vmatmul.mubr.msk.f32.vlgmr.msra.gmra.mxu0 %vm279_vm3, %v4062_v8 }
 0x1a1   :  { %986 = vmatprep.subr.mxu1 %v949_v24  ;;  %1246 = vmatprep.mubr.f32.mxu0 %v5981_v7  ;;  %v882_v56 = vsel %vm195_vm2, %v877_v34, %v879_v17 }
 0x1a2   :  { %v861_v4 = vpop.permute.xlu0 %860 }
 0x1a3   :  { %v866_v23 = vsel %vm178_vm1, %v861_v4, %v863_v18 }
 0x1a4   :  { %v852_v20 = vpop.permute.xlu1 %851  ;;  %v948_v50 = vsel %vm265_vm11, %v866_v23, %v882_v56 }
 0x1a5   :  { %987 = vmatpush1.msra.mxu1 %v948_v50 }
 0x1a6   :  { %v850_v62 = vpop.permute.xlu0 %849 }
 0x1a7   :  { %v854_v14 = vsel %vm164_vm0, %v850_v62, %v852_v20 }
 0x1a8   :  { %v1165_v52 = vpop.permute.xlu1 %1164  ;;  %v947_v33 = vsel %vm265_vm11, %v826_v11, %v854_v14 }
 0x1a9   :  { %988 = vmatprep.subr.mxu1 %v947_v33 }
 0x1aa   :  { %v848_v30 = vpop.permute.xlu0 %847 }
 0x1ab   :  { %v853_v27 = vsel %vm164_vm0, %v848_v30, %v850_v62 }
 0x1ac   :  { %v1142_v46 = vpop.permute.xlu1 %1141  ;;  %v946_v61 = vsel %vm265_vm11, %v825_v44, %v853_v27 }
 0x1ad   :  { %989 = vmatpush1.msra.mxu1 %v946_v61 }
 0x1ae   :  { %v1167_v29 = vpop.permute.xlu0 %1166  ;;  %3294 = vmatmul.mubr.msk.f32.vlgmr.msra.gmra.mxu1 %vm279_vm3, %v4062_v8 }
 0x1af   :  { %v1169_v21 = vsel %vm262_vm10, %v1165_v52, %v1167_v29  ;;  %1470 = vmatprep.mubr.f32.mxu1 %v5981_v7 }
 0x1b0   :  { %3296 = vmatprep.subr.msk.mxu0 %vm265_vm11, %v1169_v21  ;;  %v1152_v63 = vpop.permute.xlu1 %1151 }
 0x1b2   :  { %v1144_v37 = vpop.permute.xlu0 %1143 }
 0x1b3   :  { %v1146_v40 = vsel %vm237_vm13, %v1142_v46, %v1144_v37 }
 0x1b4   :  { %v1163_v36 = vpop.permute.xlu1 %1162 }
 0x1b5   :  { %v1168_v53 = vsel %vm262_vm10, %v1163_v36, %v1165_v52 }
 0x1b6   :  { %v1154_v38 = vpop.permute.xlu0 %1153  ;;  %3297 = vmatpush1.msk.msra.mxu0 %vm265_vm11, %v1168_v53 }
 0x1b7   :  { %v1156_v18 = vsel %vm248_vm12, %v1152_v63, %v1154_v38 }
 0x1b8   :  { %v1150_v59 = vpop.permute.xlu1 %1149  ;;  %v1177_v31 = vsel %vm265_vm11, %v1146_v40, %v1156_v18 }
 0x1b9   :  { %1206 = vmatprep.subr.mxu0 %v1177_v31  ;;  %v1155_v2 = vsel %vm248_vm12, %v1150_v59, %v1152_v63 }
 0x1ba   :  { %v1140_v60 = vpop.permute.xlu0 %1139 }
 0x1bb   :  { %v1145_v13 = vsel %vm237_vm13, %v1140_v60, %v1142_v46 }
 0x1bc   :  { %v1391_v17 = vpop.permute.xlu1 %1390  ;;  %v1176_v16 = vsel %vm265_vm11, %v1145_v13, %v1155_v2 }
 0x1bd   :  { %1207 = vmatpush1.msra.mxu0 %v1176_v16 }
 0x1be   :  { %v1389_v54 = vpop.permute.xlu0 %1388 }
 0x1bf   :  { %v1393_v57 = vsel %vm262_vm10, %v1389_v54, %v1391_v17 }
 0x1c0   :  { %3300 = vmatprep.subr.msk.mxu1 %vm265_vm11, %v1393_v57  ;;  %v1115_v35 = vpop.permute.xlu1 %1114 }
 0x1c2   :  { %v1113_v22 = vpop.permute.xlu0 %1112 }
 0x1c3   :  { %v1117_v15 = vsel %vm206_vm15, %v1113_v22, %v1115_v35 }
 0x1c4   :  { %v1131_v3 = vpop.permute.xlu1 %1130 }
 0x1c6   :  { %v1129_v48 = vpop.permute.xlu0 %1128 }
 0x1c7   :  { %v1133_v28 = vsel %vm223_vm14, %v1129_v48, %v1131_v3 }
 0x1c8   :  { %v1368_v34 = vpop.permute.xlu1 %1367  ;;  %v1175_v24 = vsel %vm265_vm11, %v1117_v15, %v1133_v28 }
 0x1c9   :  { %1208 = vmatprep.subr.mxu0 %v1175_v24 }
 0x1ca   :  { %v1366_v4 = vpop.permute.xlu0 %1365 }
 0x1cb   :  { %v1370_v11 = vsel %vm237_vm13, %v1366_v4, %v1368_v34 }
 0x1cc   :  { %v1378_v56 = vpop.permute.xlu1 %1377 }
 0x1ce   :  { %v1376_v23 = vpop.permute.xlu0 %1375 }
 0x1cf   :  { %v1380_v50 = vsel %vm248_vm12, %v1376_v23, %v1378_v56 }
 0x1d0   :  { %v1111_v20 = vpop.permute.xlu1 %1110  ;;  %v1401_v33 = vsel %vm265_vm11, %v1370_v11, %v1380_v50  ;;  %v1050_v50 = vmul.f32 %v3458_v12, %v3900_v6 }
 0x1d1   :  { %v1116_v44 = vsel %vm206_vm15, %v1111_v20, %v1113_v22 }
 0x1d2   :  { %v1387_v62 = vpop.permute.xlu0 %1386 }
 0x1d3   :  { %v1392_v14 = vsel %vm262_vm10, %v1387_v62, %v1389_v54 }
 0x1d4   :  { %3301 = vmatpush1.msk.msra.mxu1 %vm265_vm11, %v1392_v14  ;;  %v1364_v52 = vpop.permute.xlu1 %1363 }
 0x1d5   :  { %1430 = vmatprep.subr.mxu1 %v1401_v33  ;;  %v1369_v21 = vsel %vm237_vm13, %v1364_v52, %v1366_v4 }
 0x1d6   :  { %v1127_v30 = vpop.permute.xlu0 %1126 }
 0x1d7   :  { %v1132_v27 = vsel %vm223_vm14, %v1127_v30, %v1129_v48  ;;  %v1049_v30 = vmul.f32 %v3453_v9, %v3950_v26 }
 0x1d8   :  { %v1087_v46 = vpop.permute.xlu1 %1086  ;;  %v1174_v61 = vsel %vm265_vm11, %v1116_v44, %v1132_v27 }
 0x1d9   :  { %1209 = vmatpush1.msra.mxu0 %v1174_v61 }
 0x1da   :  { %v1374_v29 = vpop.permute.xlu0 %1373 }
 0x1db   :  { %v1379_v63 = vsel %vm248_vm12, %v1374_v29, %v1376_v23 }
 0x1dc   :  { %v1103_v37 = vpop.permute.xlu1 %1102  ;;  %v1400_v36 = vsel %vm265_vm11, %v1369_v21, %v1379_v63 }
 0x1dd   :  { %1431 = vmatpush1.msra.mxu1 %v1400_v36 }
 0x1de   :  { %v1089_v53 = vpop.permute.xlu0 %1088 }
 0x1df   :  { %v1091_v18 = vsel %vm178_vm1, %v1087_v46, %v1089_v53 }
 0x1e0   :  { %v1337_v38 = vpop.permute.xlu1 %1336 }
 0x1e2   :  { %v1105_v40 = vpop.permute.xlu0 %1104 }
 0x1e3   :  { %v1107_v59 = vsel %vm195_vm2, %v1103_v37, %v1105_v40  ;;  %v1274_v40 = vmul.f32 %v3458_v12, %v3966_v0 }
 0x1e4   :  { %v1353_v31 = vpop.permute.xlu1 %1352  ;;  %v1173_v60 = vsel %vm265_vm11, %v1091_v18, %v1107_v59 }
 0x1e5   :  { %1210 = vmatprep.subr.mxu0 %v1173_v60  ;;  %v1273_v60 = vmul.f32 %v3453_v9, %v4101_v41 }
 0x1e6   :  { %v1339_v2 = vpop.permute.xlu0 %1338 }
 0x1e7   :  { %v1341_v16 = vsel %vm206_vm15, %v1337_v38, %v1339_v2 }
 0x1e8   :  { %v1085_v13 = vpop.permute.xlu1 %1084 }
 0x1e9   :  { %v1090_v3 = vsel %vm178_vm1, %v1085_v13, %v1087_v46 }
 0x1ea   :  { %v1355_v17 = vpop.permute.xlu0 %1354 }
 0x1eb   :  { %v1357_v54 = vsel %vm223_vm14, %v1353_v31, %v1355_v17 }
 0x1ec   :  { %v1335_v57 = vpop.permute.xlu1 %1334  ;;  %v1399_v35 = vsel %vm265_vm11, %v1341_v16, %v1357_v54 }
 0x1ed   :  { %1432 = vmatprep.subr.mxu1 %v1399_v35  ;;  %v1340_v24 = vsel %vm206_vm15, %v1335_v57, %v1337_v38 }
 0x1ee   :  { %v1101_v22 = vpop.permute.xlu0 %1100 }
 0x1ef   :  { %v1106_v48 = vsel %vm195_vm2, %v1101_v22, %v1103_v37 }
 0x1f0   :  { %v1074_v15 = vpop.permute.xlu1 %1073  ;;  %v1172_v28 = vsel %vm265_vm11, %v1090_v3, %v1106_v48 }
 0x1f1   :  { %1211 = vmatpush1.msra.mxu0 %v1172_v28 }
 0x1f2   :  { %v1351_v34 = vpop.permute.xlu0 %1350 }
 0x1f3   :  { %v1356_v4 = vsel %vm223_vm14, %v1351_v34, %v1353_v31 }
 0x1f4   :  { %v1311_v56 = vpop.permute.xlu1 %1310  ;;  %v1398_v23 = vsel %vm265_vm11, %v1340_v24, %v1356_v4 }
 0x1f5   :  { %1433 = vmatpush1.msra.mxu1 %v1398_v23 }
 0x1f6   :  { %v1076_v20 = vpop.permute.xlu0 %1075 }
 0x1f7   :  { %v1078_v62 = vsel %vm164_vm0, %v1074_v15, %v1076_v20 }
 0x1f8   :  { %v1327_v11 = vpop.permute.xlu1 %1326  ;;  %v1171_v14 = vsel %vm265_vm11, %v1050_v50, %v1078_v62 }
 0x1f9   :  { %1212 = vmatprep.subr.mxu0 %v1171_v14 }
 0x1fa   :  { %v1313_v52 = vpop.permute.xlu0 %1312 }
 0x1fb   :  { %v1315_v61 = vsel %vm178_vm1, %v1311_v56, %v1313_v52 }
 0x1fc   :  { %v1072_v33 = vpop.permute.xlu1 %1071 }
 0x1fd   :  { %v1077_v44 = vsel %vm164_vm0, %v1072_v33, %v1074_v15 }
 0x1fe   :  { %v1329_v27 = vpop.permute.xlu0 %1328  ;;  %v1170_v46 = vsel %vm265_vm11, %v1049_v30, %v1077_v44 }
 0x1ff   :  { %v1331_v6 = vsel %vm195_vm2, %v1327_v11, %v1329_v27  ;;  %1213 = vmatpush1.msra.mxu0 %v1170_v46 }
 0x200   :  { %3298 = vmatmul.mubr.msk.f32.vlgmr.msra.gmra.mxu0 %vm279_vm3, %v4062_v8  ;;  %v1325_v29 = vpop.permute.xlu1 %1324  ;;  %v1397_v21 = vsel %vm265_vm11, %v1315_v61, %v1331_v6 }
 0x201   :  { %1434 = vmatprep.subr.mxu1 %v1397_v21  ;;  %2036 = vmatprep.mubr.f32.mxu0 %v5981_v7  ;;  %v1330_v63 = vsel %vm195_vm2, %v1325_v29, %v1327_v11 }
 0x202   :  { %v1309_v26 = vpop.permute.xlu0 %1308 }
 0x203   :  { %v1314_v37 = vsel %vm178_vm1, %v1309_v26, %v1311_v56 }
 0x204   :  { %v1396_v36 = vsel %vm265_vm11, %v1314_v37, %v1330_v63  ;;  %v1300_v53 = vpop.permute.xlu1 %1299 }
 0x205   :  { %1435 = vmatpush1.msra.mxu1 %v1396_v36 }
 0x206   :  { %v1298_v38 = vpop.permute.xlu0 %1297 }
 0x207   :  { %v1302_v18 = vsel %vm164_vm0, %v1298_v38, %v1300_v53 }
 0x208   :  { %v1395_v59 = vsel %vm265_vm11, %v1274_v40, %v1302_v18 }
 0x209   :  { %1436 = vmatprep.subr.mxu1 %v1395_v59 }
 0x20a   :  { %v1296_v31 = vpop.permute.xlu0 %1295 }
 0x20b   :  { %v1301_v2 = vsel %vm164_vm0, %v1296_v31, %v1298_v38 }
 0x20c   :  { %v1394_v13 = vsel %vm265_vm11, %v1273_v60, %v1301_v2 }
 0x20d   :  { %1437 = vmatpush1.msra.mxu1 %v1394_v13 }
 0x20e   :  { %3302 = vmatmul.mubr.msk.f32.vlgmr.msra.gmra.mxu1 %vm279_vm3, %v4062_v8 }
 0x20f   :  { %2413 = vmatprep.mubr.f32.mxu1 %v5981_v7 }
 0x211   :  { %v576_v17 = vpop.f32.mrf.mxu1  ;;  %v277_v57 = vpop.permute.xlu1 %276 }
 0x212   :  { %v577_v48 = vadd.f32 %v576_v17, %v277_v57 }
 0x213   :  { %v353_v0 = vpop.f32.mrf.mxu0  ;;  %v578_v54 = vpop.f32.mrf.mxu1 }
 0x214   :  { %v354_v22 = vadd.f32 %v353_v0, %v277_v57  ;;  %v579_v41 = vadd.f32 %v578_v54, %v277_v57 }
 0x215   :  { %v355_v16 = vpop.f32.mrf.mxu0 }
 0x216   :  { %v356_v3 = vadd.f32 %v355_v16, %v277_v57  ;;  %v4314_v24 = vcombine.low %v577_v48, %v579_v41  ;;  %v3314_v8 = vcombine.low %v579_v41, %v579_v41 }
 0x218   :  { %v4312_v34 = vcombine.low %v354_v22, %v356_v3  ;;  %v3313_v4 = vcombine.low %v356_v3, %v356_v3  ;;  %v1508_v11 = vsel %vm265_vm11, %v4314_v24, 0.0  ;;  %v1519_v52 = vsel %vm265_vm11, %v3314_v8, 0.0 }
 0x21a   :  { %v1507_v62 = vsel %vm265_vm11, %v4312_v34, 0.0  ;;  %v1518_v14 = vsel %vm265_vm11, %v3313_v4, 0.0 }
 0x21b   :  { %v1509_v29 = vadd.f32 %v1508_v11, %v1507_v62  ;;  %v1520_v21 = vadd.f32 %v1519_v52, %v1518_v14  ;;  %v5987_v11 = vlaneseq }
 0x21d   :  { %v1540_v14 = vshrl.u32 %v5987_v11, 7 }
 0x260   :  { %v800_v35 = vpop.f32.mrf.mxu0 }
 0x261   :  { %v801_v23 = vadd.f32 %v800_v35, %v277_v57 }
 0x262   :  { %v802_v15 = vpop.f32.mrf.mxu0 }
 0x263   :  { %v803_v20 = vadd.f32 %v802_v15, %v277_v57 }
 0x265   :  { %v4322_v30 = vcombine.low %v801_v23, %v803_v20  ;;  %v3315_v44 = vcombine.low %v803_v20, %v803_v20 }
 0x267   :  { %v1510_v26 = vsel %vm265_vm11, %v4322_v30, 0.0  ;;  %v1521_v63 = vsel %vm265_vm11, %v3315_v44, 0.0 }
 0x268   :  { %v1511_v40 = vadd.f32 %v1510_v26, %v1509_v29  ;;  %v1522_v18 = vadd.f32 %v1521_v63, %v1520_v21 }
 0x26e   :  { %v1024_v28 = vpop.f32.mrf.mxu1 }
 0x26f   :  { %v1025_v27 = vadd.f32 %v1024_v28, %v277_v57 }
 0x270   :  { %v1026_v50 = vpop.f32.mrf.mxu1 }
 0x271   :  { %v1027_v46 = vadd.f32 %v1026_v50, %v277_v57 }
 0x273   :  { %v4327_v37 = vcombine.low %v1025_v27, %v1027_v46  ;;  %v3316_v36 = vcombine.low %v1027_v46, %v1027_v46 }
 0x275   :  { %v1512_v31 = vsel %vm265_vm11, %v4327_v37, 0.0  ;;  %v1523_v60 = vsel %vm265_vm11, %v3316_v36, 0.0 }
 0x276   :  { %v1513_v54 = vadd.f32 %v1512_v31, %v1511_v40  ;;  %v1524_v35 = vadd.f32 %v1523_v60, %v1522_v18 }
 0x2c0   :  { %v1248_v56 = vpop.f32.mrf.mxu0 }
 0x2c1   :  { %v1249_v61 = vadd.f32 %v1248_v56, %v277_v57 }
 0x2c2   :  { %v1250_v33 = vpop.f32.mrf.mxu0 }
 0x2c3   :  { %v1251_v6 = vadd.f32 %v1250_v33, %v277_v57 }
 0x2c5   :  { %v4329_v53 = vcombine.low %v1249_v61, %v1251_v6  ;;  %v3317_v38 = vcombine.low %v1251_v6, %v1251_v6 }
 0x2c7   :  { %v1514_v13 = vsel %vm265_vm11, %v4329_v53, 0.0  ;;  %v1525_v0 = vsel %vm265_vm11, %v3317_v38, 0.0 }
 0x2c8   :  { %v1515_v48 = vadd.f32 %v1514_v13, %v1513_v54  ;;  %v1526_v41 = vadd.f32 %v1525_v0, %v1524_v35 }
 0x2ce   :  { %v1472_v59 = vpop.f32.mrf.mxu1 }
 0x2cf   :  { %v1473_v17 = vadd.f32 %v1472_v59, %v277_v57 }
 0x2d0   :  { %v1474_v2 = vpop.f32.mrf.mxu1 }
 0x2d1   :  { %v1475_v16 = vadd.f32 %v1474_v2, %v277_v57  ;;  %v3389_v57 = vmov 839922192  }
 0x2d2   :  { %v1537_v50 = vunpack.c.l.s4 %v3389_v57 }
 0x2d3   :  { %v4337_v22 = vcombine.low %v1473_v17, %v1475_v16  ;;  %v3318_v3 = vcombine.low %v1475_v16, %v1475_v16 }
 0x2d4   :  { %v1538_v62 = vunpack.c.0.s8 %v1537_v50 }
 0x2d5   :  { %v1516_v15 = vsel %vm265_vm11, %v4337_v22, 0.0  ;;  %v1527_v28 = vsel %vm265_vm11, %v3318_v3, 0.0 }
 0x2d6   :  { %v1528_v4 = vadd.f32 %v1527_v28, %v1526_v41  ;;  %v1517_v8 = vadd.f32 %v1516_v15, %v1515_v48  ;;  %v4345_v52 = vsub.s32 %v1538_v62, %v1540_v14 }
 0x2d8   :  { %v1529_v56 = vsel %vm265_vm11, %v1517_v8, 0.0  ;;  %v1530_v23 = vsel %vm265_vm11, %v1528_v4, 0.0 }
 0x2d9   :  { %v1531_v20 = vadd.f32 %v1530_v23, %v1529_v56 }
 0x2db   :  { %1532 = vadd.xlane.f32.xlu0 %v1531_v20 }
 0x364   :  { %v1533_v33 = vpop.xlane.xlu0 %1532 }
 0x365   :  { %v1534_v44 = vmul.f32 0.0006510417, %v1533_v33 }
 0x367   :  { %v1542_v27 = vrot.slane %v1534_v44, %v4345_v52 }
 0x369   :  { %v1544_v46 = vsub.f32 %v4312_v34, %v1542_v27  ;;  %v1545_v61 = vsub.f32 %v4314_v24, %v1542_v27  ;;  %v1546_v6 = vsub.f32 %v4322_v30, %v1542_v27  ;;  %v1547_v29 = vsub.f32 %v4327_v37, %v1542_v27 }
 0x36a   :  { %v1548_v21 = vsub.f32 %v4329_v53, %v1542_v27  ;;  %v1549_v26 = vsub.f32 %v4337_v22, %v1542_v27 }
 0x36b   :  { %v1550_v63 = vmul.f32 %v1544_v46, %v1544_v46  ;;  %v1551_v36 = vmul.f32 %v1545_v61, %v1545_v61  ;;  %v1552_v38 = vmul.f32 %v1546_v6, %v1546_v6  ;;  %v1553_v40 = vmul.f32 %v1547_v29, %v1547_v29 }
 0x36c   :  { %v1554_v31 = vmul.f32 %v1548_v21, %v1548_v21  ;;  %v1555_v0 = vmul.f32 %v1549_v26, %v1549_v26 }
 0x36d   :  { %v1562_v18 = vcombine.high %v1550_v63, %v1550_v63  ;;  %v1563_v59 = vcombine.high %v1551_v36, %v1551_v36  ;;  %v1564_v60 = vcombine.high %v1552_v38, %v1552_v38  ;;  %v1574_v2 = vsel %vm265_vm11, %v1550_v63, 0.0 }
 0x36e   :  { %v1575_v13 = vsel %vm265_vm11, %v1551_v36, 0.0  ;;  %v1565_v16 = vcombine.high %v1553_v40, %v1553_v40  ;;  %v1577_v54 = vsel %vm265_vm11, %v1552_v38, 0.0  ;;  %v1566_v15 = vcombine.high %v1554_v31, %v1554_v31  ;;  %v1602_v38 = vld [vmem:[%s5894_s3] sm:$0xf] }
 0x36f   :  { %v1576_v17 = vadd.f32 %v1575_v13, %v1574_v2  ;;  %v1585_v35 = vsel %vm265_vm11, %v1562_v18, 0.0  ;;  %v1586_v3 = vsel %vm265_vm11, %v1563_v59, 0.0  ;;  %v1579_v28 = vsel %vm265_vm11, %v1553_v40, 0.0  ;;  %v1606_v59 = vld [vmem:[%s5895_s4] sm:$0xf] }
 0x370   :  { %v1587_v41 = vadd.f32 %v1586_v3, %v1585_v35  ;;  %v1588_v4 = vsel %vm265_vm11, %v1564_v60, 0.0  ;;  %v1567_v23 = vcombine.high %v1555_v0, %v1555_v0  ;;  %v1581_v20 = vsel %vm265_vm11, %v1554_v31, 0.0 }
 0x371   :  { %v1578_v48 = vadd.f32 %v1577_v54, %v1576_v17  ;;  %v1590_v57 = vsel %vm265_vm11, %v1565_v16, 0.0  ;;  %v1583_v11 = vsel %vm265_vm11, %v1555_v0, 0.0  ;;  %v1592_v14 = vsel %vm265_vm11, %v1566_v15, 0.0 }
 0x372   :  { %v1589_v56 = vadd.f32 %v1588_v4, %v1587_v41  ;;  %v1594_v46 = vsel %vm265_vm11, %v1567_v23, 0.0 }
 0x373   :  { %v1580_v8 = vadd.f32 %v1579_v28, %v1578_v48 }
 0x374   :  { %v1591_v62 = vadd.f32 %v1590_v57, %v1589_v56 }
 0x375   :  { %v1582_v50 = vadd.f32 %v1581_v20, %v1580_v8 }
 0x376   :  { %v1593_v27 = vadd.f32 %v1592_v14, %v1591_v62 }
 0x377   :  { %v1584_v33 = vadd.f32 %v1583_v11, %v1582_v50 }
 0x378   :  { %v1595_v61 = vadd.f32 %v1594_v46, %v1593_v27 }
 0x379   :  { %v1596_v6 = vsel %vm265_vm11, %v1584_v33, 0.0 }
 0x37a   :  { %v1597_v29 = vsel %vm265_vm11, %v1595_v61, 0.0 }
 0x37b   :  { %v1598_v21 = vadd.f32 %v1597_v29, %v1596_v6 }
 0x37d   :  { %1599 = vadd.xlane.f32.xlu1 %v1598_v21 }
 0x406   :  { %v1600_v26 = vpop.xlane.xlu1 %1599 }
 0x407   :  { %v1601_v63 = vmul.f32 0.0006510417, %v1600_v26 }
 0x409   :  { %v1603_v36 = vadd.f32 1e-05, %v1601_v63 }
 0x40b   :  { %3369 = vrsqrt.f32 %v1603_v36 }
 0x418   :  { %v3370_v40 = vpop.eup %3369 }
 0x419   :  { %v1605_v18 = vmul.f32 %v3370_v40, %v1602_v38 }
 0x41b   :  { %1611 = vperm.xlu0 %3362, %v1605_v18   ;;  %v1607_v31 = vmul.f32 %v1605_v18, %v1534_v44 }
 0x41d   :  { %v1608_v60 = vsub.f32 %v1606_v59, %v1607_v31 }
 0x41f   :  { %1629 = vperm.xlu1 %3361, %v1608_v60  }
 0x496   :  { %v1612_v2 = vpop.permute.xlu0 %1611 }
 0x497   :  { %v1619_v13 = vrot.slane %v1612_v2, %v4345_v52 }
 0x499   :  { %v1626_v16 = vmul.f32 %v1619_v13, %v4337_v22  ;;  %v1622_v54 = vmul.f32 %v1619_v13, %v4314_v24  ;;  %v1623_v48 = vmul.f32 %v1619_v13, %v4322_v30  ;;  %v1621_v41 = vmul.f32 %v1619_v13, %v4312_v34 }
 0x49a   :  { %v1630_v0 = vpop.permute.xlu1 %1629  ;;  %v1624_v24 = vmul.f32 %v1619_v13, %v4327_v37 }
 0x49b   :  { %v1637_v17 = vrot.slane %v1630_v0, %v4345_v52  ;;  %v1625_v52 = vmul.f32 %v1619_v13, %v4329_v53 }
 0x49d   :  { %v1644_v35 = vadd.f32 %v1637_v17, %v1626_v16  ;;  %v1640_v3 = vadd.f32 %v1637_v17, %v1622_v54  ;;  %v1641_v28 = vadd.f32 %v1637_v17, %v1623_v48  ;;  %v1639_v4 = vadd.f32 %v1637_v17, %v1621_v41 }
 0x49e   :  { %v1643_v56 = vadd.f32 %v1637_v17, %v1625_v52  ;;  %v1642_v30 = vadd.f32 %v1637_v17, %v1624_v24 }
 0x49f   :  { %v1650_v15 = vmax.f32 %v1644_v35, 0.0  ;;  %v1646_v44 = vmax.f32 %v1640_v3, 0.0  ;;  %v1647_v8 = vmax.f32 %v1641_v28, 0.0  ;;  %v1645_v22 = vmax.f32 %v1639_v4, 0.0 }
 0x4a0   :  { %v1649_v34 = vmax.f32 %v1643_v56, 0.0  ;;  %v1648_v20 = vmax.f32 %v1642_v30, 0.0 }
 0x4a1   :  { %2834 = vrot.lane.b32.xlu0 %v1650_v15, %s3374_s13  ;;  %1692 = vrot.lane.b32.xlu1 %v1646_v44, %s3374_s13  ;;  %v1691_v23 = vcombine.high %v1646_v44, %v1646_v44  ;;  %v2077_v53 = vcombine.high %v1647_v8, %v1647_v8  ;;  %v2833_v37 = vcombine.high %v1650_v15, %v1650_v15 }
 0x4a2   :  { %v2455_v57 = vcombine.high %v1649_v34, %v1649_v34  ;;  %v1661_v50 = vcombine.high %v1645_v22, %v1645_v22  ;;  %v2425_v62 = vcombine.high %v1648_v20, %v1648_v20 }
 0x4a5   :  { %2078 = vrot.lane.b32.xlu1 %v1647_v8, %s3374_s13  ;;  %1662 = vrot.lane.b32.xlu0 %v1645_v22, %s3374_s13 }
 0x4a9   :  { %2456 = vrot.lane.b32.xlu1 %v1649_v34, %s3374_s13  ;;  %2048 = vrot.lane.b32.xlu0 %v1646_v44, %s3374_s13 }
 0x4ad   :  { %1694 = vrot.lane.b32.xlu1 %v1691_v23, %s3374_s13  ;;  %2426 = vrot.lane.b32.xlu0 %v1648_v20, %s3374_s13 }
 0x4b1   :  { %2080 = vrot.lane.b32.xlu1 %v2077_v53, %s3374_s13  ;;  %2804 = vrot.lane.b32.xlu0 %v1649_v34, %s3374_s13 }
 0x4b5   :  { %2458 = vrot.lane.b32.xlu1 %v2455_v57, %s3374_s13 }
 0x4b9   :  { %2836 = vrot.lane.b32.xlu1 %v2833_v37, %s3374_s13 }
 0x4bd   :  { %1664 = vrot.lane.b32.xlu1 %v1661_v50, %s3374_s13 }
 0x4c1   :  { %2050 = vrot.lane.b32.xlu1 %v1691_v23, %s3374_s13 }
 0x4c5   :  { %2428 = vrot.lane.b32.xlu1 %v2425_v62, %s3374_s13 }
 0x4c9   :  { %2806 = vrot.lane.b32.xlu1 %v2455_v57, %s3374_s13 }
 0x513   :  { %v4398_v11 = vpop.permute.xlu0 %2834  ;;  %v1693_v14 = vpop.permute.xlu1 %1692 }
 0x514   :  { %v4401_v33 = vsel %vm80_vm4, 0.0, %v1693_v14  ;;  %v4419_v26 = vsel %vm80_vm4, 0.0, %v4398_v11 }
 0x515   :  { %1833 = vrot.lane.b32.xlu0 %v4401_v33, %s3382_s28  ;;  %v1710_v36 = vmul.f32 %v5982_v49, %v4401_v33  ;;  %v1872_v59 = vrot.slane %v4401_v33, 4  ;;  %v1707_v2 = vmul.f32 %v3563_v58, %v4401_v33 }
 0x517   :  { %v2079_v27 = vpop.permute.xlu1 %2078  ;;  %v1663_v46 = vpop.permute.xlu0 %1662 }
 0x518   :  { %v4406_v61 = vsel %vm80_vm4, 0.0, %v2079_v27  ;;  %v4409_v6 = vsel %vm80_vm4, 0.0, %v1663_v46 }
 0x519   :  { %1763 = vrot.lane.b32.xlu0 %v4409_v6, %s3380_s27  ;;  %2219 = vrot.lane.b32.xlu1 %v4406_v61, %s3382_s28  ;;  %v2096_v0 = vmul.f32 %v5982_v49, %v4406_v61  ;;  %v2258_v17 = vrot.slane %v4406_v61, 4  ;;  %v2093_v48 = vmul.f32 %v3563_v58, %v4406_v61  ;;  %v1683_v41 = vmul.f32 %v3528_v42, %v4409_v6 }
 0x51a   :  { %v1686_v4 = vmul.f32 %v3531_v43, %v4409_v6  ;;  %v1721_v8 = vrot.slane %v4409_v6, 4  ;;  %v1674_v57 = vmul.f32 %v3540_v47, %v4409_v6 }
 0x51b   :  { %v4415_v29 = vpop.permute.xlu1 %2456  ;;  %v2049_v21 = vpop.permute.xlu0 %2048 }
 0x51c   :  { %v4422_v63 = vsel %vm80_vm4, 0.0, %v2049_v21  ;;  %v4432_v38 = vsel %vm80_vm4, 0.0, %v4415_v29 }
 0x51d   :  { %2149 = vrot.lane.b32.xlu0 %v4422_v63, %s3380_s27  ;;  %2975 = vrot.lane.b32.xlu1 %v4419_v26, %s3382_s28  ;;  %v2072_v15 = vmul.f32 %v3531_v43, %v4422_v63  ;;  %v2107_v22 = vrot.slane %v4422_v63, 4  ;;  %v2069_v30 = vmul.f32 %v3528_v42, %v4422_v63  ;;  %v2060_v23 = vmul.f32 %v3540_v47, %v4422_v63 }
 0x51e   :  { %v2474_v53 = vmul.f32 %v5982_v49, %v4432_v38  ;;  %v2636_v37 = vrot.slane %v4432_v38, 4  ;;  %v2471_v50 = vmul.f32 %v3563_v58, %v4432_v38 }
 0x51f   :  { %v1695_v40 = vpop.permute.xlu1 %1694  ;;  %v4434_v18 = vpop.permute.xlu0 %2426 }
 0x520   :  { %v4442_v31 = vsel %vm80_vm4, 0.0, %v4434_v18  ;;  %v4450_v13 = vsel %vm80_vm4, %v1695_v40, 0.0  ;;  %v4461_v54 = vsel %vm80_vm4, %v1693_v14, %v1695_v40  ;;  %v3014_v14 = vrot.slane %v4419_v26, 4 }
 0x521   :  { %2597 = vrot.lane.b32.xlu0 %v4432_v38, %s3382_s28  ;;  %1888 = vrot.lane.b32.xlu1 %v1710_v36, %s3386_s11  ;;  %5988 = vst [vmem:[#allocation5_spill] sm:$0xff] %v4442_v31  ;;  %v2447_v40 = vmul.f32 %v3528_v42, %v4442_v31 }
 0x523   :  { %v2081_v60 = vpop.permute.xlu1 %2080  ;;  %v2805_v36 = vpop.permute.xlu0 %2804 }
 0x524   :  { %v4464_v35 = vsel %vm80_vm4, %v2081_v60, 0.0  ;;  %v4479_v44 = vsel %vm80_vm4, %v2079_v27, %v2081_v60  ;;  %v2852_v27 = vmul.f32 %v5982_v49, %v4419_v26  ;;  %v4556_v60 = vsel %vm80_vm4, 0.0, %v2805_v36 }
 0x525   :  { %2527 = vrot.lane.b32.xlu0 %v4442_v31, %s3380_s27  ;;  %1875 = vrot.lane.b32.xlu1 %v1872_v59, %s3380_s27  ;;  %v2849_v59 = vmul.f32 %v3563_v58, %v4419_v26  ;;  %5989 = vst [vmem:[#allocation6_spill] sm:$0xff] %v4556_v60 }
 0x527   :  { %v2459_v16 = vpop.permute.xlu1 %2458 }
 0x528   :  { %v4530_v62 = vsel %vm80_vm4, %v2459_v16, 0.0 }
 0x529   :  { %1862 = vrot.lane.b32.xlu0 %v1707_v2, %s3387_s12  ;;  %1837 = vrot.lane.b32.xlu1 %v4450_v13, %s3382_s28 }
 0x52b   :  { %v2837_v3 = vpop.permute.xlu1 %2836 }
 0x52c   :  { %v4564_v2 = vsel %vm80_vm4, %v4398_v11, %v2837_v3  ;;  %v5920_v11 = vrot.slane %v4442_v31, 4 }
 0x52d   :  { %2274 = vrot.lane.b32.xlu0 %v2096_v0, %s3386_s11  ;;  %2261 = vrot.lane.b32.xlu1 %v2258_v17, %s3380_s27  ;;  %v2450_v17 = vmul.f32 %v3531_v43, %v4442_v31 }
 0x52f   :  { %v1665_v28 = vpop.permute.xlu1 %1664 }
 0x530   :  { %v4487_v52 = vsel %vm80_vm4, %v1665_v28, 0.0  ;;  %v4497_v24 = vsel %vm80_vm4, %v1663_v46, %v1665_v28  ;;  %v4542_v46 = vsel %vm80_vm4, %v4415_v29, %v2459_v16  ;;  %v2828_v29 = vmul.f32 %v3531_v43, %v4556_v60 }
 0x531   :  { %1835 = vrot.lane.b32.xlu0 %v4461_v54, %s3382_s28  ;;  %2223 = vrot.lane.b32.xlu1 %v4464_v35, %s3382_s28 }
 0x533   :  { %v2051_v56 = vpop.permute.xlu1 %2050 }
 0x534   :  { %v4500_v34 = vsel %vm80_vm4, %v2051_v56, 0.0  ;;  %v4513_v20 = vsel %vm80_vm4, %v2049_v21, %v2051_v56  ;;  %v4545_v21 = vsel %vm80_vm4, %v2837_v3, 0.0  ;;  %v5919_v3 = vrot.slane %v4556_v60, 4 }
 0x535   :  { %2248 = vrot.lane.b32.xlu0 %v2093_v48, %s3387_s12  ;;  %1792 = vrot.lane.b32.xlu1 %v1683_v41, %s3383_s29  ;;  %v2102_v41 = vmul.f32 %v3531_v43, %v4406_v61 }
 0x537   :  { %v2429_v0 = vpop.permute.xlu1 %2428 }
 0x538   :  { %v4572_v16 = vsel %vm80_vm4, %v2429_v0, 0.0 }
 0x539   :  { %2221 = vrot.lane.b32.xlu0 %v4479_v44, %s3382_s28  ;;  %2201 = vrot.lane.b32.xlu1 %v2072_v15, %s3384_s30  ;;  %v4589_v15 = vsel %vm80_vm4, %v4434_v18, %v2429_v0  ;;  %v2099_v0 = vmul.f32 %v3528_v42, %v4406_v61 }
 0x53b   :  { %v2807_v48 = vpop.permute.xlu1 %2806 }
 0x53c   :  { %v4592_v28 = vsel %vm80_vm4, %v2807_v48, 0.0  ;;  %v4605_v56 = vsel %vm80_vm4, %v2805_v36, %v2807_v48  ;;  %vm1968_vm4 = vcmask 588800  }
 0x53d   :  { %1815 = vrot.lane.b32.xlu0 %v1686_v4, %s3384_s30  ;;  %1767 = vrot.lane.b32.xlu1 %v4487_v52, %s3380_s27  ;;  %v2825_v4 = vmul.f32 %v3528_v42, %v4556_v60  ;;  %5990 = vst [vmem:[#allocation7_spill] sm:$0xff] %v4605_v56 }
 0x541   :  { %1802 = vrot.lane.b32.xlu0 %v1721_v8, %s3381_s0  ;;  %2188 = vrot.lane.b32.xlu1 %v2107_v22, %s3381_s0 }
 0x545   :  { %1765 = vrot.lane.b32.xlu0 %v4497_v24, %s3380_s27  ;;  %2153 = vrot.lane.b32.xlu1 %v4500_v34, %s3380_s27 }
 0x549   :  { %2178 = vrot.lane.b32.xlu0 %v2069_v30, %s3383_s29  ;;  %2123 = vrot.lane.b32.xlu1 %v2060_v23, %s3385_s10  ;;  %v1712_v30 = vmul.f32 %v3615_v19, %v4450_v13  ;;  %v2438_v23 = vmul.f32 %v3540_v47, %v4442_v31 }
 0x54d   :  { %2110 = vrot.lane.b32.xlu1 %v2107_v22, %s3382_s28  ;;  %2151 = vrot.lane.b32.xlu0 %v4513_v20, %s3380_s27  ;;  %v2858_v22 = vmul.f32 %v3531_v43, %v4419_v26 }
 0x54f   :  { %v3075_v18 = vrot.slane %v2858_v22, 4 }
 0x551   :  { %2652 = vrot.lane.b32.xlu1 %v2474_v53, %s3386_s11  ;;  %1737 = vrot.lane.b32.xlu0 %v1674_v57, %s3385_s10  ;;  %v1716_v53 = vmul.f32 %v3531_v43, %v4401_v33  ;;  %v1708_v57 = vmul.f32 %v4461_v54, %v5984_v25 }
 0x555   :  { %2639 = vrot.lane.b32.xlu1 %v2636_v37, %s3380_s27  ;;  %1724 = vrot.lane.b32.xlu0 %v1721_v8, %s3382_s28  ;;  %v2319_v8 = vrot.slane %v2102_v41, 4  ;;  %v1933_v37 = vrot.slane %v1716_v53, 4 }
 0x559   :  { %2601 = vrot.lane.b32.xlu1 %v4530_v62, %s3382_s28  ;;  %2626 = vrot.lane.b32.xlu0 %v2471_v50, %s3387_s12  ;;  %v2480_v50 = vmul.f32 %v3531_v43, %v4432_v38  ;;  %v2097_v43 = vmul.f32 %v4479_v44, %v3647_v39 }
 0x55b   :  { %v2697_v36 = vrot.slane %v2480_v50, 4  ;;  %v1874_v50 = vrot.slane %v4450_v13, 4 }
 0x55d   :  { %3017 = vrot.lane.b32.xlu1 %v3014_v14, %s3380_s27  ;;  %3030 = vrot.lane.b32.xlu0 %v2852_v27, %s3386_s11  ;;  %v1873_v27 = vrot.slane %v4461_v54, 4 }
 0x561   :  { %2979 = vrot.lane.b32.xlu1 %v4545_v21, %s3382_s28  ;;  %2599 = vrot.lane.b32.xlu0 %v4542_v46, %s3382_s28 }
 0x565   :  { %2556 = vrot.lane.b32.xlu1 %v2447_v40, %s3383_s29  ;;  %3004 = vrot.lane.b32.xlu0 %v2849_v59, %s3387_s12 }
 0x569   :  { %2957 = vrot.lane.b32.xlu1 %v2828_v29, %s3384_s30  ;;  %2977 = vrot.lane.b32.xlu0 %v4564_v2, %s3382_s28  ;;  %v1711_v29 = vmul.f32 %v4461_v54, %v3647_v39 }
 0x56d   :  { %2579 = vrot.lane.b32.xlu0 %v2450_v17, %s3384_s30  ;;  %2531 = vrot.lane.b32.xlu1 %v4572_v16, %s3380_s27  ;;  %v1713_v17 = vmul.f32 %v3528_v42, %v4401_v33 }
 0x571   :  { %2566 = vrot.lane.b32.xlu0 %v5920_v11, %s3381_s0  ;;  %2944 = vrot.lane.b32.xlu1 %v5919_v3, %s3381_s0  ;;  %v2090_v3 = vmul.f32 %v3540_v47, %v4406_v61 }
 0x573   :  { %v2232_v7 = vrot.slane %v2090_v3, 4 }
 0x575   :  { %2529 = vrot.lane.b32.xlu0 %v4589_v15, %s3380_s27  ;;  %2909 = vrot.lane.b32.xlu1 %v4592_v28, %s3380_s27 }
 0x579   :  { %2934 = vrot.lane.b32.xlu0 %v2825_v4, %s3383_s29  ;;  %2322 = vrot.lane.b32.xlu1 %v2319_v8, %s3382_s28  ;;  %v2287_v4 = vrot.slane %v2099_v0, 4  ;;  %v1901_v8 = vrot.slane %v1713_v17, 4  ;;  %v2098_v0 = vmul.f32 %v3615_v19, %v4464_v35 }
 0x57d   :  { %3078 = vrot.lane.b32.xlu1 %v3075_v18, %s3382_s28  ;;  %2907 = vrot.lane.b32.xlu0 %v4605_v56, %s3380_s27 }
 0x581   :  { %1892 = vrot.lane.b32.xlu1 %v1712_v30, %s3386_s11  ;;  %2501 = vrot.lane.b32.xlu0 %v2438_v23, %s3385_s10  ;;  %v2095_v30 = vmul.f32 %v5985_v32, %v4464_v35  ;;  %v1709_v23 = vmul.f32 %v5985_v32, %v4450_v13 }
 0x585   :  { %1864 = vrot.lane.b32.xlu1 %v1708_v57, %s3387_s12  ;;  %1936 = vrot.lane.b32.xlu0 %v1933_v37, %s3382_s28  ;;  %v2260_v37 = vrot.slane %v4464_v35, 4 }
 0x587   :  { %v4624_v14 = vpop.permute.xlu0 %1833 }
 0x589   :  { %1877 = vrot.lane.b32.xlu1 %v1873_v27, %s3380_s27  ;;  %2700 = vrot.lane.b32.xlu0 %v2697_v36, %s3382_s28  ;;  %v1704_v27 = vmul.f32 %v3540_v47, %v4401_v33 }
 0x58b   :  { %v4629_v40 = vpop.permute.xlu0 %1763  ;;  %v4631_v59 = vpop.permute.xlu1 %2219 }
 0x58c   :  { %5991 = vst [vmem:[#allocation10_spill] sm:$0xff] %v4629_v40  ;;  %5992 = vst [vmem:[#allocation8_spill] sm:$0xff] %v4631_v59 }
 0x58d   :  { %2276 = vrot.lane.b32.xlu1 %v2097_v43, %s3386_s11  ;;  %1890 = vrot.lane.b32.xlu0 %v1711_v29, %s3386_s11  ;;  %v1846_v29 = vrot.slane %v1704_v27, 4  ;;  %v2259_v27 = vrot.slane %v4479_v44, 4 }
 0x58f   :  { %v4643_v48 = vpop.permute.xlu0 %2149  ;;  %v4645_v41 = vpop.permute.xlu1 %2975 }
 0x590   :  { %5993 = vst [vmem:[#allocation9_spill] sm:$0xff] %v4643_v48  ;;  %5994 = vst [vmem:[#allocation11_spill] sm:$0xff] %v4645_v41  ;;  %v2066_v41 = vmul.f32 %v5982_v49, %v4422_v63 }
 0x591   :  { %2290 = vrot.lane.b32.xlu1 %v2287_v4, %s3383_s29  ;;  %1904 = vrot.lane.b32.xlu0 %v1901_v8, %s3383_s29  ;;  %v1688_v8 = vmul.f32 %v3548_v51, %v4487_v52 }
 0x593   :  { %v4649_v22 = vpop.permute.xlu0 %2597  ;;  %v4651_v18 = vpop.permute.xlu1 %1888 }
 0x594   :  { %5995 = vst [vmem:[#allocation12_spill] sm:$0xff] %v4649_v22  ;;  %5996 = vst [vmem:[#allocation13_spill] sm:$0xff] %v4651_v18 }
 0x595   :  { %2252 = vrot.lane.b32.xlu1 %v2095_v30, %s3387_s12  ;;  %1866 = vrot.lane.b32.xlu0 %v1709_v23, %s3387_s12  ;;  %v2094_v30 = vmul.f32 %v4479_v44, %v5984_v25 }
 0x597   :  { %v4659_v53 = vpop.permute.xlu0 %2527  ;;  %v4661_v57 = vpop.permute.xlu1 %1875 }
 0x598   :  { %5997 = vst [vmem:[#allocation14_spill] sm:$0xff] %v4659_v53  ;;  %5998 = vst [vmem:[#allocation15_spill] sm:$0xff] %v4661_v57  ;;  %v2070_v53 = vmul.f32 %v4513_v20, %v3596_v10 }
 0x599   :  { %2265 = vrot.lane.b32.xlu1 %v2260_v37, %s3380_s27  ;;  %1879 = vrot.lane.b32.xlu0 %v1874_v50, %s3380_s27  ;;  %v1684_v50 = vmul.f32 %v4497_v24, %v3596_v10 }
 0x59b   :  { %v4669_v36 = vpop.permute.xlu0 %1862  ;;  %v4671_v43 = vpop.permute.xlu1 %1837 }
 0x59c   :  { %5999 = vst [vmem:[#allocation16_spill] sm:$0xff] %v4669_v36  ;;  %v1676_v36 = vmul.f32 %v3578_v1, %v4487_v52 }
 0x59d   :  { %1849 = vrot.lane.b32.xlu1 %v1846_v29, %s3385_s10  ;;  %2278 = vrot.lane.b32.xlu0 %v2098_v0, %s3386_s11 }
 0x59f   :  { %v4677_v17 = vpop.permute.xlu0 %2274  ;;  %v4679_v4 = vpop.permute.xlu1 %2261 }
 0x5a0   :  { %6000 = vst [vmem:[#allocation17_spill] sm:$0xff] %v4677_v17  ;;  %6001 = vst [vmem:[#allocation18_spill] sm:$0xff] %v4679_v4  ;;  %v2071_v4 = vmul.f32 %v3556_v55, %v4500_v34 }
 0x5a1   :  { %1819 = vrot.lane.b32.xlu1 %v1688_v8, %s3384_s30  ;;  %2250 = vrot.lane.b32.xlu0 %v2094_v30, %s3387_s12  ;;  %v1722_v8 = vrot.slane %v4497_v24, 4  ;;  %v1687_v30 = vmul.f32 %v4497_v24, %v3584_v5 }
 0x5a3   :  { %v4687_v23 = vpop.permute.xlu0 %1835  ;;  %v4689_v37 = vpop.permute.xlu1 %2223 }
 0x5a4   :  { %6002 = vst [vmem:[#allocation19_spill] sm:$0xff] %v4689_v37  ;;  %v1718_v37 = vmul.f32 %v3548_v51, %v4450_v13 }
 0x5a5   :  { %1794 = vrot.lane.b32.xlu1 %v1684_v50, %s3383_s29  ;;  %2263 = vrot.lane.b32.xlu0 %v2259_v27, %s3380_s27  ;;  %v2073_v27 = vmul.f32 %v4513_v20, %v3584_v5 }
 0x5a7   :  { %v4696_v29 = vpop.permute.xlu0 %2248  ;;  %v4698_v0 = vpop.permute.xlu1 %1792 }
 0x5a8   :  { %6003 = vst [vmem:[#allocation20_spill] sm:$0xff] %v4696_v29  ;;  %6004 = vst [vmem:[#allocation21_spill] sm:$0xff] %v4698_v0 }
 0x5a9   :  { %1804 = vrot.lane.b32.xlu1 %v1722_v8, %s3381_s0  ;;  %1817 = vrot.lane.b32.xlu0 %v1687_v30, %s3384_s30  ;;  %v1685_v30 = vmul.f32 %v3556_v55, %v4487_v52 }
 0x5ab   :  { %v4707_v11 = vpop.permute.xlu0 %2221  ;;  %v4709_v50 = vpop.permute.xlu1 %2201 }
 0x5ac   :  { %6005 = vst [vmem:[#allocation22_spill] sm:$0xff] %v4709_v50 }
 0x5ad   :  { %2203 = vrot.lane.b32.xlu1 %v2073_v27, %s3384_s30  ;;  %2235 = vrot.lane.b32.xlu0 %v2232_v7, %s3385_s10  ;;  %v2109_v7 = vrot.slane %v4500_v34, 4  ;;  %v1723_v27 = vrot.slane %v4487_v52, 4 }
 0x5af   :  { %v4715_v0 = vpop.permute.xlu0 %1815  ;;  %v4717_v29 = vpop.permute.xlu1 %1767 }
 0x5b0   :  { %6006 = vst [vmem:[#allocation23_spill] sm:$0xff] %v4715_v0  ;;  %6007 = vst [vmem:[#allocation24_spill] sm:$0xff] %v4717_v29  ;;  %v1680_v0 = vmul.f32 %v5982_v49, %v4409_v6 }
 0x5b1   :  { %2182 = vrot.lane.b32.xlu1 %v2071_v4, %s3383_s29  ;;  %1796 = vrot.lane.b32.xlu0 %v1685_v30, %s3383_s29 }
 0x5b2   :  { %v1776_v30 = vrot.slane %v1680_v0, 4  ;;  %v1677_v0 = vmul.f32 %v3563_v58, %v4409_v6 }
 0x5b3   :  { %v4725_v50 = vpop.permute.xlu0 %1802  ;;  %v4727_v3 = vpop.permute.xlu1 %2188 }
 0x5b4   :  { %6008 = vst [vmem:[#allocation25_spill] sm:$0xff] %v4725_v50  ;;  %6009 = vst [vmem:[#allocation26_spill] sm:$0xff] %v4727_v3  ;;  %v2074_v50 = vmul.f32 %v3548_v51, %v4500_v34 }
 0x5b5   :  { %2192 = vrot.lane.b32.xlu1 %v2109_v7, %s3381_s0  ;;  %1806 = vrot.lane.b32.xlu0 %v1723_v27, %s3381_s0 }
 0x5b7   :  { %v4735_v17 = vpop.permute.xlu0 %1765  ;;  %v4737_v4 = vpop.permute.xlu1 %2153 }
 0x5b8   :  { %6010 = vst [vmem:[#allocation27_spill] sm:$0xff] %v4735_v17  ;;  %6011 = vst [vmem:[#allocation28_spill] sm:$0xff] %v4737_v4  ;;  %v2104_v17 = vmul.f32 %v3548_v51, %v4464_v35 }
 0x5b9   :  { %1779 = vrot.lane.b32.xlu1 %v1776_v30, %s3386_s11  ;;  %2205 = vrot.lane.b32.xlu0 %v2074_v50, %s3384_s30 }
 0x5bb   :  { %v4743_v3 = vpop.permute.xlu0 %2178  ;;  %v4745_v18 = vpop.permute.xlu1 %2123 }
 0x5bc   :  { %6012 = vst [vmem:[#allocation29_spill] sm:$0xff] %v4743_v3  ;;  %6013 = vst [vmem:[#allocation30_spill] sm:$0xff] %v4745_v18  ;;  %v1750_v3 = vrot.slane %v1677_v0, 4  ;;  %v2108_v18 = vrot.slane %v4513_v20, 4 }
 0x5bd   :  { %1741 = vrot.lane.b32.xlu1 %v1676_v36, %s3385_s10  ;;  %2180 = vrot.lane.b32.xlu0 %v2070_v53, %s3383_s29  ;;  %v2162_v36 = vrot.slane %v2066_v41, 4  ;;  %v1675_v53 = vmul.f32 %v4497_v24, %v5983_v45  ;;  %v2062_v41 = vmul.f32 %v3578_v1, %v4500_v34 }
 0x5bf   :  { %v4755_v30 = vpop.permute.xlu0 %2151  ;;  %v4757_v50 = vpop.permute.xlu1 %2110 }
 0x5c0   :  { %6014 = vst [vmem:[#allocation31_spill] sm:$0xff] %v4755_v30  ;;  %6015 = vst [vmem:[#allocation32_spill] sm:$0xff] %v4757_v50 }
 0x5c1   :  { %1753 = vrot.lane.b32.xlu1 %v1750_v3, %s3387_s12  ;;  %2190 = vrot.lane.b32.xlu0 %v2108_v18, %s3381_s0 }
 0x5c3   :  { %v4764_v22 = vpop.permute.xlu0 %1737  ;;  %v4766_v4 = vpop.permute.xlu1 %2652 }
 0x5c4   :  { %6016 = vst [vmem:[#allocation33_spill] sm:$0xff] %v4764_v22  ;;  %6017 = vst [vmem:[#allocation34_spill] sm:$0xff] %v4766_v4 }
 0x5c5   :  { %2165 = vrot.lane.b32.xlu1 %v2162_v36, %s3386_s11  ;;  %1739 = vrot.lane.b32.xlu0 %v1675_v53, %s3385_s10  ;;  %v2061_v36 = vmul.f32 %v4513_v20, %v5983_v45  ;;  %v2063_v53 = vmul.f32 %v3563_v58, %v4422_v63 }
 0x5c7   :  { %v4772_v0 = vpop.permute.xlu0 %1724  ;;  %v4774_v50 = vpop.permute.xlu1 %2639 }
 0x5c8   :  { %6018 = vst [vmem:[#allocation35_spill] sm:$0xff] %v4772_v0  ;;  %6019 = vst [vmem:[#allocation36_spill] sm:$0xff] %v4774_v50  ;;  %v2476_v0 = vmul.f32 %v3615_v19, %v4530_v62 }
 0x5c9   :  { %1728 = vrot.lane.b32.xlu1 %v1723_v27, %s3382_s28  ;;  %1726 = vrot.lane.b32.xlu0 %v1722_v8, %s3382_s28 }
 0x5cb   :  { %v4778_v3 = vpop.permute.xlu0 %2626  ;;  %v4780_v22 = vpop.permute.xlu1 %2601 }
 0x5cc   :  { %6020 = vst [vmem:[#allocation37_spill] sm:$0xff] %v4778_v3  ;;  %6021 = vst [vmem:[#allocation38_spill] sm:$0xff] %v4780_v22  ;;  %v2136_v3 = vrot.slane %v2063_v53, 4  ;;  %v2477_v53 = vmul.f32 %v3528_v42, %v4432_v38 }
 0x5cd   :  { %2127 = vrot.lane.b32.xlu1 %v2062_v41, %s3385_s10  ;;  %2125 = vrot.lane.b32.xlu0 %v2061_v36, %s3385_s10 }
 0x5cf   :  { %v4790_v27 = vpop.permute.xlu0 %3030  ;;  %v4792_v8 = vpop.permute.xlu1 %3017 }
 0x5d0   :  { %6022 = vst [vmem:[#allocation39_spill] sm:$0xff] %v4790_v27  ;;  %v2665_v27 = vrot.slane %v2477_v53, 4  ;;  %v2638_v53 = vrot.slane %v4530_v62, 4 }
 0x5d1   :  { %2112 = vrot.lane.b32.xlu1 %v2108_v18, %s3382_s28  ;;  %2139 = vrot.lane.b32.xlu0 %v2136_v3, %s3387_s12  ;;  %v2472_v18 = vmul.f32 %v4542_v46, %v5984_v25  ;;  %v2475_v3 = vmul.f32 %v4542_v46, %v3647_v39 }
 0x5d3   :  { %v4796_v50 = vpop.permute.xlu0 %2599  ;;  %v4798_v4 = vpop.permute.xlu1 %2979 }
 0x5d4   :  { %6023 = vst [vmem:[#allocation40_spill] sm:$0xff] %v4796_v50  ;;  %6024 = vst [vmem:[#allocation41_spill] sm:$0xff] %v4798_v4  ;;  %v2637_v4 = vrot.slane %v4542_v46, 4 }
 0x5d5   :  { %2656 = vrot.lane.b32.xlu1 %v2476_v0, %s3386_s11  ;;  %2114 = vrot.lane.b32.xlu0 %v2109_v7, %s3382_s28 }
 0x5d7   :  { %v4804_v41 = vpop.permute.xlu0 %3004  ;;  %v4806_v36 = vpop.permute.xlu1 %2556 }
 0x5d9   :  { %2628 = vrot.lane.b32.xlu1 %v2472_v18, %s3387_s12  ;;  %2654 = vrot.lane.b32.xlu0 %v2475_v3, %s3386_s11  ;;  %v2473_v18 = vmul.f32 %v5985_v32, %v4530_v62  ;;  %v2853_v3 = vmul.f32 %v4564_v2, %v3647_v39 }
 0x5db   :  { %v4816_v0 = vpop.permute.xlu0 %2977  ;;  %v4818_v7 = vpop.permute.xlu1 %2957 }
 0x5dc   :  { %6025 = vst [vmem:[#allocation42_spill] sm:$0xff] %v4816_v0  ;;  %6026 = vst [vmem:[#allocation43_spill] sm:$0xff] %v4818_v7  ;;  %v2855_v7 = vmul.f32 %v3528_v42, %v4419_v26  ;;  %v2854_v42 = vmul.f32 %v3615_v19, %v4545_v21 }
 0x5dd   :  { %2668 = vrot.lane.b32.xlu0 %v2665_v27, %s3383_s29  ;;  %2641 = vrot.lane.b32.xlu1 %v2637_v4, %s3380_s27 }
 0x5df   :  { %v4823_v22 = vpop.permute.xlu0 %2579  ;;  %v4825_v50 = vpop.permute.xlu1 %2531 }
 0x5e0   :  { %6027 = vst [vmem:[#allocation44_spill] sm:$0xff] %v4823_v22  ;;  %6028 = vst [vmem:[#allocation45_spill] sm:$0xff] %v4825_v50  ;;  %v3043_v22 = vrot.slane %v2855_v7, 4 }
 0x5e1   :  { %2630 = vrot.lane.b32.xlu0 %v2473_v18, %s3387_s12  ;;  %3032 = vrot.lane.b32.xlu1 %v2853_v3, %s3386_s11  ;;  %v2851_v18 = vmul.f32 %v5985_v32, %v4545_v21 }
 0x5e3   :  { %v4835_v27 = vpop.permute.xlu0 %2566  ;;  %v4837_v4 = vpop.permute.xlu1 %2944 }
 0x5e5   :  { %2643 = vrot.lane.b32.xlu0 %v2638_v53, %s3380_s27  ;;  %3046 = vrot.lane.b32.xlu1 %v3043_v22, %s3383_s29  ;;  %v2850_v22 = vmul.f32 %v4564_v2, %v5984_v25  ;;  %v3016_v53 = vrot.slane %v4545_v21, 4 }
 0x5e7   :  { %v4842_v50 = vpop.permute.xlu0 %2529  ;;  %v4844_v0 = vpop.permute.xlu1 %2909 }
 0x5e8   :  { %6029 = vst [vmem:[#allocation46_spill] sm:$0xff] %v4842_v50  ;;  %6030 = vst [vmem:[#allocation47_spill] sm:$0xff] %v4844_v0  ;;  %v2468_v0 = vmul.f32 %v3540_v47, %v4432_v38 }
 0x5e9   :  { %3034 = vrot.lane.b32.xlu0 %v2854_v42, %s3386_s11  ;;  %3008 = vrot.lane.b32.xlu1 %v2851_v18, %s3387_s12  ;;  %v3015_v18 = vrot.slane %v4564_v2, 4 }
 0x5ea   :  { %v2610_v57 = vrot.slane %v2468_v0, 4 }
 0x5eb   :  { %v4852_v3 = vpop.permute.xlu0 %2934  ;;  %v4854_v7 = vpop.permute.xlu1 %2322 }
 0x5ed   :  { %3006 = vrot.lane.b32.xlu0 %v2850_v22, %s3387_s12  ;;  %3021 = vrot.lane.b32.xlu1 %v3016_v53, %s3380_s27  ;;  %v2451_v22 = vmul.f32 %v4589_v15, %v3584_v5  ;;  %v2452_v53 = vmul.f32 %v3548_v51, %v4572_v16 }
 0x5ef   :  { %v4863_v50 = vpop.permute.xlu0 %2907  ;;  %v4865_v42 = vpop.permute.xlu1 %3078 }
 0x5f0   :  { %6031 = vst [vmem:[#allocation48_spill] sm:$0xff] %v4863_v50  ;;  %v2846_v50 = vmul.f32 %v3540_v47, %v4419_v26 }
 0x5f1   :  { %3019 = vrot.lane.b32.xlu0 %v3015_v18, %s3380_s27  ;;  %2613 = vrot.lane.b32.xlu1 %v2610_v57, %s3385_s10 }
 0x5f2   :  { %v2988_v18 = vrot.slane %v2846_v50, 4 }
 0x5f3   :  { %v4870_v48 = vpop.permute.xlu0 %2501  ;;  %v4872_v30 = vpop.permute.xlu1 %1892 }
 0x5f4   :  { %6032 = vst [vmem:[#allocation49_spill] sm:$0xff] %v4870_v48  ;;  %6033 = vst [vmem:[#allocation50_spill] sm:$0xff] %v4872_v30  ;;  %v2448_v48 = vmul.f32 %v4589_v15, %v3596_v10 }
 0x5f5   :  { %2581 = vrot.lane.b32.xlu0 %v2451_v22, %s3384_s30  ;;  %2583 = vrot.lane.b32.xlu1 %v2452_v53, %s3384_s30  ;;  %v2449_v22 = vmul.f32 %v3556_v55, %v4572_v16  ;;  %v5929_v53 = vrot.slane %v4589_v15, 4 }
 0x5f7   :  { %v4882_v0 = vpop.permute.xlu0 %1936  ;;  %v4884_v57 = vpop.permute.xlu1 %1864 }
 0x5f8   :  { %6034 = vst [vmem:[#allocation51_spill] sm:$0xff] %v4884_v57  ;;  %v2829_v57 = vmul.f32 %v4605_v56, %v3584_v5 }
 0x5f9   :  { %2991 = vrot.lane.b32.xlu0 %v2988_v18, %s3385_s10  ;;  %2558 = vrot.lane.b32.xlu1 %v2448_v48, %s3383_s29  ;;  %v5932_v48 = vrot.slane %v4572_v16, 4 }
 0x5fb   :  { %v4890_v30 = vpop.permute.xlu0 %2700  ;;  %v4892_v29 = vpop.permute.xlu1 %1877 }
 0x5fc   :  { %6035 = vst [vmem:[#allocation52_spill] sm:$0xff] %v4892_v29 }
 0x5fd   :  { %2560 = vrot.lane.b32.xlu0 %v2449_v22, %s3383_s29  ;;  %2568 = vrot.lane.b32.xlu1 %v5929_v53, %s3381_s0  ;;  %v2830_v53 = vmul.f32 %v3548_v51, %v4592_v28 }
 0x5ff   :  { %v4901_v50 = vpop.permute.xlu0 %1890  ;;  %v4903_v18 = vpop.permute.xlu1 %2276 }
 0x600   :  { %6036 = vst [vmem:[#allocation53_spill] sm:$0xff] %v4901_v50  ;;  %6037 = vst [vmem:[#allocation54_spill] sm:$0xff] %v4903_v18  ;;  %v2827_v18 = vmul.f32 %v3556_v55, %v4592_v28 }
 0x601   :  { %2570 = vrot.lane.b32.xlu0 %v5932_v48, %s3381_s0  ;;  %2959 = vrot.lane.b32.xlu1 %v2829_v57, %s3384_s30  ;;  %v2826_v57 = vmul.f32 %v4605_v56, %v3596_v10  ;;  %v5933_v48 = vrot.slane %v4592_v28, 4 }
 0x603   :  { %v4912_v22 = vpop.permute.xlu0 %1904  ;;  %v4914_v29 = vpop.permute.xlu1 %2290 }
 0x604   :  { %6038 = vst [vmem:[#allocation55_spill] sm:$0xff] %v4912_v22  ;;  %6039 = vst [vmem:[#allocation56_spill] sm:$0xff] %v4914_v29  ;;  %v2444_v29 = vmul.f32 %v5982_v49, %v4442_v31  ;;  %v5934_v22 = vrot.slane %v4605_v56, 4 }
 0x605   :  { %2961 = vrot.lane.b32.xlu0 %v2830_v53, %s3384_s30  ;;  %2938 = vrot.lane.b32.xlu1 %v2827_v18, %s3383_s29 }
 0x607   :  { %v4922_v50 = vpop.permute.xlu0 %1866  ;;  %v4924_v40 = vpop.permute.xlu1 %2252 }
 0x608   :  { %6040 = vst [vmem:[#allocation57_spill] sm:$0xff] %v4922_v50  ;;  %6041 = vst [vmem:[#allocation58_spill] sm:$0xff] %v4924_v40  ;;  %v2540_v40 = vrot.slane %v2444_v29, 4  ;;  %v2441_v29 = vmul.f32 %v3563_v58, %v4442_v31 }
 0x609   :  { %2936 = vrot.lane.b32.xlu0 %v2826_v57, %s3383_s29  ;;  %2948 = vrot.lane.b32.xlu1 %v5933_v48, %s3381_s0  ;;  %v2439_v48 = vmul.f32 %v4589_v15, %v5983_v45 }
 0x60b   :  { %v4935_v53 = vpop.permute.xlu0 %1879  ;;  %v4937_v18 = vpop.permute.xlu1 %2265 }
 0x60c   :  { %6042 = vst [vmem:[#allocation59_spill] sm:$0xff] %v4935_v53  ;;  %6043 = vst [vmem:[#allocation60_spill] sm:$0xff] %v4937_v18  ;;  %v2440_v53 = vmul.f32 %v3578_v1, %v4572_v16  ;;  %v1717_v18 = vmul.f32 %v4461_v54, %v3584_v5 }
 0x60d   :  { %2946 = vrot.lane.b32.xlu0 %v5934_v22, %s3381_s0  ;;  %2543 = vrot.lane.b32.xlu1 %v2540_v40, %s3386_s11 }
 0x60f   :  { %v4944_v50 = vpop.permute.xlu0 %2278  ;;  %v4946_v57 = vpop.permute.xlu1 %1849 }
 0x610   :  { %6044 = vst [vmem:[#allocation61_spill] sm:$0xff] %v4944_v50  ;;  %6045 = vst [vmem:[#allocation62_spill] sm:$0xff] %v4946_v57  ;;  %v1934_v57 = vrot.slane %v1717_v18, 4  ;;  %v2514_v50 = vrot.slane %v2441_v29, 4  ;;  %v2481_v18 = vmul.f32 %v4542_v46, %v3584_v5  ;;  %v2103_v29 = vmul.f32 %v4479_v44, %v3584_v5 }
 0x611   :  { %2503 = vrot.lane.b32.xlu0 %v2439_v48, %s3385_s10  ;;  %2505 = vrot.lane.b32.xlu1 %v2440_v53, %s3385_s10  ;;  %v2321_v53 = vrot.slane %v2104_v17, 4  ;;  %v2860_v17 = vmul.f32 %v3548_v51, %v4545_v21 }
 0x613   :  { %v4958_v40 = vpop.permute.xlu0 %2250  ;;  %v4960_v22 = vpop.permute.xlu1 %1819 }
 0x614   :  { %6046 = vst [vmem:[#allocation63_spill] sm:$0xff] %v4958_v40  ;;  %6047 = vst [vmem:[#allocation64_spill] sm:$0xff] %v4960_v22  ;;  %v1935_v40 = vrot.slane %v1718_v37, 4  ;;  %v2482_v37 = vmul.f32 %v3548_v51, %v4530_v62 }
 0x615   :  { %1938 = vrot.lane.b32.xlu0 %v1934_v57, %s3382_s28  ;;  %2517 = vrot.lane.b32.xlu1 %v2514_v50, %s3387_s12  ;;  %v2698_v50 = vrot.slane %v2481_v18, 4  ;;  %v1714_v18 = vmul.f32 %v4461_v54, %v3596_v10 }
 0x617   :  { %v4968_v59 = vpop.permute.xlu0 %2263  ;;  %v4970_v48 = vpop.permute.xlu1 %1794 }
 0x618   :  { %6048 = vst [vmem:[#allocation65_spill] sm:$0xff] %v4968_v59  ;;  %6049 = vst [vmem:[#allocation66_spill] sm:$0xff] %v4970_v48  ;;  %v2320_v59 = vrot.slane %v2103_v29, 4  ;;  %v2859_v29 = vmul.f32 %v4564_v2, %v3584_v5 }
 0x619   :  { %2326 = vrot.lane.b32.xlu0 %v2321_v53, %s3382_s28  ;;  %1940 = vrot.lane.b32.xlu1 %v1935_v40, %s3382_s28  ;;  %v3077_v40 = vrot.slane %v2860_v17, 4  ;;  %v2101_v17 = vmul.f32 %v3556_v55, %v4464_v35 }
 0x61b   :  { %v4978_v22 = vpop.permute.xlu0 %1817  ;;  %v4980_v57 = vpop.permute.xlu1 %1804 }
 0x61c   :  { %6050 = vst [vmem:[#allocation67_spill] sm:$0xff] %v4978_v22  ;;  %v2699_v22 = vrot.slane %v2482_v37, 4  ;;  %v1715_v37 = vmul.f32 %v3556_v55, %v4450_v13 }
 0x61d   :  { %2702 = vrot.lane.b32.xlu0 %v2698_v50, %s3382_s28  ;;  %2324 = vrot.lane.b32.xlu1 %v2320_v59, %s3382_s28  ;;  %v1902_v59 = vrot.slane %v1714_v18, 4  ;;  %v1705_v18 = vmul.f32 %v4461_v54, %v5983_v45 }
 0x61f   :  { %v4988_v48 = vpop.permute.xlu0 %2235  ;;  %v4990_v53 = vpop.permute.xlu1 %2203 }
 0x620   :  { %6051 = vst [vmem:[#allocation68_spill] sm:$0xff] %v4988_v48  ;;  %6052 = vst [vmem:[#allocation69_spill] sm:$0xff] %v4990_v53  ;;  %v3076_v48 = vrot.slane %v2859_v29, 4  ;;  %v2100_v29 = vmul.f32 %v4479_v44, %v3596_v10 }
 0x621   :  { %3082 = vrot.lane.b32.xlu0 %v3077_v40, %s3382_s28  ;;  %2704 = vrot.lane.b32.xlu1 %v2699_v22, %s3382_s28  ;;  %v2289_v22 = vrot.slane %v2101_v17, 4  ;;  %v2091_v17 = vmul.f32 %v4479_v44, %v5983_v45 }
 0x623   :  { %v4998_v51 = vpop.permute.xlu0 %1796  ;;  %v5000_v50 = vpop.permute.xlu1 %2182 }
 0x624   :  { %6053 = vst [vmem:[#allocation70_spill] sm:$0xff] %v4998_v51  ;;  %6054 = vst [vmem:[#allocation71_spill] sm:$0xff] %v5000_v50  ;;  %v1903_v51 = vrot.slane %v1715_v37, 4  ;;  %v1706_v37 = vmul.f32 %v3578_v1, %v4450_v13 }
 0x625   :  { %1906 = vrot.lane.b32.xlu0 %v1902_v59, %s3383_s29  ;;  %3080 = vrot.lane.b32.xlu1 %v3076_v48, %s3382_s28  ;;  %v1847_v48 = vrot.slane %v1705_v18, 4  ;;  %v1681_v18 = vmul.f32 %v4497_v24, %v3647_v39 }
 0x627   :  { %v5008_v5 = vpop.permute.xlu0 %1806  ;;  %v5010_v40 = vpop.permute.xlu1 %2192 }
 0x628   :  { %6055 = vst [vmem:[#allocation72_spill] sm:$0xff] %v5008_v5  ;;  %6056 = vst [vmem:[#allocation73_spill] sm:$0xff] %v5010_v40  ;;  %v2288_v5 = vrot.slane %v2100_v29, 4  ;;  %v2092_v29 = vmul.f32 %v3578_v1, %v4464_v35 }
 0x629   :  { %2294 = vrot.lane.b32.xlu0 %v2289_v22, %s3383_s29  ;;  %1908 = vrot.lane.b32.xlu1 %v1903_v51, %s3383_s29  ;;  %v2233_v51 = vrot.slane %v2091_v17, 4  ;;  %v1678_v17 = vmul.f32 %v4497_v24, %v5984_v25 }
 0x62b   :  { %v5018_v50 = vpop.permute.xlu0 %2205  ;;  %v5020_v59 = vpop.permute.xlu1 %1779 }
 0x62c   :  { %6057 = vst [vmem:[#allocation74_spill] sm:$0xff] %v5018_v50  ;;  %6058 = vst [vmem:[#allocation75_spill] sm:$0xff] %v5020_v59  ;;  %v1848_v50 = vrot.slane %v1706_v37, 4  ;;  %v1682_v37 = vmul.f32 %v3615_v19, %v4487_v52 }
 0x62d   :  { %1851 = vrot.lane.b32.xlu0 %v1847_v48, %s3385_s10  ;;  %2292 = vrot.lane.b32.xlu1 %v2288_v5, %s3383_s29  ;;  %v1777_v5 = vrot.slane %v1681_v18, 4  ;;  %v2067_v18 = vmul.f32 %v4513_v20, %v3647_v39 }
 0x62f   :  { %v5028_v40 = vpop.permute.xlu0 %2180  ;;  %v5030_v22 = vpop.permute.xlu1 %1741 }
 0x630   :  { %6059 = vst [vmem:[#allocation76_spill] sm:$0xff] %v5028_v40  ;;  %6060 = vst [vmem:[#allocation77_spill] sm:$0xff] %v5030_v22  ;;  %v2234_v40 = vrot.slane %v2092_v29, 4  ;;  %v1679_v29 = vmul.f32 %v5985_v32, %v4487_v52 }
 0x631   :  { %2237 = vrot.lane.b32.xlu0 %v2233_v51, %s3385_s10  ;;  %1853 = vrot.lane.b32.xlu1 %v1848_v50, %s3385_s10  ;;  %v1751_v50 = vrot.slane %v1678_v17, 4  ;;  %v2064_v17 = vmul.f32 %v4513_v20, %v5984_v25 }
 0x633   :  { %v5038_v59 = vpop.permute.xlu0 %2190  ;;  %v5040_v48 = vpop.permute.xlu1 %1753 }
 0x634   :  { %6061 = vst [vmem:[#allocation78_spill] sm:$0xff] %v5038_v59  ;;  %6062 = vst [vmem:[#allocation79_spill] sm:$0xff] %v5040_v48  ;;  %v1778_v59 = vrot.slane %v1682_v37, 4  ;;  %v2068_v37 = vmul.f32 %v3615_v19, %v4500_v34 }
 0x635   :  { %1781 = vrot.lane.b32.xlu0 %v1777_v5, %s3386_s11  ;;  %2239 = vrot.lane.b32.xlu1 %v2234_v40, %s3385_s10  ;;  %v2163_v40 = vrot.slane %v2067_v18, 4  ;;  %v2478_v18 = vmul.f32 %v4542_v46, %v3596_v10 }
 0x637   :  { %v5048_v22 = vpop.permute.xlu0 %1739  ;;  %v5050_v51 = vpop.permute.xlu1 %2165 }
 0x638   :  { %6063 = vst [vmem:[#allocation80_spill] sm:$0xff] %v5048_v22  ;;  %6064 = vst [vmem:[#allocation81_spill] sm:$0xff] %v5050_v51  ;;  %v1752_v22 = vrot.slane %v1679_v29, 4  ;;  %v2164_v51 = vrot.slane %v2068_v37, 4  ;;  %v2065_v29 = vmul.f32 %v5985_v32, %v4500_v34  ;;  %v2479_v37 = vmul.f32 %v3556_v55, %v4530_v62 }
 0x639   :  { %1755 = vrot.lane.b32.xlu0 %v1751_v50, %s3387_s12  ;;  %1783 = vrot.lane.b32.xlu1 %v1778_v59, %s3386_s11  ;;  %v2137_v59 = vrot.slane %v2064_v17, 4  ;;  %v2857_v17 = vmul.f32 %v3556_v55, %v4545_v21 }
 0x63b   :  { %v5058_v48 = vpop.permute.xlu0 %1726  ;;  %v5060_v5 = vpop.permute.xlu1 %1728 }
 0x63c   :  { %6065 = vst [vmem:[#allocation82_spill] sm:$0xff] %v5058_v48  ;;  %6066 = vst [vmem:[#allocation83_spill] sm:$0xff] %v5060_v5  ;;  %v2823_v48 = vmul.f32 %v4605_v56, %v3647_v39 }
 0x63d   :  { %2167 = vrot.lane.b32.xlu0 %v2163_v40, %s3386_s11  ;;  %1757 = vrot.lane.b32.xlu1 %v1752_v22, %s3387_s12  ;;  %v2666_v22 = vrot.slane %v2478_v18, 4  ;;  %v2469_v18 = vmul.f32 %v4542_v46, %v5983_v45 }
 0x63f   :  { %v5068_v52 = vpop.permute.xlu0 %2125  ;;  %v5070_v50 = vpop.permute.xlu1 %2127 }
 0x640   :  { %6067 = vst [vmem:[#allocation84_spill] sm:$0xff] %v5068_v52  ;;  %6068 = vst [vmem:[#allocation85_spill] sm:$0xff] %v5070_v50  ;;  %v2138_v52 = vrot.slane %v2065_v29, 4  ;;  %v2856_v29 = vmul.f32 %v4564_v2, %v3596_v10 }
 0x641   :  { %2141 = vrot.lane.b32.xlu0 %v2137_v59, %s3387_s12  ;;  %2169 = vrot.lane.b32.xlu1 %v2164_v51, %s3386_s11  ;;  %v3045_v51 = vrot.slane %v2857_v17, 4  ;;  %v2847_v17 = vmul.f32 %v4564_v2, %v5983_v45 }
 0x643   :  { %v5078_v5 = vpop.permute.xlu0 %2139  ;;  %v5080_v40 = vpop.permute.xlu1 %2112 }
 0x644   :  { %6069 = vst [vmem:[#allocation86_spill] sm:$0xff] %v5078_v5  ;;  %6070 = vst [vmem:[#allocation87_spill] sm:$0xff] %v5080_v40  ;;  %v2667_v5 = vrot.slane %v2479_v37, 4  ;;  %v3044_v40 = vrot.slane %v2856_v29, 4  ;;  %v2470_v37 = vmul.f32 %v3578_v1, %v4530_v62  ;;  %v2848_v29 = vmul.f32 %v3578_v1, %v4545_v21 }
 0x645   :  { %2670 = vrot.lane.b32.xlu0 %v2666_v22, %s3383_s29  ;;  %2143 = vrot.lane.b32.xlu1 %v2138_v52, %s3387_s12  ;;  %v2611_v52 = vrot.slane %v2469_v18, 4  ;;  %v2445_v18 = vmul.f32 %v4589_v15, %v3647_v39 }
 0x647   :  { %v5088_v34 = vpop.permute.xlu0 %2114  ;;  %v5090_v59 = vpop.permute.xlu1 %2656 }
 0x648   :  { %6071 = vst [vmem:[#allocation88_spill] sm:$0xff] %v5088_v34  ;;  %6072 = vst [vmem:[#allocation89_spill] sm:$0xff] %v5090_v59  ;;  %v2612_v59 = vrot.slane %v2470_v37, 4  ;;  %v2990_v34 = vrot.slane %v2848_v29, 4 }
 0x649   :  { %3050 = vrot.lane.b32.xlu0 %v3045_v51, %s3383_s29  ;;  %2672 = vrot.lane.b32.xlu1 %v2667_v5, %s3383_s29  ;;  %v2989_v5 = vrot.slane %v2847_v17, 4  ;;  %v2446_v17 = vmul.f32 %v3615_v19, %v4572_v16 }
 0x64b   :  { %v5098_v55 = vpop.permute.xlu0 %2654  ;;  %v5100_v22 = vpop.permute.xlu1 %2628 }
 0x64c   :  { %6073 = vst [vmem:[#allocation90_spill] sm:$0xff] %v5098_v55  ;;  %6074 = vst [vmem:[#allocation91_spill] sm:$0xff] %v5100_v22 }
 0x64d   :  { %2615 = vrot.lane.b32.xlu0 %v2611_v52, %s3385_s10  ;;  %3048 = vrot.lane.b32.xlu1 %v3044_v40, %s3383_s29  ;;  %v2541_v40 = vrot.slane %v2445_v18, 4  ;;  %v2443_v18 = vmul.f32 %v5985_v32, %v4572_v16 }
 0x64f   :  { %v5108_v10 = vpop.permute.xlu0 %2668  ;;  %v5110_v51 = vpop.permute.xlu1 %2641  ;;  %v2516_v39 = vrot.slane %v2443_v18, 4 }
 0x650   :  { %6075 = vst [vmem:[#allocation92_spill] sm:$0xff] %v5108_v10  ;;  %6076 = vst [vmem:[#allocation93_spill] sm:$0xff] %v5110_v51  ;;  %v2442_v10 = vmul.f32 %v4589_v15, %v5984_v25 }
 0x651   :  { %2993 = vrot.lane.b32.xlu0 %v2989_v5, %s3385_s10  ;;  %2617 = vrot.lane.b32.xlu1 %v2612_v59, %s3385_s10  ;;  %v2542_v59 = vrot.slane %v2446_v17, 4  ;;  %v2919_v17 = vrot.slane %v2823_v48, 4 }
 0x652   :  { %v2515_v5 = vrot.slane %v2442_v10, 4 }
 0x653   :  { %v2631_v55 = vpop.permute.xlu0 %2630  ;;  %v5118_v52 = vpop.permute.xlu1 %3032 }
 0x654   :  { %6077 = vst [vmem:[#allocation94_spill] sm:$0xff] %v5118_v52  ;;  %v2633_v29 = vsel %vm195_vm2, %v5100_v22, %v2631_v55 }
 0x655   :  { %2545 = vrot.lane.b32.xlu0 %v2541_v40, %s3386_s11  ;;  %2995 = vrot.lane.b32.xlu1 %v2990_v34, %s3385_s10 }
 0x657   :  { %v2644_v37 = vpop.permute.xlu0 %2643  ;;  %v5126_v50 = vpop.permute.xlu1 %3046 }
 0x658   :  { %6078 = vst [vmem:[#allocation95_spill] sm:$0xff] %v5126_v50  ;;  %v2646_v53 = vsel %vm206_vm15, %v5110_v51, %v2644_v37  ;;  %v2824_v50 = vmul.f32 %v3615_v19, %v4592_v28 }
 0x659   :  { %2519 = vrot.lane.b32.xlu0 %v2515_v5, %s3387_s12  ;;  %2547 = vrot.lane.b32.xlu1 %v2542_v59, %s3386_s11  ;;  %v5139_v34 = vsel %vm265_vm11, %v2633_v29, %v2646_v53 }
 0x65a   :  { %6079 = vst [vmem:[#allocation96_spill] sm:$0xff] %v5139_v34  ;;  %v2920_v59 = vrot.slane %v2824_v50, 4 }
 0x65b   :  { %v3035_v10 = vpop.permute.xlu0 %3034  ;;  %v3009_v40 = vpop.permute.xlu1 %3008 }
 0x65c   :  { %v5145_v55 = vsel %vm223_vm14, %v5118_v52, %v3035_v10 }
 0x65d   :  { %6080 = vst [vmem:[#allocation97_spill] sm:$0xff] %v5145_v55  ;;  %2923 = vrot.lane.b32.xlu0 %v2919_v17, %s3386_s11  ;;  %2521 = vrot.lane.b32.xlu1 %v2516_v39, %s3387_s12  ;;  %v6159_v55 = vld [vmem:[#allocation18_spill] sm:$0xff] }
 0x65f   :  { %v3007_v37 = vpop.permute.xlu0 %3006  ;;  %v3022_v5 = vpop.permute.xlu1 %3021 }
 0x660   :  { %v3011_v53 = vsel %vm195_vm2, %v3007_v37, %v3009_v40  ;;  %v3010_v19 = vsel %vm195_vm2, %v4804_v41, %v3007_v37 }
 0x661   :  { %2925 = vrot.lane.b32.xlu1 %v2920_v59, %s3386_s11 }
 0x663   :  { %v3020_v48 = vpop.permute.xlu0 %3019  ;;  %v5151_v18 = vpop.permute.xlu1 %2613 }
 0x664   :  { %6081 = vst [vmem:[#allocation98_spill] sm:$0xff] %v5151_v18  ;;  %v3023_v29 = vsel %vm206_vm15, %v4792_v8, %v3020_v48  ;;  %v3024_v10 = vsel %vm206_vm15, %v3020_v48, %v3022_v5 }
 0x665   :  { %v5159_v17 = vsel %vm265_vm11, %v3011_v53, %v3024_v10  ;;  %v5162_v50 = vsel %vm265_vm11, %v3010_v19, %v3023_v29 }
 0x666   :  { %6082 = vst [vmem:[#allocation99_spill] sm:$0xff] %v5159_v17  ;;  %6083 = vst [vmem:[#allocation100_spill] sm:$0xff] %v5162_v50 }
 0x667   :  { %v5164_v40 = vpop.permute.xlu0 %2581  ;;  %v2584_v39 = vpop.permute.xlu1 %2583 }
 0x668   :  { %6084 = vst [vmem:[#allocation101_spill] sm:$0xff] %v5164_v40  ;;  %v5168_v59 = vsel %vm262_vm10, %v5164_v40, %v2584_v39 }
 0x669   :  { %6085 = vst [vmem:[#allocation102_spill] sm:$0xff] %v5168_v59 }
 0x66b   :  { %v5170_v34 = vpop.permute.xlu0 %2991  ;;  %v2559_v41 = vpop.permute.xlu1 %2558 }
 0x66c   :  { %6086 = vst [vmem:[#allocation103_spill] sm:$0xff] %v5170_v34  ;;  %v2562_v5 = vsel %vm237_vm13, %v4806_v36, %v2559_v41 }
 0x66f   :  { %v2561_v37 = vpop.permute.xlu0 %2560  ;;  %v2569_v8 = vpop.permute.xlu1 %2568 }
 0x670   :  { %v2563_v53 = vsel %vm237_vm13, %v2559_v41, %v2561_v37  ;;  %v2572_v48 = vsel %vm248_vm12, %v4835_v27, %v2569_v8 }
 0x671   :  { %v5178_v19 = vsel %vm265_vm11, %v2562_v5, %v2572_v48 }
 0x672   :  { %6087 = vst [vmem:[#allocation104_spill] sm:$0xff] %v5178_v19 }
 0x673   :  { %v2571_v29 = vpop.permute.xlu0 %2570  ;;  %v5180_v10 = vpop.permute.xlu1 %2959 }
 0x674   :  { %6088 = vst [vmem:[#allocation105_spill] sm:$0xff] %v5180_v10  ;;  %v2573_v39 = vsel %vm248_vm12, %v2569_v8, %v2571_v29 }
 0x675   :  { %v5184_v50 = vsel %vm265_vm11, %v2563_v53, %v2573_v39 }
 0x676   :  { %6089 = vst [vmem:[#allocation106_spill] sm:$0xff] %v5184_v50 }
 0x677   :  { %v2962_v59 = vpop.permute.xlu0 %2961  ;;  %v2939_v17 = vpop.permute.xlu1 %2938 }
 0x678   :  { %v5188_v36 = vsel %vm262_vm10, %v5180_v10, %v2962_v59  ;;  %v6163_v10 = vld [vmem:[#allocation64_spill] sm:$0xff] }
 0x679   :  { %6090 = vst [vmem:[#allocation107_spill] sm:$0xff] %v5188_v36 }
 0x67b   :  { %v2937_v41 = vpop.permute.xlu0 %2936  ;;  %v2949_v37 = vpop.permute.xlu1 %2948 }
 0x67c   :  { %v2941_v27 = vsel %vm237_vm13, %v2937_v41, %v2939_v17  ;;  %v2940_v19 = vsel %vm237_vm13, %v4852_v3, %v2937_v41 }
 0x67f   :  { %v2947_v5 = vpop.permute.xlu0 %2946  ;;  %v5191_v48 = vpop.permute.xlu1 %2543 }
 0x680   :  { %6091 = vst [vmem:[#allocation108_spill] sm:$0xff] %v5191_v48  ;;  %v2950_v8 = vsel %vm248_vm12, %v4837_v4, %v2947_v5  ;;  %v2951_v53 = vsel %vm248_vm12, %v2947_v5, %v2949_v37  ;;  %v6130_v48 = vld [vmem:[#allocation15_spill] sm:$0xff] }
 0x681   :  { %v5199_v29 = vsel %vm265_vm11, %v2941_v27, %v2951_v53  ;;  %v5202_v59 = vsel %vm265_vm11, %v2940_v19, %v2950_v8 }
 0x682   :  { %6092 = vst [vmem:[#allocation109_spill] sm:$0xff] %v5199_v29  ;;  %6093 = vst [vmem:[#allocation110_spill] sm:$0xff] %v5202_v59  ;;  %v5386_v29 = vmul.f32 %v3458_v12, %v4479_v44 }
 0x683   :  { %v5204_v39 = vpop.permute.xlu0 %2503  ;;  %v2506_v17 = vpop.permute.xlu1 %2505 }
 0x684   :  { %6094 = vst [vmem:[#allocation111_spill] sm:$0xff] %v5204_v39  ;;  %v5208_v50 = vsel %vm178_vm1, %v5204_v39, %v2506_v17 }
 0x685   :  { %6095 = vst [vmem:[#allocation112_spill] sm:$0xff] %v5208_v50 }
 0x687   :  { %v1939_v36 = vpop.permute.xlu0 %1938  ;;  %v5210_v3 = vpop.permute.xlu1 %2517 }
 0x688   :  { %6096 = vst [vmem:[#allocation113_spill] sm:$0xff] %v5210_v3 }
 0x68b   :  { %v2327_v41 = vpop.permute.xlu0 %2326  ;;  %v1941_v4 = vpop.permute.xlu1 %1940 }
 0x68c   :  { %v2335_v37 = vsel %vm265_vm11, %v4464_v35, %v2327_v41  ;;  %v1949_v27 = vsel %vm265_vm11, %v4450_v13, %v1941_v4  ;;  %v1943_v50 = vsel %vm164_vm0, %v1939_v36, %v1941_v4 }
 0x68d   :  { %2343 = vrot.lane.b32.xlu0 %v2335_v37, %s3381_s0  ;;  %1957 = vrot.lane.b32.xlu1 %v1949_v27, %s3381_s0  ;;  %v1948_v27 = vsel %vm265_vm11, %v4461_v54, %v1943_v50 }
 0x68f   :  { %v2703_v19 = vpop.permute.xlu0 %2702  ;;  %v2325_v5 = vpop.permute.xlu1 %2324 }
 0x690   :  { %v2329_v35 = vsel %vm164_vm0, %v2325_v5, %v2327_v41  ;;  %v2328_v4 = vsel %vm164_vm0, %v4854_v7, %v2325_v5 }
 0x693   :  { %v3083_v8 = vpop.permute.xlu0 %3082  ;;  %v2705_v53 = vpop.permute.xlu1 %2704 }
 0x694   :  { %v3091_v17 = vsel %vm265_vm11, %v4545_v21, %v3083_v8  ;;  %v2713_v59 = vsel %vm265_vm11, %v4530_v62, %v2705_v53  ;;  %v2334_v21 = vsel %vm265_vm11, %v4479_v44, %v2329_v35  ;;  %v1942_v62 = vsel %vm164_vm0, %v4882_v0, %v1939_v36 }
 0x695   :  { %3099 = vrot.lane.b32.xlu0 %v3091_v17, %s3381_s0  ;;  %2721 = vrot.lane.b32.xlu1 %v2713_v59, %s3381_s0  ;;  %v2822_v17 = vmul.f32 %v5982_v49, %v4556_v60  ;;  %v1947_v35 = vsel %vm265_vm11, %v4401_v33, %v1942_v62  ;;  %v2333_v0 = vsel %vm265_vm11, %v4406_v61, %v2328_v4  ;;  %v6097_v4 = vrot.slane %v4589_v15, 4 }
 0x696   :  { %v5404_v44 = vmul.f32 %v3453_v9, %v4409_v6  ;;  %v5424_v6 = vmul.f32 %v3453_v9, %v4419_v26 }
 0x697   :  { %v5226_v13 = vpop.permute.xlu0 %1906  ;;  %v3081_v37 = vpop.permute.xlu1 %3080  ;;  %v2918_v5 = vrot.slane %v2822_v17, 4  ;;  %v2817_v17 = vmul.f32 %v4605_v56, %v5983_v45 }
 0x698   :  { %6120 = vst [vmem:[#allocation131_spill] sm:$0xff] %v5424_v6 }
 0x699   :  { %1955 = vrot.lane.b32.xlu0 %v1948_v27, %s3381_s0  ;;  %2341 = vrot.lane.b32.xlu1 %v2334_v21, %s3381_s0 }
 0x69b   :  { %v2295_v59 = vpop.permute.xlu0 %2294  ;;  %v1909_v41 = vpop.permute.xlu1 %1908 }
 0x69c   :  { %v5242_v50 = vsel %vm237_vm13, %v5226_v13, %v1909_v41 }
 0x69d   :  { %1953 = vrot.lane.b32.xlu0 %v1947_v35, %s3381_s0  ;;  %2339 = vrot.lane.b32.xlu1 %v2333_v0, %s3381_s0  ;;  %v2818_v35 = vmul.f32 %v3578_v1, %v4592_v28 }
 0x69f   :  { %v5250_v7 = vpop.permute.xlu0 %1851  ;;  %v5252_v36 = vpop.permute.xlu1 %2292 }
 0x6a0   :  { %v5256_v49 = vsel %vm237_vm13, %v5252_v36, %v2295_v59  ;;  %v6098_v59 = vrot.slane %v4572_v16, 4 }
 0x6a1   :  { %2905 = vrot.lane.b32.xlu0 %v4556_v60, %s3380_s27  ;;  %2921 = vrot.lane.b32.xlu1 %v2918_v5, %s3386_s11  ;;  %v2707_v5 = vsel %vm164_vm0, %v2703_v19, %v2705_v53  ;;  %v3084_v53 = vsel %vm164_vm0, %v4865_v42, %v3081_v37 }
 0x6a2   :  { %v2712_v1 = vsel %vm265_vm11, %v4542_v46, %v2707_v5  ;;  %v2821_v5 = vmul.f32 %v5985_v32, %v4592_v28  ;;  %v3089_v42 = vsel %vm265_vm11, %v4419_v26, %v3084_v53  ;;  %v2819_v32 = vmul.f32 %v3563_v58, %v4556_v60  ;;  %v1658_v58 = vld [vmem:[%s5896_s6] sm:$0xff] }
 0x6a3   :  { %v5261_v27 = vpop.permute.xlu0 %2237  ;;  %v1854_v21 = vpop.permute.xlu1 %1853  ;;  %v6123_v26 = vld [vmem:[#allocation19_spill] sm:$0xff] }
 0x6a4   :  { %v5265_v62 = vsel %vm178_vm1, %v5250_v7, %v1854_v21  ;;  %v3085_v21 = vsel %vm164_vm0, %v3081_v37, %v3083_v8  ;;  %v2706_v8 = vsel %vm164_vm0, %v4890_v30, %v2703_v19  ;;  %v2894_v37 = vrot.slane %v2821_v5, 4 }
 0x6a5   :  { %2490 = vrot.lane.b32.xlu0 %v6097_v4, %s3382_s28  ;;  %2492 = vrot.lane.b32.xlu1 %v6098_v59, %s3382_s28  ;;  %v3090_v59 = vsel %vm265_vm11, %v4564_v2, %v3085_v21  ;;  %v2711_v30 = vsel %vm265_vm11, %v4432_v38, %v2706_v8  ;;  %v6101_v8 = vrot.slane %v4592_v28, 4 }
 0x6a7   :  { %v2240_v41 = vpop.permute.xlu1 %2239  ;;  %v5283_v4 = vpop.permute.xlu0 %1781 }
 0x6a8   :  { %v5279_v0 = vsel %vm178_vm1, %v5261_v27, %v2240_v41 }
 0x6a9   :  { %2881 = vrot.lane.b32.xlu0 %v2817_v17, %s3385_s10  ;;  %2883 = vrot.lane.b32.xlu1 %v2818_v35, %s3385_s10  ;;  %v2820_v35 = vmul.f32 %v4605_v56, %v5984_v25  ;;  %v2816_v25 = vmul.f32 %v3540_v47, %v4556_v60  ;;  %v6102_v47 = vrot.slane %v4556_v60, 4  ;;  %v5378_v60 = vmul.f32 %v3453_v9, %v4401_v33 }
 0x6aa   :  { %v5396_v33 = vmul.f32 %v3458_v12, %v4497_v24  ;;  %v5416_v24 = vmul.f32 %v3458_v12, %v4564_v2  ;;  %v5438_v2 = vsel %vm164_vm0, %v4687_v23, %v4671_v43 }
 0x6ab   :  { %v1784_v16 = vpop.permute.xlu1 %1783  ;;  %v5301_v41 = vpop.permute.xlu0 %1755  ;;  %v2893_v19 = vrot.slane %v2820_v35, 4  ;;  %v1827_v39 = vrot.slane %v5378_v60, 4  ;;  %v5408_v60 = vmul.f32 %v3453_v9, %v4422_v63  ;;  %v5428_v63 = vmul.f32 %v3458_v12, %v4589_v15 }
 0x6ac   :  { %v5289_v45 = vsel %vm223_vm14, %v5283_v4, %v1784_v16  ;;  %v6099_v16 = vrot.slane %v4442_v31, 4  ;;  %6118 = vst [vmem:[#allocation129_spill] sm:$0xff] %v5416_v24  ;;  %v5448_v15 = vsel %vm164_vm0, %v4707_v11, %v6123_v26  ;;  %v6131_v26 = vld [vmem:[#allocation28_spill] sm:$0xff] }
 0x6ad   :  { %2719 = vrot.lane.b32.xlu0 %v2712_v1, %s3381_s0  ;;  %3097 = vrot.lane.b32.xlu1 %v3090_v59, %s3381_s0  ;;  %v2892_v1 = vrot.slane %v2819_v32, 4  ;;  %v6100_v59 = vrot.slane %v4605_v56, 4  ;;  %6121 = vst [vmem:[#allocation132_spill] sm:$0xff] %v5428_v63  ;;  %v6125_v63 = vld [vmem:[#allocation10_spill] sm:$0xff]  ;;  %v6133_v24 = vld [vmem:[#allocation12_spill] sm:$0xff] }
 0x6af   :  { %v1758_v17 = vpop.permute.xlu1 %1757  ;;  %v5340_v53 = vpop.permute.xlu0 %2167 }
 0x6b0   :  { %v5309_v21 = vsel %vm195_vm2, %v5301_v41, %v1758_v17 }
 0x6b1   :  { %2717 = vrot.lane.b32.xlu0 %v2711_v30, %s3381_s0  ;;  %3095 = vrot.lane.b32.xlu1 %v3089_v42, %s3381_s0 }
 0x6b3   :  { %v5342_v17 = vpop.permute.xlu1 %2169  ;;  %v5344_v35 = vpop.permute.xlu0 %2141 }
 0x6b5   :  { %2897 = vrot.lane.b32.xlu0 %v2893_v19, %s3387_s12  ;;  %2899 = vrot.lane.b32.xlu1 %v2894_v37, %s3387_s12 }
 0x6b7   :  { %v5346_v5 = vpop.permute.xlu1 %2143  ;;  %v5348_v30 = vpop.permute.xlu0 %2670 }
 0x6b8   :  { %6103 = vst [vmem:[#allocation114_spill] sm:$0xff] %v5348_v30  ;;  %v6171_v30 = vld [vmem:[#allocation22_spill] sm:$0xff] }
 0x6b9   :  { %2488 = vrot.lane.b32.xlu0 %v6099_v16, %s3382_s28  ;;  %2879 = vrot.lane.b32.xlu1 %v2816_v25, %s3385_s10 }
 0x6bb   :  { %v5350_v28 = vpop.permute.xlu1 %2672  ;;  %v5352_v42 = vpop.permute.xlu0 %3050 }
 0x6bc   :  { %6104 = vst [vmem:[#allocation115_spill] sm:$0xff] %v5350_v28  ;;  %6105 = vst [vmem:[#allocation116_spill] sm:$0xff] %v5352_v42  ;;  %v6168_v42 = vld [vmem:[#allocation66_spill] sm:$0xff]  ;;  %v6170_v28 = vld [vmem:[#allocation69_spill] sm:$0xff] }
 0x6bd   :  { %2895 = vrot.lane.b32.xlu0 %v2892_v1, %s3387_s12  ;;  %2868 = vrot.lane.b32.xlu1 %v6100_v59, %s3382_s28 }
 0x6bf   :  { %v5354_v19 = vpop.permute.xlu1 %3048  ;;  %v5356_v37 = vpop.permute.xlu0 %2615 }
 0x6c0   :  { %6106 = vst [vmem:[#allocation117_spill] sm:$0xff] %v5354_v19  ;;  %6107 = vst [vmem:[#allocation118_spill] sm:$0xff] %v5356_v37  ;;  %v6167_v19 = vld [vmem:[#allocation58_spill] sm:$0xff] }
 0x6c1   :  { %2870 = vrot.lane.b32.xlu0 %v6101_v8, %s3382_s28  ;;  %2866 = vrot.lane.b32.xlu1 %v6102_v47, %s3382_s28 }
 0x6c3   :  { %v5358_v25 = vpop.permute.xlu1 %2617  ;;  %v5360_v32 = vpop.permute.xlu0 %2993 }
 0x6c4   :  { %6108 = vst [vmem:[#allocation119_spill] sm:$0xff] %v5358_v25  ;;  %6109 = vst [vmem:[#allocation120_spill] sm:$0xff] %v5360_v32  ;;  %v6149_v32 = vld [vmem:[#allocation45_spill] sm:$0xff] }
 0x6c5   :  { %1965 = vperm.xlu0 %3362, %v1658_v58   ;;  %v5374_v58 = vmul.f32 %v3458_v12, %v4461_v54  ;;  %v5392_v54 = vmul.f32 %v3453_v9, %v4406_v61  ;;  %v5412_v61 = vmul.f32 %v3458_v12, %v4542_v46  ;;  %v5433_v46 = vsel %vm164_vm0, %v4624_v14, %v4687_v23  ;;  %v6127_v23 = vld [vmem:[#allocation31_spill] sm:$0xff]  ;;  %v6156_v25 = vld [vmem:[#allocation17_spill] sm:$0xff] }
 0x6c7   :  { %v5362_v16 = vpop.permute.xlu1 %2995  ;;  %v5364_v1 = vpop.permute.xlu0 %2545  ;;  %v1828_v3 = vrot.slane %v5374_v58, 4  ;;  %6117 = vst [vmem:[#allocation128_spill] sm:$0xff] %v5412_v61 }
 0x6c8   :  { %6110 = vst [vmem:[#allocation121_spill] sm:$0xff] %v5362_v16  ;;  %6111 = vst [vmem:[#allocation122_spill] sm:$0xff] %v5364_v1  ;;  %v5471_v1 = vsel %vm206_vm15, %v6127_v23, %v6131_v26  ;;  %v6140_v26 = vld [vmem:[#allocation11_spill] sm:$0xff] }
 0x6cb   :  { %v5366_v59 = vpop.permute.xlu1 %2547  ;;  %v5368_v8 = vpop.permute.xlu0 %2519 }
 0x6cc   :  { %6112 = vst [vmem:[#allocation123_spill] sm:$0xff] %v5366_v59  ;;  %6113 = vst [vmem:[#allocation124_spill] sm:$0xff] %v5368_v8  ;;  %v6129_v59 = vld [vmem:[#allocation52_spill] sm:$0xff] }
 0x6cf   :  { %v5370_v47 = vpop.permute.xlu1 %2521  ;;  %v5380_v56 = vpop.permute.xlu0 %2923 }
 0x6d0   :  { %6114 = vst [vmem:[#allocation125_spill] sm:$0xff] %v5370_v47  ;;  %6115 = vst [vmem:[#allocation126_spill] sm:$0xff] %v5380_v56  ;;  %v6128_v47 = vld [vmem:[#allocation9_spill] sm:$0xff] }
 0x6d3   :  { %v5382_v31 = vpop.permute.xlu1 %2925 }
 0x6d4   :  { %6116 = vst [vmem:[#allocation127_spill] sm:$0xff] %v5382_v31  ;;  %v5400_v31 = vmul.f32 %v3458_v12, %v4513_v20  ;;  %v5420_v20 = vmul.f32 %v3453_v9, %v4432_v38  ;;  %v6122_v38 = vld [vmem:[#allocation8_spill] sm:$0xff]  ;;  %v6124_v12 = vld [vmem:[#allocation27_spill] sm:$0xff] }
 0x6d5   :  { %v5443_v58 = vsel %vm164_vm0, %v6122_v38, %v4707_v11  ;;  %v5453_v14 = vsel %vm206_vm15, %v6125_v63, %v6124_v12  ;;  %v6126_v9 = vld [vmem:[#allocation24_spill] sm:$0xff]  ;;  %v5463_v38 = vsel %vm206_vm15, %v6128_v47, %v6127_v23  ;;  %v1881_v11 = vsel %vm206_vm15, %v6130_v48, %v6129_v59  ;;  %v6137_v47 = vld [vmem:[#allocation59_spill] sm:$0xff]  ;;  %v6139_v23 = vld [vmem:[#allocation42_spill] sm:$0xff] }
 0x6d6   :  { %6119 = vst [vmem:[#allocation130_spill] sm:$0xff] %v5420_v20  ;;  %v5458_v43 = vsel %vm206_vm15, %v6124_v12, %v6126_v9  ;;  %v6132_v63 = vld [vmem:[#allocation40_spill] sm:$0xff]  ;;  %v6135_v9 = vld [vmem:[#allocation38_spill] sm:$0xff]  ;;  %v1882_v34 = vsel %vm206_vm15, %v6129_v59, %v6137_v47  ;;  %v5493_v22 = vsel %vm164_vm0, %v6140_v26, %v6139_v23  ;;  %v6147_v59 = vld [vmem:[#allocation51_spill] sm:$0xff] }
 0x6d7   :  { %v5476_v6 = vsel %vm164_vm0, %v6133_v24, %v6132_v63  ;;  %v5481_v12 = vsel %vm164_vm0, %v6132_v63, %v6135_v9  ;;  %6141 = vst [vmem:[#allocation10_spill] sm:$0xff] %v5493_v22  ;;  %v6142_v24 = vld [vmem:[#allocation41_spill] sm:$0xff]  ;;  %v6144_v63 = vld [vmem:[#allocation46_spill] sm:$0xff]  ;;  %v6148_v47 = vld [vmem:[#allocation16_spill] sm:$0xff] }
 0x6d8   :  { %6134 = vst [vmem:[#allocation8_spill] sm:$0xff] %v5476_v6  ;;  %6136 = vst [vmem:[#allocation19_spill] sm:$0xff] %v5481_v12  ;;  %v5498_v6 = vsel %vm164_vm0, %v6139_v23, %v6142_v24  ;;  %v6145_v9 = vld [vmem:[#allocation14_spill] sm:$0xff]  ;;  %v1868_v20 = vsel %vm195_vm2, %v6148_v47, %v6147_v59  ;;  %v5511_v16 = vsel %vm206_vm15, %v6144_v63, %v6149_v32  ;;  %v6151_v26 = vld [vmem:[#allocation53_spill] sm:$0xff] }
 0x6d9   :  { %6143 = vst [vmem:[#allocation24_spill] sm:$0xff] %v5498_v6  ;;  %v5503_v12 = vsel %vm206_vm15, %v6145_v9, %v6144_v63  ;;  %6150 = vst [vmem:[#allocation9_spill] sm:$0xff] %v5511_v16  ;;  %v6152_v22 = vld [vmem:[#allocation13_spill] sm:$0xff]  ;;  %v1926_v9 = vsel %vm265_vm11, %v1868_v20, %v1881_v11  ;;  %v6155_v47 = vld [vmem:[#allocation54_spill] sm:$0xff] }
 0x6da   :  { %6146 = vst [vmem:[#allocation31_spill] sm:$0xff] %v5503_v12  ;;  %v1894_v37 = vsel %vm223_vm14, %v6152_v22, %v6151_v26  ;;  %v6153_v23 = vld [vmem:[#allocation57_spill] sm:$0xff]  ;;  %v6154_v12 = vld [vmem:[#allocation50_spill] sm:$0xff]  ;;  %v2280_v61 = vsel %vm223_vm14, %v6156_v25, %v6155_v47  ;;  %v6161_v11 = vld [vmem:[#allocation67_spill] sm:$0xff] }
 0x6db   :  { %v1869_v24 = vsel %vm195_vm2, %v6147_v59, %v6153_v23  ;;  %v1895_v6 = vsel %vm223_vm14, %v6151_v26, %v6154_v12  ;;  %v6157_v32 = vld [vmem:[#allocation61_spill] sm:$0xff]  ;;  %v6160_v23 = vld [vmem:[#allocation60_spill] sm:$0xff]  ;;  %v6162_v12 = vld [vmem:[#allocation23_spill] sm:$0xff]  ;;  %v1822_v25 = vsel %vm262_vm10, %v6161_v11, %v6163_v10 }
 0x6dc   :  { %v2281_v63 = vsel %vm223_vm14, %v6155_v47, %v6157_v32  ;;  %v1927_v22 = vsel %vm265_vm11, %v1869_v24, %v1882_v34  ;;  %v6158_v16 = vld [vmem:[#allocation65_spill] sm:$0xff]  ;;  %v1821_v26 = vsel %vm262_vm10, %v6162_v12, %v6161_v11  ;;  %v6164_v32 = vld [vmem:[#allocation63_spill] sm:$0xff]  ;;  %v6165_v34 = vld [vmem:[#allocation20_spill] sm:$0xff]  ;;  %v1923_v51 = vsel %vm265_vm11, %v1822_v25, %v1828_v3 }
 0x6dd   :  { %v2267_v59 = vsel %vm206_vm15, %v6159_v55, %v6158_v16  ;;  %v2268_v20 = vsel %vm206_vm15, %v6158_v16, %v6160_v23  ;;  %v2254_v24 = vsel %vm195_vm2, %v6165_v34, %v6164_v32  ;;  %v6166_v55 = vld [vmem:[#allocation25_spill] sm:$0xff]  ;;  %v2255_v12 = vsel %vm195_vm2, %v6164_v32, %v6167_v19  ;;  %v6172_v32 = vld [vmem:[#allocation72_spill] sm:$0xff]  ;;  %v6176_v25 = vld [vmem:[#allocation74_spill] sm:$0xff] }
 0x6de   :  { %v1808_v52 = vsel %vm248_vm12, %v6166_v55, %v4980_v57  ;;  %v6169_v10 = vld [vmem:[#allocation21_spill] sm:$0xff]  ;;  %v2207_v34 = vsel %vm262_vm10, %v6171_v30, %v6170_v28  ;;  %v2213_v55 = vrot.slane %v5392_v54, 4  ;;  %v1922_v19 = vsel %vm265_vm11, %v1821_v26, %v1827_v39 }
 0x6df   :  { %v1798_v11 = vsel %vm237_vm13, %v6169_v10, %v6168_v42  ;;  %v1809_v10 = vsel %vm248_vm12, %v4980_v57, %v6172_v32  ;;  %v6183_v32 = vld [vmem:[#allocation26_spill] sm:$0xff] }
 0x6e0   :  { %v2308_v26 = vsel %vm265_vm11, %v2207_v34, %v2213_v55  ;;  %v6179_v34 = vld [vmem:[#allocation62_spill] sm:$0xff] }
 0x6ff   :  { %v2344_v8 = vpop.permute.xlu0 %2343  ;;  %v1958_v56 = vpop.permute.xlu1 %1957 }
 0x707   :  { %v5486_v48 = vpop.permute.xlu0 %3099  ;;  %v5488_v18 = vpop.permute.xlu1 %2721 }
 0x708   :  { %6138 = vst [vmem:[#allocation27_spill] sm:$0xff] %v5486_v48  ;;  %v6173_v48 = vld [vmem:[#allocation55_spill] sm:$0xff] }
 0x709   :  { %v1910_v30 = vsel %vm237_vm13, %v6173_v48, %v5226_v13  ;;  %v2208_v13 = vsel %vm262_vm10, %v6170_v28, %v6176_v25  ;;  %v2214_v48 = vrot.slane %v5386_v29, 4  ;;  %v6178_v28 = vld [vmem:[#allocation78_spill] sm:$0xff]  ;;  %v6181_v29 = vld [vmem:[#allocation76_spill] sm:$0xff]  ;;  %v2172_v25 = vsel %vm223_vm14, %v5340_v53, %v5342_v17 }
 0x70b   :  { %v1956_v40 = vpop.permute.xlu0 %1955  ;;  %v2342_v47 = vpop.permute.xlu1 %2341 }
 0x70c   :  { %v1960_v16 = vsel %vm248_vm12, %v1956_v40, %v1958_v56  ;;  %v2346_v23 = vsel %vm248_vm12, %v2342_v47, %v2344_v8  ;;  %v2313_v56 = vsel %vm265_vm11, %v2255_v12, %v2268_v20  ;;  %v2312_v8 = vsel %vm265_vm11, %v2254_v24, %v2267_v59  ;;  %v6175_v24 = vld [vmem:[#allocation70_spill] sm:$0xff]  ;;  %v6177_v12 = vld [vmem:[#allocation73_spill] sm:$0xff] }
 0x70d   :  { %1986 = vmatprep.subr.mxu0 %v1960_v16  ;;  %2363 = vmatprep.subr.mxu1 %v2346_v23  ;;  %v6174_v16 = vld [vmem:[#allocation56_spill] sm:$0xff]  ;;  %v1920_v59 = vsel %vm265_vm11, %v1798_v11, %v1808_v52  ;;  %v1799_v39 = vsel %vm237_vm13, %v6168_v42, %v6175_v24  ;;  %v2315_v52 = vsel %vm265_vm11, %v2281_v63, %v5256_v49  ;;  %v6187_v24 = vld [vmem:[#allocation77_spill] sm:$0xff] }
 0x70e   :  { %v2296_v54 = vsel %vm237_vm13, %v6174_v16, %v5252_v36  ;;  %v1929_v36 = vsel %vm265_vm11, %v1895_v6, %v5242_v50  ;;  %v2195_v11 = vsel %vm248_vm12, %v6178_v28, %v6177_v12  ;;  %v1855_v50 = vsel %vm178_vm1, %v6179_v34, %v5250_v7  ;;  %v6180_v49 = vld [vmem:[#allocation68_spill] sm:$0xff] }
 0x70f   :  { %v1954_v23 = vpop.permute.xlu0 %1953  ;;  %v2340_v20 = vpop.permute.xlu1 %2339  ;;  %v2314_v42 = vsel %vm265_vm11, %v2280_v61, %v2296_v54  ;;  %v2241_v6 = vsel %vm178_vm1, %v6180_v49, %v5261_v27  ;;  %v6182_v61 = vld [vmem:[#allocation29_spill] sm:$0xff]  ;;  %v2309_v7 = vsel %vm265_vm11, %v2208_v13, %v2214_v48  ;;  %v1925_v16 = vsel %vm265_vm11, %v5438_v2, %v5265_v62  ;;  %v6191_v13 = vld [vmem:[#allocation84_spill] sm:$0xff] }
 0x710   :  { %v1959_v3 = vsel %vm248_vm12, %v1954_v23, %v1956_v40  ;;  %v2345_v57 = vsel %vm248_vm12, %v2340_v20, %v2342_v47  ;;  %v1928_v40 = vsel %vm265_vm11, %v1894_v37, %v1910_v30  ;;  %v1921_v47 = vsel %vm265_vm11, %v1799_v39, %v1809_v10  ;;  %v6184_v30 = vld [vmem:[#allocation71_spill] sm:$0xff]  ;;  %v6194_v48 = vld [vmem:[#allocation81_spill] sm:$0xff] }
 0x711   :  { %1987 = vmatpush1.msra.mxu0 %v1959_v3  ;;  %2364 = vmatpush1.msra.mxu1 %v2345_v57  ;;  %v2184_v55 = vsel %vm237_vm13, %v6182_v61, %v6181_v29  ;;  %v2194_v10 = vsel %vm248_vm12, %v6183_v32, %v6178_v28  ;;  %v2185_v27 = vsel %vm237_vm13, %v6181_v29, %v6184_v30  ;;  %v6190_v3 = vld [vmem:[#allocation83_spill] sm:$0xff]  ;;  %v6195_v28 = vld [vmem:[#allocation85_spill] sm:$0xff]  ;;  %v6202_v61 = vld [vmem:[#allocation48_spill] sm:$0xff] }
 0x712   :  { %1988 = vmatprep.subr.mxu0 %v1929_v36  ;;  %2365 = vmatprep.subr.mxu1 %v2315_v52  ;;  %v2311_v54 = vsel %vm265_vm11, %v5448_v15, %v5279_v0  ;;  %v2307_v23 = vsel %vm265_vm11, %v2185_v27, %v2195_v11  ;;  %v6188_v15 = vld [vmem:[#allocation82_spill] sm:$0xff]  ;;  %v2171_v12 = vsel %vm223_vm14, %v6194_v48, %v5340_v53  ;;  %v5704_v27 = vld [vmem:[%s5897_s5] sm:$0xff] }
 0x713   :  { %v5600_v63 = vpop.permute.xlu0 %2905  ;;  %1989 = vmatpush1.msra.mxu0 %v1928_v40  ;;  %2366 = vmatpush1.msra.mxu1 %v2314_v42  ;;  %v5602_v37 = vpop.permute.xlu1 %2921  ;;  %v1731_v57 = vsel %vm164_vm0, %v6188_v15, %v6190_v3  ;;  %v6192_v36 = vld [vmem:[#allocation30_spill] sm:$0xff]  ;;  %v6193_v40 = vld [vmem:[#allocation75_spill] sm:$0xff]  ;;  %v2130_v17 = vsel %vm178_vm1, %v6191_v13, %v6195_v28  ;;  %v2146_v34 = vsel %vm195_vm2, %v5344_v35, %v5346_v5  ;;  %v6198_v5 = vld [vmem:[#allocation88_spill] sm:$0xff] }
 0x714   :  { %1990 = vmatprep.subr.mxu0 %v1927_v22  ;;  %2367 = vmatprep.subr.mxu1 %v2313_v56  ;;  %v1924_v22 = vsel %vm265_vm11, %v5433_v46, %v1855_v50  ;;  %v2310_v56 = vsel %vm265_vm11, %v5443_v58, %v2241_v6  ;;  %v2306_v46 = vsel %vm265_vm11, %v2184_v55, %v2194_v10  ;;  %v6189_v58 = vld [vmem:[#allocation35_spill] sm:$0xff]  ;;  %v6200_v6 = vld [vmem:[#allocation32_spill] sm:$0xff] }
 0x715   :  { %1991 = vmatpush1.msra.mxu0 %v1926_v9  ;;  %2368 = vmatpush1.msra.mxu1 %v2312_v8  ;;  %v6185_v9 = vld [vmem:[#allocation80_spill] sm:$0xff]  ;;  %v6186_v8 = vld [vmem:[#allocation33_spill] sm:$0xff]  ;;  %v1730_v39 = vsel %vm164_vm0, %v6189_v58, %v6188_v15  ;;  %v2129_v52 = vsel %vm178_vm1, %v6192_v36, %v6191_v13  ;;  %v1785_v42 = vsel %vm223_vm14, %v6193_v40, %v5283_v4  ;;  %v6197_v4 = vld [vmem:[#allocation86_spill] sm:$0xff] }
 0x716   :  { %1992 = vmatprep.subr.mxu0 %v1925_v16  ;;  %2369 = vmatprep.subr.mxu1 %v2311_v54  ;;  %v1743_v20 = vsel %vm178_vm1, %v6186_v8, %v6185_v9  ;;  %v1744_v62 = vsel %vm178_vm1, %v6185_v9, %v6187_v24  ;;  %v2145_v53 = vsel %vm195_vm2, %v6197_v4, %v5344_v35  ;;  %v6203_v54 = vld [vmem:[#allocation27_spill] sm:$0xff]  ;;  %v6207_v8 = vld [vmem:[#allocation93_spill] sm:$0xff]  ;;  %v6212_v58 = vld [vmem:[#allocation116_spill] sm:$0xff] }
 0x717   :  { %v5631_v2 = vpop.permute.xlu0 %2490  ;;  %1993 = vmatpush1.msra.mxu0 %v1924_v22  ;;  %2370 = vmatpush1.msra.mxu1 %v2310_v56  ;;  %v5633_v0 = vpop.permute.xlu1 %2492  ;;  %v2305_v50 = vsel %vm265_vm11, %v5471_v1, %v2172_v25  ;;  %v1918_v35 = vsel %vm265_vm11, %v5453_v14, %v1785_v42  ;;  %v2303_v1 = vsel %vm265_vm11, %v2130_v17, %v2146_v34  ;;  %v6204_v22 = vld [vmem:[#allocation90_spill] sm:$0xff]  ;;  %v6215_v25 = vld [vmem:[#allocation39_spill] sm:$0xff]  ;;  %v6216_v36 = vld [vmem:[#allocation101_spill] sm:$0xff] }
 0x718   :  { %1994 = vmatprep.subr.mxu0 %v1923_v51  ;;  %2371 = vmatprep.subr.mxu1 %v2309_v7  ;;  %v6196_v51 = vld [vmem:[#allocation79_spill] sm:$0xff]  ;;  %v1914_v30 = vsel %vm265_vm11, %v5404_v44, %v1730_v39  ;;  %v6205_v56 = vld [vmem:[#allocation34_spill] sm:$0xff]  ;;  %v6213_v39 = vld [vmem:[#allocation117_spill] sm:$0xff] }
 0x719   :  { %1995 = vmatpush1.msra.mxu0 %v1922_v19  ;;  %2372 = vmatpush1.msra.mxu1 %v2308_v26  ;;  %v1759_v11 = vsel %vm195_vm2, %v6196_v51, %v5301_v41  ;;  %v1919_v41 = vsel %vm265_vm11, %v5458_v43, %v5289_v45  ;;  %v1917_v45 = vsel %vm265_vm11, %v1744_v62, %v5309_v21  ;;  %v6201_v43 = vld [vmem:[#allocation47_spill] sm:$0xff]  ;;  %v6210_v62 = vld [vmem:[#allocation92_spill] sm:$0xff]  ;;  %v6219_v17 = vld [vmem:[#allocation105_spill] sm:$0xff] }
 0x71a   :  { %1996 = vmatprep.subr.mxu0 %v1921_v47  ;;  %2373 = vmatprep.subr.mxu1 %v2307_v23  ;;  %v6199_v47 = vld [vmem:[#allocation87_spill] sm:$0xff]  ;;  %v5691_v55 = vsel %vm206_vm15, %v6202_v61, %v6201_v43  ;;  %v1916_v14 = vsel %vm265_vm11, %v1743_v20, %v1759_v11  ;;  %v1915_v21 = vsel %vm265_vm11, %v5396_v33, %v1731_v57  ;;  %v6206_v23 = vld [vmem:[#allocation89_spill] sm:$0xff]  ;;  %v6208_v20 = vld [vmem:[#allocation36_spill] sm:$0xff] }
 0x71b   :  { %v5666_v19 = vpop.permute.xlu0 %2881  ;;  %1997 = vmatpush1.msra.mxu0 %v1920_v59  ;;  %2374 = vmatpush1.msra.mxu1 %v2306_v46  ;;  %v5668_v26 = vpop.permute.xlu1 %2883  ;;  %v2117_v49 = vsel %vm164_vm0, %v6199_v47, %v6198_v5  ;;  %v2304_v59 = vsel %vm265_vm11, %v5463_v38, %v2171_v12  ;;  %v2116_v29 = vsel %vm164_vm0, %v6200_v6, %v6199_v47  ;;  %v6211_v46 = vld [vmem:[#allocation115_spill] sm:$0xff]  ;;  %v6214_v57 = vld [vmem:[#allocation94_spill] sm:$0xff] }
 0x71c   :  { %1998 = vmatprep.subr.mxu0 %v1919_v41  ;;  %2375 = vmatprep.subr.mxu1 %v2305_v50  ;;  %v2302_v38 = vsel %vm265_vm11, %v2129_v52, %v2145_v53  ;;  %v2301_v7 = vsel %vm265_vm11, %v5400_v31, %v2117_v49  ;;  %v2300_v16 = vsel %vm265_vm11, %v5408_v60, %v2116_v29  ;;  %v6209_v60 = vld [vmem:[#allocation114_spill] sm:$0xff]  ;;  %v6217_v52 = vld [vmem:[#allocation44_spill] sm:$0xff]  ;;  %v6218_v42 = vld [vmem:[#allocation95_spill] sm:$0xff]  ;;  %v6221_v53 = vmov 0.0  }
 0x71d   :  { %1999 = vmatpush1.msra.mxu0 %v1918_v35  ;;  %2376 = vmatpush1.msra.mxu1 %v2304_v59  ;;  %v2658_v44 = vsel %vm223_vm14, %v6205_v56, %v6204_v22  ;;  %v2659_v9 = vsel %vm223_vm14, %v6204_v22, %v6206_v23  ;;  %v2645_v24 = vsel %vm206_vm15, %v6208_v20, %v6207_v8  ;;  %v6220_v51 = vld [vmem:[#allocation43_spill] sm:$0xff]  ;;  %v6222_v50 = vld [vmem:[#allocation97_spill] sm:$0xff]  ;;  %v6223_v49 = vld [vmem:[#allocation128_spill] sm:$0xff] }
 0x71e   :  { %2000 = vmatprep.subr.mxu0 %v1917_v45  ;;  %2377 = vmatprep.subr.mxu1 %v2303_v1  ;;  %v2675_v15 = vsel %vm237_vm13, %v6209_v60, %v6211_v46  ;;  %v3053_v3 = vsel %vm237_vm13, %v6213_v39, %v6212_v58  ;;  %v3036_v13 = vsel %vm223_vm14, %v6215_v25, %v6214_v57  ;;  %v2592_v35 = vrot.slane %v6223_v49, 4  ;;  %v6224_v59 = vld [vmem:[#allocation119_spill] sm:$0xff]  ;;  %v6225_v6 = vld [vmem:[#allocation118_spill] sm:$0xff]  ;;  %v6226_v45 = vld [vmem:[#allocation121_spill] sm:$0xff] }
 0x71f   :  { %v2720_v32 = vpop.permute.xlu0 %2719  ;;  %2001 = vmatpush1.msra.mxu0 %v1916_v14  ;;  %2378 = vmatpush1.msra.mxu1 %v2302_v38  ;;  %v3098_v10 = vpop.permute.xlu1 %3097  ;;  %v2585_v40 = vsel %vm262_vm10, %v6217_v52, %v6216_v36  ;;  %v3052_v48 = vsel %vm237_vm13, %v6218_v42, %v6213_v39  ;;  %v2963_v11 = vsel %vm262_vm10, %v6220_v51, %v6219_v17  ;;  %v6227_v1 = vld [vmem:[#allocation120_spill] sm:$0xff]  ;;  %v6228_v38 = vld [vmem:[#allocation130_spill] sm:$0xff]  ;;  %v6233_v56 = vld [vmem:[#allocation131_spill] sm:$0xff] }
 0x720   :  { %2002 = vmatprep.subr.mxu0 %v1915_v21  ;;  %2379 = vmatprep.subr.mxu1 %v2301_v7  ;;  %v2724_v33 = vsel %vm248_vm12, %v2720_v32, %v5488_v18  ;;  %v3102_v31 = vsel %vm248_vm12, %v3098_v10, %v6203_v54  ;;  %v2674_v18 = vsel %vm237_vm13, %v6210_v62, %v6209_v60  ;;  %v6230_v21 = vld [vmem:[#allocation37_spill] sm:$0xff]  ;;  %v6234_v23 = vld [vmem:[#allocation96_spill] sm:$0xff]  ;;  %v6236_v20 = vld [vmem:[#allocation102_spill] sm:$0xff] }
 0x721   :  { %2003 = vmatpush1.msra.mxu0 %v1914_v30  ;;  %2380 = vmatpush1.msra.mxu1 %v2300_v16  ;;  %v2693_v41 = vsel %vm265_vm11, %v2659_v9, %v2675_v15  ;;  %v3071_v5 = vsel %vm265_vm11, %v6222_v50, %v3053_v3  ;;  %v2692_v47 = vsel %vm265_vm11, %v2658_v44, %v2674_v18  ;;  %v6231_v30 = vld [vmem:[#allocation98_spill] sm:$0xff]  ;;  %v2969_v44 = vrot.slane %v6233_v56, 4  ;;  %v6235_v9 = vld [vmem:[#allocation99_spill] sm:$0xff]  ;;  %v6237_v18 = vld [vmem:[#allocation100_spill] sm:$0xff] }
 0x722   :  { %3303 = vmatmul.mubr.msk.f32.vlgmr.msra.gmra.mxu0 %vm1968_vm4, %v5704_v27  ;;  %3304 = vmatmul.mubr.msk.f32.vlgmr.msra.gmra.mxu1 %vm1968_vm4, %v5704_v27  ;;  %v2620_v29 = vsel %vm178_vm1, %v6225_v6, %v6224_v59  ;;  %v2998_v43 = vsel %vm178_vm1, %v6227_v1, %v6226_v45  ;;  %v3070_v14 = vsel %vm265_vm11, %v3036_v13, %v3052_v48  ;;  %v6238_v46 = vld [vmem:[#allocation19_spill] sm:$0xff]  ;;  %v6239_v58 = vld [vmem:[#allocation24_spill] sm:$0xff]  ;;  %v6240_v3 = vld [vmem:[#allocation129_spill] sm:$0xff] }
 0x723   :  { %2741 = vmatprep.subr.mxu0 %v2724_v33  ;;  %3119 = vmatprep.subr.mxu1 %v3102_v31  ;;  %v2718_v12 = vpop.permute.xlu0 %2717  ;;  %v3096_v28 = vpop.permute.xlu1 %3095  ;;  %v2619_v16 = vsel %vm178_vm1, %v6231_v30, %v6225_v6  ;;  %v6232_v33 = vld [vmem:[#allocation103_spill] sm:$0xff]  ;;  %v2687_v60 = vsel %vm265_vm11, %v6236_v20, %v2592_v35  ;;  %v2689_v15 = vsel %vm265_vm11, %v6238_v46, %v2620_v29  ;;  %v2970_v57 = vrot.slane %v6240_v3, 4  ;;  %v6241_v13 = vld [vmem:[#allocation122_spill] sm:$0xff]  ;;  %v6243_v52 = vld [vmem:[#allocation8_spill] sm:$0xff] }
 0x724   :  { %v2723_v34 = vsel %vm248_vm12, %v2718_v12, %v2720_v32  ;;  %v3101_v4 = vsel %vm248_vm12, %v3096_v28, %v3098_v10  ;;  %2791 = vmatprep.mubr.f32.mxu0 %v6221_v53  ;;  %3169 = vmatprep.mubr.f32.mxu1 %v6221_v53  ;;  %v2591_v32 = vrot.slane %v6228_v38, 4  ;;  %v6229_v10 = vld [vmem:[#allocation91_spill] sm:$0xff]  ;;  %v2997_v54 = vsel %vm178_vm1, %v6232_v33, %v6227_v1  ;;  %v6244_v42 = vld [vmem:[#allocation10_spill] sm:$0xff]  ;;  %v6246_v17 = vld [vmem:[#allocation125_spill] sm:$0xff] }
 0x725   :  { %2742 = vmatpush1.msra.mxu0 %v2723_v34  ;;  %3120 = vmatpush1.msra.mxu1 %v3101_v4  ;;  %v2632_v7 = vsel %vm195_vm2, %v6230_v21, %v6229_v10  ;;  %v3067_v39 = vsel %vm265_vm11, %v6239_v58, %v2998_v43  ;;  %v3064_v25 = vsel %vm265_vm11, %v2963_v11, %v2969_v44  ;;  %v6245_v12 = vld [vmem:[#allocation123_spill] sm:$0xff]  ;;  %v6247_v51 = vld [vmem:[#allocation124_spill] sm:$0xff]  ;;  %v6252_v6 = vld [vmem:[#allocation49_spill] sm:$0xff] }
 0x726   :  { %2743 = vmatprep.subr.mxu0 %v2693_v41  ;;  %3121 = vmatprep.subr.mxu1 %v3071_v5  ;;  %v2690_v8 = vsel %vm265_vm11, %v2632_v7, %v2645_v24  ;;  %v2686_v62 = vsel %vm265_vm11, %v2585_v40, %v2591_v32  ;;  %v6242_v24 = vld [vmem:[#allocation108_spill] sm:$0xff]  ;;  %v2688_v40 = vsel %vm265_vm11, %v6243_v52, %v2619_v16  ;;  %v6248_v53 = vld [vmem:[#allocation107_spill] sm:$0xff]  ;;  %v6250_v5 = vld [vmem:[#allocation126_spill] sm:$0xff] }
 0x727   :  { %v2898_v31 = vpop.permute.xlu0 %2897  ;;  %2744 = vmatpush1.msra.mxu0 %v2692_v47  ;;  %3122 = vmatpush1.msra.mxu1 %v3070_v14  ;;  %v2900_v22 = vpop.permute.xlu1 %2899  ;;  %v2549_v36 = vsel %vm223_vm14, %v6242_v24, %v6241_v13  ;;  %v3066_v48 = vsel %vm265_vm11, %v6244_v42, %v2997_v54  ;;  %v2550_v28 = vsel %vm223_vm14, %v6241_v13, %v6245_v12  ;;  %v6249_v50 = vld [vmem:[#allocation127_spill] sm:$0xff]  ;;  %v6253_v45 = vld [vmem:[#allocation113_spill] sm:$0xff]  ;;  %v6258_v10 = vld [vmem:[#allocation112_spill] sm:$0xff] }
 0x728   :  { %2745 = vmatprep.subr.mxu0 %v6234_v23  ;;  %3123 = vmatprep.subr.mxu1 %v6235_v9  ;;  %v2524_v11 = vsel %vm195_vm2, %v6247_v51, %v6246_v17  ;;  %v3065_v41 = vsel %vm265_vm11, %v6248_v53, %v2970_v57  ;;  %v2928_v47 = vsel %vm223_vm14, %v6250_v5, %v6249_v50  ;;  %v6251_v59 = vld [vmem:[#allocation111_spill] sm:$0xff]  ;;  %v6257_v38 = vld [vmem:[#allocation9_spill] sm:$0xff]  ;;  %v6259_v16 = vld [vmem:[#allocation104_spill] sm:$0xff] }
 0x729   :  { %2746 = vmatpush1.msra.mxu0 %v2690_v8  ;;  %3124 = vmatpush1.msra.mxu1 %v6237_v18  ;;  %v2911_v49 = vsel %vm206_vm15, %v5600_v63, %v6202_v61  ;;  %v2927_v35 = vsel %vm223_vm14, %v5602_v37, %v6250_v5  ;;  %v2507_v29 = vsel %vm178_vm1, %v6252_v6, %v6251_v59  ;;  %v6254_v43 = vld [vmem:[#allocation31_spill] sm:$0xff]  ;;  %v6255_v61 = vld [vmem:[#allocation106_spill] sm:$0xff]  ;;  %v6256_v37 = vld [vmem:[#allocation109_spill] sm:$0xff] }
 0x72a   :  { %2747 = vmatprep.subr.mxu0 %v2689_v15  ;;  %3125 = vmatprep.subr.mxu1 %v3067_v39  ;;  %v2523_v1 = vsel %vm195_vm2, %v6253_v45, %v6247_v51  ;;  %v2682_v14 = vsel %vm265_vm11, %v6254_v43, %v2549_v36  ;;  %v2902_v63 = vsel %vm195_vm2, %v2898_v31, %v2900_v22  ;;  %v6260_v33 = vld [vmem:[#allocation110_spill] sm:$0xff]  ;;  %v6261_v20 = vld [vmem:[#allocation5_spill] sm:$0xff]  ;;  %v6263_v18 = vld [vmem:[#allocation132_spill] sm:$0xff] }
 0x72b   :  { %v2489_v34 = vpop.permute.xlu0 %2488  ;;  %2748 = vmatpush1.msra.mxu0 %v2688_v40  ;;  %3126 = vmatpush1.msra.mxu1 %v3066_v48  ;;  %v2880_v4 = vpop.permute.xlu1 %2879  ;;  %v2683_v32 = vsel %vm265_vm11, %v6257_v38, %v2550_v28  ;;  %v2681_v21 = vsel %vm265_vm11, %v6258_v10, %v2524_v11  ;;  %v2495_v7 = vsel %vm164_vm0, %v5631_v2, %v5633_v0  ;;  %v6264_v46 = vld [vmem:[#allocation7_spill] sm:$0xff]  ;;  %v6265_v15 = vld [vmem:[#allocation4_spill] sm:$0xff]  ;;  %v6266_v39 = vld [vmem:[#allocation6_spill] sm:$0xff] }
 0x72c   :  { %2749 = vmatprep.subr.mxu0 %v2687_v60  ;;  %3127 = vmatprep.subr.mxu1 %v3065_v41  ;;  %v3061_v22 = vsel %vm265_vm11, %v5691_v55, %v2928_v47  ;;  %v3060_v56 = vsel %vm265_vm11, %v2911_v49, %v2927_v35  ;;  %v2886_v44 = vsel %vm178_vm1, %v5666_v19, %v5668_v26  ;;  %v6262_v60 = vld [vmem:[#allocation3_spill] sm:$0xff] }
 0x72d   :  { %2750 = vmatpush1.msra.mxu0 %v2686_v62  ;;  %3128 = vmatpush1.msra.mxu1 %v3064_v25  ;;  %v2885_v23 = vsel %vm178_vm1, %v2880_v4, %v5666_v19  ;;  %v2494_v9 = vsel %vm164_vm0, %v2489_v34, %v5631_v2  ;;  %v3059_v55 = vsel %vm265_vm11, %v2886_v44, %v2902_v63 }
 0x72e   :  { %2751 = vmatprep.subr.mxu0 %v6255_v61  ;;  %3129 = vmatprep.subr.mxu1 %v6256_v37  ;;  %v2680_v26 = vsel %vm265_vm11, %v2507_v29, %v2523_v1  ;;  %v2436_v19 = vmul.f32 %v6262_v60, %v6261_v20  ;;  %v2679_v2 = vsel %vm265_vm11, %v6263_v18, %v2495_v7  ;;  %v3223_v18 = vld [vmem:[%s5898_s7] sm:$0xff] }
 0x72f   :  { %v2896_v30 = vpop.permute.xlu0 %2895  ;;  %2752 = vmatpush1.msra.mxu0 %v6259_v16  ;;  %3130 = vmatpush1.msra.mxu1 %v6260_v33  ;;  %v2869_v54 = vpop.permute.xlu1 %2868  ;;  %v2815_v58 = vmul.f32 %v6265_v15, %v6264_v46  ;;  %v2814_v3 = vmul.f32 %v6262_v60, %v6266_v39  ;;  %v3227_v15 = vld [vmem:[%s5899_s8] sm:$0xff] }
 0x730   :  { %v2901_v0 = vsel %vm195_vm2, %v2896_v30, %v2898_v31  ;;  %2753 = vmatprep.subr.mxu0 %v2683_v32  ;;  %3131 = vmatprep.subr.mxu1 %v3061_v22  ;;  %v2678_v13 = vsel %vm265_vm11, %v2436_v19, %v2494_v9 }
 0x731   :  { %2754 = vmatpush1.msra.mxu0 %v2682_v14  ;;  %3132 = vmatpush1.msra.mxu1 %v3060_v56  ;;  %v3058_v8 = vsel %vm265_vm11, %v2885_v23, %v2901_v0 }
 0x732   :  { %2755 = vmatprep.subr.mxu0 %v2681_v21  ;;  %3133 = vmatprep.subr.mxu1 %v3059_v55 }
 0x733   :  { %v2871_v62 = vpop.permute.xlu0 %2870  ;;  %2756 = vmatpush1.msra.mxu0 %v2680_v26  ;;  %3134 = vmatpush1.msra.mxu1 %v3058_v8  ;;  %v2867_v31 = vpop.permute.xlu1 %2866 }
 0x734   :  { %v2873_v57 = vsel %vm164_vm0, %v2869_v54, %v2871_v62  ;;  %v2872_v25 = vsel %vm164_vm0, %v2867_v31, %v2869_v54  ;;  %2757 = vmatprep.subr.mxu0 %v2679_v2 }
 0x735   :  { %2758 = vmatpush1.msra.mxu0 %v2678_v13  ;;  %v3057_v24 = vsel %vm265_vm11, %v2815_v58, %v2873_v57  ;;  %v3056_v36 = vsel %vm265_vm11, %v2814_v3, %v2872_v25 }
 0x736   :  { %3307 = vmatmul.mubr.msk.f32.vlgmr.msra.gmra.mxu0 %vm1968_vm4, %v5704_v27  ;;  %3135 = vmatprep.subr.mxu1 %v3057_v24 }
 0x737   :  { %3136 = vmatpush1.msra.mxu1 %v3056_v36 }
 0x738   :  { %3310 = vmatmul.mubr.msk.f32.vlgmr.msra.gmra.mxu1 %vm1968_vm4, %v5704_v27 }
 0x740   :  { %v1966_v42 = vpop.permute.xlu0 %1965 }
 0x7e2   :  { %v2038_v52 = vpop.f32.mrf.mxu0  ;;  %v2415_v40 = vpop.f32.mrf.mxu1 }
 0x7e3   :  { %v2039_v28 = vadd.f32 %v2038_v52, %v1966_v42  ;;  %v2416_v17 = vadd.f32 %v2415_v40, %v1966_v42 }
 0x7e4   :  { %v2040_v48 = vpop.f32.mrf.mxu0  ;;  %v2417_v12 = vpop.f32.mrf.mxu1 }
 0x7e5   :  { %v2041_v51 = vadd.f32 %v2040_v48, %v1966_v42  ;;  %v2418_v11 = vadd.f32 %v2417_v12, %v1966_v42  ;;  %v3187_v53 = vadd.f32 %v2416_v17, %v2039_v28 }
 0x7e7   :  { %v3190_v35 = vadd.f32 %v2418_v11, %v2041_v51 }
 0x7f6   :  { %v2793_v34 = vpop.f32.mrf.mxu0 }
 0x7f7   :  { %v2794_v4 = vadd.f32 %v2793_v34, %v1966_v42 }
 0x7f8   :  { %v2795_v41 = vpop.f32.mrf.mxu0  ;;  %v3171_v50 = vpop.f32.mrf.mxu1 }
 0x7f9   :  { %v2796_v5 = vadd.f32 %v2795_v41, %v1966_v42  ;;  %v3172_v47 = vadd.f32 %v3171_v50, %v1966_v42  ;;  %v3188_v49 = vadd.f32 %v3187_v53, %v2794_v4 }
 0x7fa   :  { %v3173_v59 = vpop.f32.mrf.mxu1 }
 0x7fb   :  { %v3174_v27 = vadd.f32 %v3173_v59, %v1966_v42  ;;  %v3191_v6 = vadd.f32 %v3190_v35, %v2796_v5  ;;  %v3189_v29 = vadd.f32 %v3188_v49, %v3172_v47 }
 0x7fd   :  { %v3192_v45 = vadd.f32 %v3191_v6, %v3174_v27 }
 0x7ff   :  { %v3193_v1 = vadd.f32 %v3192_v45, %v3189_v29 }
 0x801   :  { %3194 = vadd.xlane.f32.xlu1 %v3193_v1 }
 0x88a   :  { %v3195_v43 = vpop.xlane.xlu1 %3194 }
 0x88b   :  { %v3196_v14 = vmul.f32 0.0009765625, %v3195_v43 }
 0x88d   :  { %v3197_v63 = vsub.f32 %v2039_v28, %v3196_v14  ;;  %v3198_v61 = vsub.f32 %v2041_v51, %v3196_v14  ;;  %v3199_v37 = vsub.f32 %v2416_v17, %v3196_v14  ;;  %v3200_v38 = vsub.f32 %v2418_v11, %v3196_v14 }
 0x88e   :  { %v3201_v32 = vsub.f32 %v2794_v4, %v3196_v14  ;;  %v3202_v10 = vsub.f32 %v2796_v5, %v3196_v14  ;;  %v3203_v21 = vsub.f32 %v3172_v47, %v3196_v14  ;;  %v3204_v7 = vsub.f32 %v3174_v27, %v3196_v14 }
 0x88f   :  { %v3205_v30 = vmul.f32 %v3197_v63, %v3197_v63  ;;  %v3206_v16 = vmul.f32 %v3198_v61, %v3198_v61  ;;  %v3207_v33 = vmul.f32 %v3199_v37, %v3199_v37  ;;  %v3208_v54 = vmul.f32 %v3200_v38, %v3200_v38 }
 0x890   :  { %v3209_v22 = vmul.f32 %v3201_v32, %v3201_v32  ;;  %v3210_v56 = vmul.f32 %v3202_v10, %v3202_v10  ;;  %v3211_v0 = vmul.f32 %v3203_v21, %v3203_v21  ;;  %v3212_v9 = vmul.f32 %v3204_v7, %v3204_v7 }
 0x891   :  { %v3213_v44 = vadd.f32 %v3207_v33, %v3205_v30  ;;  %v3216_v23 = vadd.f32 %v3208_v54, %v3206_v16 }
 0x893   :  { %v3214_v55 = vadd.f32 %v3213_v44, %v3209_v22  ;;  %v3217_v8 = vadd.f32 %v3216_v23, %v3210_v56 }
 0x895   :  { %v3215_v26 = vadd.f32 %v3214_v55, %v3211_v0  ;;  %v3218_v20 = vadd.f32 %v3217_v8, %v3212_v9 }
 0x897   :  { %v3219_v60 = vadd.f32 %v3218_v20, %v3215_v26 }
 0x899   :  { %3220 = vadd.xlane.f32.xlu0 %v3219_v60 }
 0x922   :  { %v3221_v19 = vpop.xlane.xlu0 %3220 }
 0x923   :  { %v3222_v62 = vmul.f32 0.0009765625, %v3221_v19 }
 0x925   :  { %v3224_v31 = vadd.f32 1e-05, %v3222_v62 }
 0x927   :  { %3371 = vrsqrt.f32 %v3224_v31 }
 0x934   :  { %v3372_v2 = vpop.eup %3371 }
 0x935   :  { %v3226_v46 = vmul.f32 %v3372_v2, %v3223_v18 }
 0x937   :  { %3232 = vperm.xlu0 %3362, %v3226_v46   ;;  %v3228_v58 = vmul.f32 %v3226_v46, %v3196_v14 }
 0x939   :  { %v3229_v39 = vsub.f32 %v3227_v15, %v3228_v58 }
 0x93b   :  { %3245 = vperm.xlu1 %3361, %v3229_v39  }
 0x9b2   :  { %v3233_v3 = vpop.permute.xlu0 %3232 }
 0x9b3   :  { %v3235_v57 = vmul.f32 %v3233_v3, %v2039_v28  ;;  %v3236_v25 = vmul.f32 %v3233_v3, %v2041_v51  ;;  %v3237_v13 = vmul.f32 %v3233_v3, %v2416_v17  ;;  %v3238_v24 = vmul.f32 %v3233_v3, %v2418_v11 }
 0x9b4   :  { %v3239_v36 = vmul.f32 %v3233_v3, %v2794_v4  ;;  %v3240_v52 = vmul.f32 %v3233_v3, %v2796_v5  ;;  %v3241_v40 = vmul.f32 %v3233_v3, %v3172_v47  ;;  %v3242_v42 = vmul.f32 %v3233_v3, %v3174_v27 }
 0x9b6   :  { %v3246_v48 = vpop.permute.xlu1 %3245 }
 0x9b7   :  { %v3248_v12 = vadd.f32 %v3246_v48, %v3235_v57  ;;  %v3249_v34 = vadd.f32 %v3246_v48, %v3236_v25  ;;  %v3250_v53 = vadd.f32 %v3246_v48, %v3237_v13  ;;  %v3251_v41 = vadd.f32 %v3246_v48, %v3238_v24 }
 0x9b8   :  { %v3252_v50 = vadd.f32 %v3246_v48, %v3239_v36  ;;  %v3253_v49 = vadd.f32 %v3246_v48, %v3240_v52  ;;  %v3254_v35 = vadd.f32 %v3246_v48, %v3241_v40  ;;  %v3255_v59 = vadd.f32 %v3246_v48, %v3242_v42 }
 0x9b9   :  { %v3256_v6 = vmax.f32 %v3248_v12, 0.0  ;;  %v3257_v29 = vmax.f32 %v3249_v34, 0.0  ;;  %v3258_v45 = vmax.f32 %v3250_v53, 0.0  ;;  %v3259_v28 = vmax.f32 %v3251_v41, 0.0 }
 0x9ba   :  { %v3260_v51 = vmax.f32 %v3252_v50, 0.0  ;;  %v3261_v17 = vmax.f32 %v3253_v49, 0.0  ;;  %v3262_v11 = vmax.f32 %v3254_v35, 0.0  ;;  %v3263_v4 = vmax.f32 %v3255_v59, 0.0 }
 0x9bb   :  { %3264 = vst [vmem:[%s5900_s9] sm:$0xff] %v3256_v6  ;;  %3265 = vst [vmem:[%s5900_s9 + $0x8] sm:$0xff] %v3257_v29 }
 0x9bc   :  { %3266 = vst [vmem:[%s5900_s9 + $0x10] sm:$0xff] %v3258_v45  ;;  %3267 = vst [vmem:[%s5900_s9 + $0x18] sm:$0xff] %v3259_v28 }
 0x9bd   :  { %3268 = vst [vmem:[%s5900_s9 + $0x20] sm:$0xff] %v3260_v51  ;;  %3269 = vst [vmem:[%s5900_s9 + $0x28] sm:$0xff] %v3261_v17 }
 0x9be   :  { %3270 = vst [vmem:[%s5900_s9 + $0x30] sm:$0xff] %v3262_v11  ;;  %3271 = vst [vmem:[%s5900_s9 + $0x38] sm:$0xff] %v3263_v4 }

</bundles_post_ra>
